<compile_context>
chip_gen: v7x
topology: tpu7x:2x2x1
jax: 0.10.0
libtpu: 0.0.40
codegen_flags: <defaults>
</compile_context>

<pallas_src>
import jax
import jax.numpy as jnp
from jax.experimental import pallas as pl
from jax.experimental.pallas import tpu as pltpu

EPS = 1e-5
VMEM_LIMIT = 48 * 1024 * 1024


def _round_up(x, m):
    return (x + m - 1) // m * m


def _cp(sem):
    return pltpu.CompilerParams(dimension_semantics=sem,
                                vmem_limit_bytes=VMEM_LIMIT)


def _border_mask(rows, q0, H, W, Wp):
    """(rows, 1) f32 mask: 1 at true image pixels, 0 at zero-ring/alignment pad.

    Computed in-kernel from an iota over the flat pixel index (Wp is a power of
    two, so row/col extraction is shift/and only) -- no (Q,1) mask tensor is
    DMA'd or lane-padded in VMEM.
    """
    q = jax.lax.broadcasted_iota(jnp.int32, (rows, 1), 0) + q0
    y = q >> (Wp.bit_length() - 1)
    x = q & (Wp - 1)
    ok = (y >= 1) & (y <= H) & (x >= 1) & (x <= W)
    return jnp.where(ok, 1.0, 0.0)


def _shift_flat(x, off):
    """out[q] = x[q + off], zero fill at the ends.

    Only used on border-masked bf16 activations; the zero fill (and anything
    that would wrap) lands exclusively in border output rows, which are masked
    out of BN statistics and sliced away at stage exit.
    """
    if off == 0:
        return x
    q = x.shape[0]
    z = jnp.zeros((abs(off),) + x.shape[1:], x.dtype)
    if off > 0:
        return jnp.concatenate([x[off:], z], axis=0)
    return jnp.concatenate([z, x[:q + off]], axis=0)


def _stats_rows(h_f32, rows=8):
    """Sublane-full (8, C) partial BN stats: row0 = sum, row1 = sum of squares."""
    s0 = jnp.sum(h_f32, axis=0, keepdims=True)
    s1 = jnp.sum(h_f32 * h_f32, axis=0, keepdims=True)
    pad = jnp.zeros((rows - 2, h_f32.shape[-1]), jnp.float32)
    return jnp.concatenate([s0, s1, pad], axis=0)


def _bn_scale_bias(stats, gamma, beta, count):
    """Finish two-pass BN: global biased batch stats from per-image partials."""
    s = jnp.sum(stats, axis=0)                       # (8, C)
    mean = s[0] / count
    var = jnp.maximum(s[1] / count - mean * mean, 0.0)
    scale = gamma * jax.lax.rsqrt(var + EPS)          # (1, C)
    bias = beta - mean * scale                        # (1, C)
    return scale, bias


# ----------------------------- Pallas passes --------------------------------


def _call_conv1(x, w1, *, N, Q, TQ, Cp, Pp):
    """conv1 (1x1) matmul + bn1 partial stats (first block of a stage).

    Border rows/padded channels of x are exactly zero, so no stats mask here.
    """
    QT = Q // TQ

    def kernel(x_ref, w_ref, h_ref, st_ref):
        @pl.when(pl.program_id(1) == 0)
        def _():
            st_ref[...] = jnp.zeros_like(st_ref)
        hb = jnp.dot(x_ref[...], w_ref[...],
                     preferred_element_type=jnp.float32).astype(jnp.bfloat16)
        h_ref[...] = hb
        st_ref[...] += _stats_rows(hb.astype(jnp.float32))

    return pl.pallas_call(
        kernel,
        out_shape=(jax.ShapeDtypeStruct((N, Q, Pp), jnp.bfloat16),
                   jax.ShapeDtypeStruct((N, 8, Pp), jnp.float32)),
        grid=(N, QT),
        in_specs=[pl.BlockSpec((None, TQ, Cp), lambda n, q: (n, q, 0)),
                  pl.BlockSpec((Cp, Pp), lambda n, q: (0, 0))],
        out_specs=(pl.BlockSpec((None, TQ, Pp), lambda n, q: (n, q, 0)),
                   pl.BlockSpec((None, 8, Pp), lambda n, q: (n, 0, 0))),
        compiler_params=_cp(("parallel", "arbitrary")),
    )(x, w1)


def _call_bn3res_conv1(h3, res, s3, b3, w1, *, N, Q, TQ, Cp, Pp, H, W, Wp):
    """Fused: previous block's bn3-apply + residual + relu, materialize that
    block's output (bf16 -> becomes this block's residual), then this block's
    1x1 conv1 matmul + bn1 partial stats.  Saves one full HBM read of the
    (N, Q, C) activation per chained block."""
    QT = Q // TQ

    def kernel(h3_ref, r_ref, s_ref, b_ref, w_ref, h1_ref, out_ref, st_ref):
        qt = pl.program_id(1)

        @pl.when(qt == 0)
        def _():
            st_ref[...] = jnp.zeros_like(st_ref)

        a = jnp.maximum(
            h3_ref[...].astype(jnp.float32) * s_ref[...] + b_ref[...]
            + r_ref[...].astype(jnp.float32), 0.0)
        ab = a.astype(jnp.bfloat16)
        out_ref[...] = ab                      # previous block's output / new residual
        hb = jnp.dot(ab, w_ref[...],
                     preferred_element_type=jnp.float32).astype(jnp.bfloat16)
        h1_ref[...] = hb
        # border rows are garbage here (relu(bias + stale rows)) -> mask stats.
        m = _border_mask(TQ, qt * TQ, H, W, Wp)
        st_ref[...] += _stats_rows(hb.astype(jnp.float32) * m)

    return pl.pallas_call(
        kernel,
        out_shape=(jax.ShapeDtypeStruct((N, Q, Pp), jnp.bfloat16),
                   jax.ShapeDtypeStruct((N, Q, Cp), jnp.bfloat16),
                   jax.ShapeDtypeStruct((N, 8, Pp), jnp.float32)),
        grid=(N, QT),
        in_specs=[pl.BlockSpec((None, TQ, Cp), lambda n, q: (n, q, 0)),
                  pl.BlockSpec((None, TQ, Cp), lambda n, q: (n, q, 0)),
                  pl.BlockSpec((1, Cp), lambda n, q: (0, 0)),
                  pl.BlockSpec((1, Cp), lambda n, q: (0, 0)),
                  pl.BlockSpec((Cp, Pp), lambda n, q: (0, 0))],
        out_specs=(pl.BlockSpec((None, TQ, Pp), lambda n, q: (n, q, 0)),
                   pl.BlockSpec((None, TQ, Cp), lambda n, q: (n, q, 0)),
                   pl.BlockSpec((None, 8, Pp), lambda n, q: (n, 0, 0))),
        compiler_params=_cp(("parallel", "arbitrary")),
    )(h3, res, s3, b3, w1)


def _call_conv2(h1, s1, b1, w2s, *, N, Q, Pp, Wp, H, W):
    """bn1-apply + relu + 3x3 conv + bn2 partial stats.

    The 3x3 conv is 3 MXU matmuls with K = 3*Pp: the three dy taps are stacked
    along the contraction dim (bf16 activations row-shifted by +/-Wp and
    concatenated channel-wise); the remaining +/-1 dx shifts are applied to the
    bf16 stacked input, never to f32 products, and the 3 dots accumulate back
    to back into one f32 accumulator.  The input mask also re-zeroes any border
    garbage left by the fused previous-block pass before the 3x3 conv mixes
    rows (correctness invariant for chained blocks).
    """

    def kernel(h1_ref, s_ref, b_ref, w_ref, h2_ref, st_ref):
        m = _border_mask(Q, 0, H, W, Wp)
        a = jnp.maximum(
            h1_ref[...].astype(jnp.float32) * s_ref[...] + b_ref[...], 0.0)
        ab = (a * m).astype(jnp.bfloat16)      # zero border == conv zero padding
        # dy taps K-stacked: astack[q] = [ab[q-Wp], ab[q], ab[q+Wp]]
        astack = jnp.concatenate(
            [_shift_flat(ab, -Wp), ab, _shift_flat(ab, Wp)], axis=1)
        a0 = _shift_flat(astack, -1)           # dx = 0 taps
        a2 = _shift_flat(astack, 1)            # dx = 2 taps
        acc = (jnp.dot(a0, w_ref[0], preferred_element_type=jnp.float32)
               + jnp.dot(astack, w_ref[1], preferred_element_type=jnp.float32)
               + jnp.dot(a2, w_ref[2], preferred_element_type=jnp.float32))
        hb = acc.astype(jnp.bfloat16)
        h2_ref[...] = hb
        st_ref[...] = _stats_rows(hb.astype(jnp.float32) * m)

    return pl.pallas_call(
        kernel,
        out_shape=(jax.ShapeDtypeStruct((N, Q, Pp), jnp.bfloat16),
                   jax.ShapeDtypeStruct((N, 8, Pp), jnp.float32)),
        grid=(N,),
        in_specs=[pl.BlockSpec((None, Q, Pp), lambda n: (n, 0, 0)),
                  pl.BlockSpec((1, Pp), lambda n: (0, 0)),
                  pl.BlockSpec((1, Pp), lambda n: (0, 0)),
                  pl.BlockSpec((3, 3 * Pp, Pp), lambda n: (0, 0, 0))],
        out_specs=(pl.BlockSpec((None, Q, Pp), lambda n: (n, 0, 0)),
                   pl.BlockSpec((None, 8, Pp), lambda n: (n, 0, 0))),
        compiler_params=_cp(("parallel",)),
    )(h1, s1, b1, w2s)


def _call_conv3(h2, s2, b2, w3, *, N, Q, TQ, Pp, Cp, H, W, Wp):
    """bn2-apply + relu + conv3 (1x1) matmul + bn3 partial stats (bf16 output)."""
    QT = Q // TQ

    def kernel(h2_ref, s_ref, b_ref, w_ref, h3_ref, st_ref):
        qt = pl.program_id(1)

        @pl.when(qt == 0)
        def _():
            st_ref[...] = jnp.zeros_like(st_ref)

        a = jnp.maximum(
            h2_ref[...].astype(jnp.float32) * s_ref[...] + b_ref[...], 0.0)
        hb = jnp.dot(a.astype(jnp.bfloat16), w_ref[...],
                     preferred_element_type=jnp.float32).astype(jnp.bfloat16)
        h3_ref[...] = hb
        m = _border_mask(TQ, qt * TQ, H, W, Wp)
        st_ref[...] += _stats_rows(hb.astype(jnp.float32) * m)

    return pl.pallas_call(
        kernel,
        out_shape=(jax.ShapeDtypeStruct((N, Q, Cp), jnp.bfloat16),
                   jax.ShapeDtypeStruct((N, 8, Cp), jnp.float32)),
        grid=(N, QT),
        in_specs=[pl.BlockSpec((None, TQ, Pp), lambda n, q: (n, q, 0)),
                  pl.BlockSpec((1, Pp), lambda n, q: (0, 0)),
                  pl.BlockSpec((1, Pp), lambda n, q: (0, 0)),
                  pl.BlockSpec((Pp, Cp), lambda n, q: (0, 0))],
        out_specs=(pl.BlockSpec((None, TQ, Cp), lambda n, q: (n, q, 0)),
                   pl.BlockSpec((None, 8, Cp), lambda n, q: (n, 0, 0))),
        compiler_params=_cp(("parallel", "arbitrary")),
    )(h2, s2, b2, w3)


def _call_bn3_residual(h3, res, s3, b3, *, N, Q, TQ, Cp):
    """bn3-apply + identity residual + relu (last block of a stage, bf16 out)."""
    QT = Q // TQ

    def kernel(h3_ref, r_ref, s_ref, b_ref, o_ref):
        o_ref[...] = jnp.maximum(
            h3_ref[...].astype(jnp.float32) * s_ref[...] + b_ref[...]
            + r_ref[...].astype(jnp.float32), 0.0).astype(o_ref.dtype)

    return pl.pallas_call(
        kernel,
        out_shape=jax.ShapeDtypeStruct((N, Q, Cp), jnp.bfloat16),
        grid=(N, QT),
        in_specs=[pl.BlockSpec((None, TQ, Cp), lambda n, q: (n, q, 0)),
                  pl.BlockSpec((None, TQ, Cp), lambda n, q: (n, q, 0)),
                  pl.BlockSpec((1, Cp), lambda n, q: (0, 0)),
                  pl.BlockSpec((1, Cp), lambda n, q: (0, 0))],
        out_specs=pl.BlockSpec((None, TQ, Cp), lambda n, q: (n, q, 0)),
        compiler_params=_cp(("parallel", "parallel")),
    )(h3, res, s3, b3)


# ------------------------------ host wrapper --------------------------------


def init_params(key, in_planes, planes, expansion=4):
    cout = expansion * planes
    k1, k2, k3 = jax.random.split(key, 3)
    # conv weights as (C_in, C_out); w2 is (9, P, P), taps in (dy, dx) row-major.
    w1 = 0.1 * jax.random.normal(k1, (in_planes, planes), jnp.float32)
    w2 = 0.1 * jax.random.normal(k2, (9, planes, planes), jnp.float32)
    w3 = 0.1 * jax.random.normal(k3, (planes, cout), jnp.float32)
    z = lambda c: jnp.zeros((1, c), jnp.float32)
    o = lambda c: jnp.ones((1, c), jnp.float32)
    return dict(w1=w1, g1=o(planes), b1=z(planes),
                w2=w2, g2=o(planes), b2=z(planes),
                w3=w3, g3=o(cout), b3=z(cout))


def _pad_params(prm, Pp, Cp):
    P = prm["w1"].shape[1]
    Cin = prm["w1"].shape[0]
    Cout = prm["w3"].shape[1]
    bf = jnp.bfloat16
    w1 = jnp.pad(prm["w1"], ((0, Cp - Cin), (0, Pp - P))).astype(bf)
    w2p = jnp.pad(prm["w2"], ((0, 0), (0, Pp - P), (0, Pp - P)))
    # (3, 3*Pp, Pp): axis 0 = dx; contraction axis stacks dy = 0,1,2 (K = 3*Pp).
    w2s = jnp.stack(
        [jnp.concatenate([w2p[dx], w2p[3 + dx], w2p[6 + dx]], axis=0)
         for dx in range(3)], axis=0).astype(bf)
    w3 = jnp.pad(prm["w3"], ((0, Pp - P), (0, Cp - Cout))).astype(bf)
    pc = lambda a, c: jnp.pad(a, ((0, 0), (0, c - a.shape[1])))
    return dict(w1=w1, w2s=w2s, w3=w3,
                g1=pc(prm["g1"], Pp), b1=pc(prm["b1"], Pp),
                g2=pc(prm["g2"], Pp), b2=pc(prm["b2"], Pp),
                g3=pc(prm["g3"], Cp), b3=pc(prm["b3"], Cp))


def _pick_q_tile(Hp, Wp, target=2048):
    best = 1
    for d in range(1, Hp + 1):
        if Hp % d == 0 and d * Wp <= max(Wp, target):
            best = d
    return best * Wp


def bottleneck_stage_forward(x_nchw, params_list):
    """A stage of stride-1, identity-residual ResNet Bottleneck blocks.

    Activations stay in a padded-flat channels-last bf16 layout (N, Q, C),
    Q = (H+2)*Wp, across the whole stage; each block's bn3 + residual + relu is
    fused into the next block's conv1 kernel (only the last block runs the
    standalone elementwise pass).  BN is training-mode (biased batch stats),
    finished by a tiny JAX reduction over per-image partial sums so the stats
    stay global while the pixel/batch dims are tiled.
    """
    N, Cin, H, W = x_nchw.shape
    P = params_list[0]["w1"].shape[1]
    Cout = params_list[0]["w3"].shape[1]
    assert Cin == Cout, "identity residual requires in_planes == expansion*planes"

    Pp = _round_up(P, 128)                       # lane-pad channel dims
    Cp = _round_up(Cin, 128)
    Hp = H + 2                                   # one zero ring for the 3x3 conv
    Wp = max(16, pl.next_power_of_2(W + 2))      # pow2 -> in-kernel mask is shift/and
    Q = Hp * Wp
    M = N * H * W                                # true pixel count (BN divisor)
    TQ = _pick_q_tile(Hp, Wp)                    # Q tile for 1x1 / elementwise passes

    # One-time layout change: NCHW -> padded-flat channels-last bf16.
    x = jnp.transpose(x_nchw, (0, 2, 3, 1)).astype(jnp.float32)
    x = jnp.pad(x, ((0, 0), (1, 1), (1, Wp - W - 1), (0, Cp - Cin)))
    res = x.reshape(N, Q, Cp).astype(jnp.bfloat16)          # residual carry

    pend = None                                  # (h3, scale3, bias3) of prev block
    for prm_raw in params_list:
        prm = _pad_params(prm_raw, Pp, Cp)
        if pend is None:
            h1, st1 = _call_conv1(res, prm["w1"], N=N, Q=Q, TQ=TQ, Cp=Cp, Pp=Pp)
        else:
            h3p, s3p, t3p = pend
            h1, res, st1 = _call_bn3res_conv1(
                h3p, res, s3p, t3p, prm["w1"],
                N=N, Q=Q, TQ=TQ, Cp=Cp, Pp=Pp, H=H, W=W, Wp=Wp)
        s1, t1 = _bn_scale_bias(st1, prm["g1"], prm["b1"], M)
        h2, st2 = _call_conv2(h1, s1, t1, prm["w2s"],
                              N=N, Q=Q, Pp=Pp, Wp=Wp, H=H, W=W)
        s2, t2 = _bn_scale_bias(st2, prm["g2"], prm["b2"], M)
        h3, st3 = _call_conv3(h2, s2, t2, prm["w3"],
                              N=N, Q=Q, TQ=TQ, Pp=Pp, Cp=Cp, H=H, W=W, Wp=Wp)
        s3, t3 = _bn_scale_bias(st3, prm["g3"], prm["b3"], M)
        pend = (h3, s3, t3)

    h3, s3, t3 = pend
    out = _call_bn3_residual(h3, res, s3, t3, N=N, Q=Q, TQ=TQ, Cp=Cp)

    out = out.astype(jnp.float32).reshape(N, Hp, Wp, Cp)[:, 1:H + 1, 1:W + 1, :Cout]
    return jnp.transpose(out, (0, 3, 1, 2))


def reference_stage_forward(x_nchw, params_list):
    """Pure-JAX/XLA reference mirroring the kernels' bf16 quantization points
    (matmul/conv inputs, stored h1/h2/h3 and block outputs) so the comparison
    isolates the Pallas layout / tiling / fusion / two-pass-BN plumbing.
    BN uses biased batch variance (PyTorch forward-normalization semantics)."""
    bf = jnp.bfloat16

    def bn(h, g, b):
        mean = jnp.mean(h, axis=(0, 1, 2), keepdims=True)
        var = jnp.mean(jnp.square(h - mean), axis=(0, 1, 2), keepdims=True)
        return (h - mean) * jax.lax.rsqrt(var + EPS) * g + b

    x = jnp.transpose(x_nchw, (0, 2, 3, 1)).astype(bf).astype(jnp.float32)
    for prm in params_list:
        h = jnp.einsum("nhwc,cp->nhwp", x.astype(bf), prm["w1"].astype(bf),
                       preferred_element_type=jnp.float32)
        h = h.astype(bf).astype(jnp.float32)
        h = jax.nn.relu(bn(h, prm["g1"][0], prm["b1"][0]))

        P = h.shape[-1]
        w2 = prm["w2"].reshape(3, 3, P, P).astype(bf)
        h = jax.lax.conv_general_dilated(
            h.astype(bf), w2, window_strides=(1, 1), padding="SAME",
            dimension_numbers=("NHWC", "HWIO", "NHWC"),
            preferred_element_type=jnp.float32)
        h = h.astype(bf).astype(jnp.float32)
        h = jax.nn.relu(bn(h, prm["g2"][0], prm["b2"][0]))

        h = jnp.einsum("nhwc,cp->nhwp", h.astype(bf), prm["w3"].astype(bf),
                       preferred_element_type=jnp.float32)
        h = h.astype(bf).astype(jnp.float32)
        h = bn(h, prm["g3"][0], prm["b3"][0])
        x = jax.nn.relu(h + x).astype(bf).astype(jnp.float32)
    return jnp.transpose(x, (0, 3, 1, 2))


if __name__ == "__main__":
    key = jax.random.PRNGKey(0)
    kx, kp1, kp2 = jax.random.split(key, 3)

    planes = 8
    in_planes = 4 * planes            # expansion * planes -> identity residual works
    N, H, W = 2, 8, 8

    x = jax.random.normal(kx, (N, in_planes, H, W), jnp.float32)
    params = [init_params(kp1, in_planes, planes),
              init_params(kp2, in_planes, planes)]   # 2-block (layer1-style) stage

    fwd = jax.jit(bottleneck_stage_forward)
    out = jax.block_until_ready(fwd(x, params))

    ref = reference_stage_forward(x, params)
    assert out.shape == (N, in_planes, H, W), out.shape
    err = float(jnp.max(jnp.abs(out - ref) / (1.0 + jnp.abs(ref))))
    assert err < 2e-2, f"mismatch vs reference: {err}"

    print("KERNEL_OK")
</pallas_src>

<mosaic_0001>
module attributes {stable_mosaic.version = 11 : i64} {
  func.func @kernel(%arg0: i32, %arg1: i32, %arg2: memref<1x160x128xbf16, #tpu.memory_space<vmem>>, %arg3: memref<128x128xbf16, #tpu.memory_space<vmem>>, %arg4: memref<1x160x128xbf16, #tpu.memory_space<vmem>>, %arg5: memref<1x8x128xf32, #tpu.memory_space<vmem>>) attributes {dimension_semantics = [#tpu.dimension_semantics<parallel>, #tpu.dimension_semantics<arbitrary>], iteration_bounds = array<i64: 2, 1>, scalar_prefetch = 0 : i64, scratch_operands = 0 : i64, tpu.core_type = #tpu.core_type<tc>, window_params = [{transform_indices = @transform_0, window_bounds = array<i64: 1, 160, 128>}, {pipeline_mode = #tpu.pipeline_mode<synchronous>, transform_indices = @transform_1, window_bounds = array<i64: 128, 128>}, {transform_indices = @transform_2, window_bounds = array<i64: 1, 160, 128>}, {transform_indices = @transform_3, window_bounds = array<i64: 1, 8, 128>}]} {
    %c0_i32 = arith.constant 0 : i32
    %0 = arith.cmpi eq, %arg1, %c0_i32 : i32
    %1 = arith.extui %0 : i1 to i32
    %c0_i32_0 = arith.constant 0 : i32
    %2 = arith.cmpi ne, %1, %c0_i32_0 : i32
    scf.if %2 {
      %cst_17 = arith.constant 0.000000e+00 : f32
      %25 = vector.broadcast %cst_17 : f32 to vector<8x128xf32>
      %c0_18 = arith.constant 0 : index
      %c0_19 = arith.constant 0 : index
      %c0_20 = arith.constant 0 : index
      %26 = vector.load %arg5[%c0_18, %c0_19, %c0_20] : memref<1x8x128xf32, #tpu.memory_space<vmem>>, vector<1x8x128xf32>
      %27 = vector.shape_cast %26 : vector<1x8x128xf32> to vector<8x128xf32>
      %28 = vector.shape_cast %25 : vector<8x128xf32> to vector<1x8x128xf32>
      tpu.vector_store %arg5[%c0_18, %c0_19, %c0_20], %28 {strides = array<i32>} : memref<1x8x128xf32, #tpu.memory_space<vmem>>, vector<1x8x128xf32>,
    } else {
    }
    %c0 = arith.constant 0 : index
    %c0_1 = arith.constant 0 : index
    %c0_2 = arith.constant 0 : index
    %3 = vector.load %arg2[%c0, %c0_1, %c0_2] : memref<1x160x128xbf16, #tpu.memory_space<vmem>>, vector<1x160x128xbf16>
    %4 = vector.shape_cast %3 : vector<1x160x128xbf16> to vector<160x128xbf16>
    %c0_3 = arith.constant 0 : index
    %c0_4 = arith.constant 0 : index
    %5 = vector.load %arg3[%c0_3, %c0_4] : memref<128x128xbf16, #tpu.memory_space<vmem>>, vector<128x128xbf16>
    %cst = arith.constant dense<0.000000e+00> : vector<160x128xf32>
    %6 = tpu.matmul %4, %5, %cst {dimension_numbers = #tpu.dot_dimension_numbers<[1], [0], [0], [1], [0, 0, 1, 1], [], []>} : vector<160x128xbf16>, vector<128x128xbf16>, vector<160x128xf32> -> vector<160x128xf32>
    %7 = arith.truncf %6 : vector<160x128xf32> to vector<160x128xbf16>
    %c0_5 = arith.constant 0 : index
    %c0_6 = arith.constant 0 : index
    %c0_7 = arith.constant 0 : index
    %8 = vector.load %arg4[%c0_5, %c0_6, %c0_7] : memref<1x160x128xbf16, #tpu.memory_space<vmem>>, vector<1x160x128xbf16>
    %9 = vector.shape_cast %8 : vector<1x160x128xbf16> to vector<160x128xbf16>
    %10 = vector.shape_cast %7 : vector<160x128xbf16> to vector<1x160x128xbf16>
    tpu.vector_store %arg4[%c0_5, %c0_6, %c0_7], %10 {strides = array<i32>} : memref<1x160x128xbf16, #tpu.memory_space<vmem>>, vector<1x160x128xbf16>,
    %c0_8 = arith.constant 0 : index
    %c0_9 = arith.constant 0 : index
    %c0_10 = arith.constant 0 : index
    %11 = vector.load %arg5[%c0_8, %c0_9, %c0_10] : memref<1x8x128xf32, #tpu.memory_space<vmem>>, vector<1x8x128xf32>
    %12 = vector.shape_cast %11 : vector<1x8x128xf32> to vector<8x128xf32>
    %13 = arith.extf %7 : vector<160x128xbf16> to vector<160x128xf32>
    %cst_11 = arith.constant dense<0.000000e+00> : vector<128xf32>
    %14 = vector.multi_reduction <add>, %13, %cst_11 [0] : vector<160x128xf32> to vector<128xf32>
    %15 = vector.shape_cast %14 : vector<128xf32> to vector<1x128xf32>
    %16 = arith.mulf %13, %13 : vector<160x128xf32>
    %cst_12 = arith.constant dense<0.000000e+00> : vector<128xf32>
    %17 = vector.multi_reduction <add>, %16, %cst_12 [0] : vector<160x128xf32> to vector<128xf32>
    %18 = vector.shape_cast %17 : vector<128xf32> to vector<1x128xf32>
    %cst_13 = arith.constant 0.000000e+00 : f32
    %19 = vector.broadcast %cst_13 : f32 to vector<6x128xf32>
    %20 = tpu.concatenate %15, %18, %19 in 0 : vector<1x128xf32>, vector<1x128xf32>, vector<6x128xf32> -> vector<8x128xf32>
    %21 = arith.addf %12, %20 : vector<8x128xf32>
    %c0_14 = arith.constant 0 : index
    %c0_15 = arith.constant 0 : index
    %c0_16 = arith.constant 0 : index
    %22 = vector.load %arg5[%c0_14, %c0_15, %c0_16] : memref<1x8x128xf32, #tpu.memory_space<vmem>>, vector<1x8x128xf32>
    %23 = vector.shape_cast %22 : vector<1x8x128xf32> to vector<8x128xf32>
    %24 = vector.shape_cast %21 : vector<8x128xf32> to vector<1x8x128xf32>
    tpu.vector_store %arg5[%c0_14, %c0_15, %c0_16], %24 {strides = array<i32>} : memref<1x8x128xf32, #tpu.memory_space<vmem>>, vector<1x8x128xf32>,
    return
  }
  func.func @transform_0(%arg0: i32, %arg1: i32) -> (i32, i32, i32) {
    %c0_i32 = arith.constant 0 : i32
    %c0_i32_0 = arith.constant 0 : i32
    return %arg0, %arg1, %c0_i32 : i32, i32, i32
  }
  func.func @transform_1(%arg0: i32, %arg1: i32) -> (i32, i32) {
    %c0_i32 = arith.constant 0 : i32
    %c0_i32_0 = arith.constant 0 : i32
    %c0_i32_1 = arith.constant 0 : i32
    return %c0_i32, %c0_i32_0 : i32, i32
  }
  func.func @transform_2(%arg0: i32, %arg1: i32) -> (i32, i32, i32) {
    %c0_i32 = arith.constant 0 : i32
    %c0_i32_0 = arith.constant 0 : i32
    return %arg0, %arg1, %c0_i32 : i32, i32, i32
  }
  func.func @transform_3(%arg0: i32, %arg1: i32) -> (i32, i32, i32) {
    %c0_i32 = arith.constant 0 : i32
    %c0_i32_0 = arith.constant 0 : i32
    %c0_i32_1 = arith.constant 0 : i32
    return %arg0, %c0_i32, %c0_i32_0 : i32, i32, i32
  }
}

module attributes {stable_mosaic.version = 11 : i64} {
  func.func @kernel(%arg0: i32, %arg1: memref<1x160x128xbf16, #tpu.memory_space<vmem>>, %arg2: memref<1x128xf32, #tpu.memory_space<vmem>>, %arg3: memref<1x128xf32, #tpu.memory_space<vmem>>, %arg4: memref<3x384x128xbf16, #tpu.memory_space<vmem>>, %arg5: memref<1x160x128xbf16, #tpu.memory_space<vmem>>, %arg6: memref<1x8x128xf32, #tpu.memory_space<vmem>>) attributes {dimension_semantics = [#tpu.dimension_semantics<parallel>], iteration_bounds = array<i64: 2>, scalar_prefetch = 0 : i64, scratch_operands = 0 : i64, tpu.core_type = #tpu.core_type<tc>, window_params = [{transform_indices = @transform_0, window_bounds = array<i64: 1, 160, 128>}, {pipeline_mode = #tpu.pipeline_mode<synchronous>, transform_indices = @transform_1, window_bounds = array<i64: 1, 128>}, {pipeline_mode = #tpu.pipeline_mode<synchronous>, transform_indices = @transform_2, window_bounds = array<i64: 1, 128>}, {pipeline_mode = #tpu.pipeline_mode<synchronous>, transform_indices = @transform_3, window_bounds = array<i64: 3, 384, 128>}, {transform_indices = @transform_4, window_bounds = array<i64: 1, 160, 128>}, {transform_indices = @transform_5, window_bounds = array<i64: 1, 8, 128>}]} {
    %0 = tpu.iota {dimensions = array<i32: 0>} : vector<160x1xi32>
    %c0_i32 = arith.constant 0 : i32
    %1 = vector.broadcast %c0_i32 : i32 to vector<160x1xi32>
    %2 = arith.addi %0, %1 : vector<160x1xi32>
    %c4_i32 = arith.constant 4 : i32
    %3 = vector.broadcast %c4_i32 : i32 to vector<160x1xi32>
    %4 = arith.shrsi %2, %3 : vector<160x1xi32>
    %c15_i32 = arith.constant 15 : i32
    %5 = vector.broadcast %c15_i32 : i32 to vector<160x1xi32>
    %6 = arith.andi %2, %5 : vector<160x1xi32>
    %c1_i32 = arith.constant 1 : i32
    %7 = vector.broadcast %c1_i32 : i32 to vector<160x1xi32>
    %8 = arith.cmpi sge, %4, %7 : vector<160x1xi32>
    %c8_i32 = arith.constant 8 : i32
    %9 = vector.broadcast %c8_i32 : i32 to vector<160x1xi32>
    %10 = arith.cmpi sle, %4, %9 : vector<160x1xi32>
    %11 = arith.andi %8, %10 : vector<160x1xi1>
    %c1_i32_0 = arith.constant 1 : i32
    %12 = vector.broadcast %c1_i32_0 : i32 to vector<160x1xi32>
    %13 = arith.cmpi sge, %6, %12 : vector<160x1xi32>
    %14 = arith.andi %11, %13 : vector<160x1xi1>
    %c8_i32_1 = arith.constant 8 : i32
    %15 = vector.broadcast %c8_i32_1 : i32 to vector<160x1xi32>
    %16 = arith.cmpi sle, %6, %15 : vector<160x1xi32>
    %17 = arith.andi %14, %16 : vector<160x1xi1>
    %cst = arith.constant 1.000000e+00 : f32
    %cst_2 = arith.constant 0.000000e+00 : f32
    %18 = vector.broadcast %cst : f32 to vector<160x1xf32>
    %19 = vector.broadcast %cst_2 : f32 to vector<160x1xf32>
    %20 = arith.select %17, %18, %19 : vector<160x1xi1>, vector<160x1xf32>
    %c0 = arith.constant 0 : index
    %c0_3 = arith.constant 0 : index
    %c0_4 = arith.constant 0 : index
    %21 = vector.load %arg1[%c0, %c0_3, %c0_4] : memref<1x160x128xbf16, #tpu.memory_space<vmem>>, vector<1x160x128xbf16>
    %22 = vector.shape_cast %21 : vector<1x160x128xbf16> to vector<160x128xbf16>
    %23 = arith.extf %22 : vector<160x128xbf16> to vector<160x128xf32>
    %c0_5 = arith.constant 0 : index
    %c0_6 = arith.constant 0 : index
    %24 = vector.load %arg2[%c0_5, %c0_6] : memref<1x128xf32, #tpu.memory_space<vmem>>, vector<1x128xf32>
    %25 = vector.broadcast %24 : vector<1x128xf32> to vector<160x128xf32>
    %26 = arith.mulf %23, %25 : vector<160x128xf32>
    %c0_7 = arith.constant 0 : index
    %c0_8 = arith.constant 0 : index
    %27 = vector.load %arg3[%c0_7, %c0_8] : memref<1x128xf32, #tpu.memory_space<vmem>>, vector<1x128xf32>
    %28 = vector.broadcast %27 : vector<1x128xf32> to vector<160x128xf32>
    %29 = arith.addf %26, %28 : vector<160x128xf32>
    %cst_9 = arith.constant 0.000000e+00 : f32
    %30 = vector.broadcast %cst_9 : f32 to vector<160x128xf32>
    %31 = arith.maximumf %29, %30 : vector<160x128xf32>
    %32 = vector.broadcast %20 : vector<160x1xf32> to vector<160x128xf32>
    %33 = arith.mulf %31, %32 : vector<160x128xf32>
    %34 = arith.truncf %33 : vector<160x128xf32> to vector<160x128xbf16>
    %cst_10 = arith.constant 0.000000e+00 : bf16
    %35 = vector.broadcast %cst_10 : bf16 to vector<16x128xbf16>
    %36 = vector.extract_strided_slice %34 {offsets = [0, 0], sizes = [144, 128], strides = [1, 1]} : vector<160x128xbf16> to vector<144x128xbf16>
    %37 = tpu.concatenate %35, %36 in 0 : vector<16x128xbf16>, vector<144x128xbf16> -> vector<160x128xbf16>
    %cst_11 = arith.constant 0.000000e+00 : bf16
    %38 = vector.broadcast %cst_11 : bf16 to vector<16x128xbf16>
    %39 = vector.extract_strided_slice %34 {offsets = [16, 0], sizes = [144, 128], strides = [1, 1]} : vector<160x128xbf16> to vector<144x128xbf16>
    %40 = tpu.concatenate %39, %38 in 0 : vector<144x128xbf16>, vector<16x128xbf16> -> vector<160x128xbf16>
    %41 = tpu.concatenate %37, %34, %40 in 1 : vector<160x128xbf16>, vector<160x128xbf16>, vector<160x128xbf16> -> vector<160x384xbf16>
    %cst_12 = arith.constant 0.000000e+00 : bf16
    %42 = vector.broadcast %cst_12 : bf16 to vector<1x384xbf16>
    %43 = vector.extract_strided_slice %41 {offsets = [0, 0], sizes = [159, 384], strides = [1, 1]} : vector<160x384xbf16> to vector<159x384xbf16>
    %44 = tpu.concatenate %42, %43 in 0 : vector<1x384xbf16>, vector<159x384xbf16> -> vector<160x384xbf16>
    %cst_13 = arith.constant 0.000000e+00 : bf16
    %45 = vector.broadcast %cst_13 : bf16 to vector<1x384xbf16>
    %46 = vector.extract_strided_slice %41 {offsets = [1, 0], sizes = [159, 384], strides = [1, 1]} : vector<160x384xbf16> to vector<159x384xbf16>
    %47 = tpu.concatenate %46, %45 in 0 : vector<159x384xbf16>, vector<1x384xbf16> -> vector<160x384xbf16>
    %c0_14 = arith.constant 0 : index
    %c0_15 = arith.constant 0 : index
    %c0_16 = arith.constant 0 : index
    %48 = vector.load %arg4[%c0_14, %c0_15, %c0_16] : memref<3x384x128xbf16, #tpu.memory_space<vmem>>, vector<1x384x128xbf16>
    %49 = vector.shape_cast %48 : vector<1x384x128xbf16> to vector<384x128xbf16>
    %cst_17 = arith.constant dense<0.000000e+00> : vector<160x128xf32>
    %50 = tpu.matmul %44, %49, %cst_17 {dimension_numbers = #tpu.dot_dimension_numbers<[1], [0], [0], [1], [0, 0, 1, 1], [], []>} : vector<160x384xbf16>, vector<384x128xbf16>, vector<160x128xf32> -> vector<160x128xf32>
    %c1 = arith.constant 1 : index
    %c0_18 = arith.constant 0 : index
    %c0_19 = arith.constant 0 : index
    %51 = vector.load %arg4[%c1, %c0_18, %c0_19] : memref<3x384x128xbf16, #tpu.memory_space<vmem>>, vector<1x384x128xbf16>
    %52 = vector.shape_cast %51 : vector<1x384x128xbf16> to vector<384x128xbf16>
    %cst_20 = arith.constant dense<0.000000e+00> : vector<160x128xf32>
    %53 = tpu.matmul %41, %52, %cst_20 {dimension_numbers = #tpu.dot_dimension_numbers<[1], [0], [0], [1], [0, 0, 1, 1], [], []>} : vector<160x384xbf16>, vector<384x128xbf16>, vector<160x128xf32> -> vector<160x128xf32>
    %54 = arith.addf %50, %53 : vector<160x128xf32>
    %c2 = arith.constant 2 : index
    %c0_21 = arith.constant 0 : index
    %c0_22 = arith.constant 0 : index
    %55 = vector.load %arg4[%c2, %c0_21, %c0_22] : memref<3x384x128xbf16, #tpu.memory_space<vmem>>, vector<1x384x128xbf16>
    %56 = vector.shape_cast %55 : vector<1x384x128xbf16> to vector<384x128xbf16>
    %cst_23 = arith.constant dense<0.000000e+00> : vector<160x128xf32>
    %57 = tpu.matmul %47, %56, %cst_23 {dimension_numbers = #tpu.dot_dimension_numbers<[1], [0], [0], [1], [0, 0, 1, 1], [], []>} : vector<160x384xbf16>, vector<384x128xbf16>, vector<160x128xf32> -> vector<160x128xf32>
    %58 = arith.addf %54, %57 : vector<160x128xf32>
    %59 = arith.truncf %58 : vector<160x128xf32> to vector<160x128xbf16>
    %c0_24 = arith.constant 0 : index
    %c0_25 = arith.constant 0 : index
    %c0_26 = arith.constant 0 : index
    %60 = vector.load %arg5[%c0_24, %c0_25, %c0_26] : memref<1x160x128xbf16, #tpu.memory_space<vmem>>, vector<1x160x128xbf16>
    %61 = vector.shape_cast %60 : vector<1x160x128xbf16> to vector<160x128xbf16>
    %62 = vector.shape_cast %59 : vector<160x128xbf16> to vector<1x160x128xbf16>
    tpu.vector_store %arg5[%c0_24, %c0_25, %c0_26], %62 {strides = array<i32>} : memref<1x160x128xbf16, #tpu.memory_space<vmem>>, vector<1x160x128xbf16>,
    %63 = arith.extf %59 : vector<160x128xbf16> to vector<160x128xf32>
    %64 = vector.broadcast %20 : vector<160x1xf32> to vector<160x128xf32>
    %65 = arith.mulf %63, %64 : vector<160x128xf32>
    %cst_27 = arith.constant dense<0.000000e+00> : vector<128xf32>
    %66 = vector.multi_reduction <add>, %65, %cst_27 [0] : vector<160x128xf32> to vector<128xf32>
    %67 = vector.shape_cast %66 : vector<128xf32> to vector<1x128xf32>
    %68 = arith.mulf %65, %65 : vector<160x128xf32>
    %cst_28 = arith.constant dense<0.000000e+00> : vector<128xf32>
    %69 = vector.multi_reduction <add>, %68, %cst_28 [0] : vector<160x128xf32> to vector<128xf32>
    %70 = vector.shape_cast %69 : vector<128xf32> to vector<1x128xf32>
    %cst_29 = arith.constant 0.000000e+00 : f32
    %71 = vector.broadcast %cst_29 : f32 to vector<6x128xf32>
    %72 = tpu.concatenate %67, %70, %71 in 0 : vector<1x128xf32>, vector<1x128xf32>, vector<6x128xf32> -> vector<8x128xf32>
    %c0_30 = arith.constant 0 : index
    %c0_31 = arith.constant 0 : index
    %c0_32 = arith.constant 0 : index
    %73 = vector.load %arg6[%c0_30, %c0_31, %c0_32] : memref<1x8x128xf32, #tpu.memory_space<vmem>>, vector<1x8x128xf32>
    %74 = vector.shape_cast %73 : vector<1x8x128xf32> to vector<8x128xf32>
    %75 = vector.shape_cast %72 : vector<8x128xf32> to vector<1x8x128xf32>
    tpu.vector_store %arg6[%c0_30, %c0_31, %c0_32], %75 {strides = array<i32>} : memref<1x8x128xf32, #tpu.memory_space<vmem>>, vector<1x8x128xf32>,
    return
  }
  func.func @transform_0(%arg0: i32) -> (i32, i32, i32) {
    %c0_i32 = arith.constant 0 : i32
    %c0_i32_0 = arith.constant 0 : i32
    %c0_i32_1 = arith.constant 0 : i32
    return %arg0, %c0_i32, %c0_i32_0 : i32, i32, i32
  }
  func.func @transform_1(%arg0: i32) -> (i32, i32) {
    %c0_i32 = arith.constant 0 : i32
    %c0_i32_0 = arith.constant 0 : i32
    %c0_i32_1 = arith.constant 0 : i32
    return %c0_i32, %c0_i32_0 : i32, i32
  }
  func.func @transform_2(%arg0: i32) -> (i32, i32) {
    %c0_i32 = arith.constant 0 : i32
    %c0_i32_0 = arith.constant 0 : i32
    %c0_i32_1 = arith.constant 0 : i32
    return %c0_i32, %c0_i32_0 : i32, i32
  }
  func.func @transform_3(%arg0: i32) -> (i32, i32, i32) {
    %c0_i32 = arith.constant 0 : i32
    %c0_i32_0 = arith.constant 0 : i32
    %c0_i32_1 = arith.constant 0 : i32
    %c0_i32_2 = arith.constant 0 : i32
    return %c0_i32, %c0_i32_0, %c0_i32_1 : i32, i32, i32
  }
  func.func @transform_4(%arg0: i32) -> (i32, i32, i32) {
    %c0_i32 = arith.constant 0 : i32
    %c0_i32_0 = arith.constant 0 : i32
    %c0_i32_1 = arith.constant 0 : i32
    return %arg0, %c0_i32, %c0_i32_0 : i32, i32, i32
  }
  func.func @transform_5(%arg0: i32) -> (i32, i32, i32) {
    %c0_i32 = arith.constant 0 : i32
    %c0_i32_0 = arith.constant 0 : i32
    %c0_i32_1 = arith.constant 0 : i32
    return %arg0, %c0_i32, %c0_i32_0 : i32, i32, i32
  }
}

module attributes {stable_mosaic.version = 11 : i64} {
  func.func @kernel(%arg0: i32, %arg1: i32, %arg2: memref<1x160x128xbf16, #tpu.memory_space<vmem>>, %arg3: memref<1x128xf32, #tpu.memory_space<vmem>>, %arg4: memref<1x128xf32, #tpu.memory_space<vmem>>, %arg5: memref<128x128xbf16, #tpu.memory_space<vmem>>, %arg6: memref<1x160x128xbf16, #tpu.memory_space<vmem>>, %arg7: memref<1x8x128xf32, #tpu.memory_space<vmem>>) attributes {dimension_semantics = [#tpu.dimension_semantics<parallel>, #tpu.dimension_semantics<arbitrary>], iteration_bounds = array<i64: 2, 1>, scalar_prefetch = 0 : i64, scratch_operands = 0 : i64, tpu.core_type = #tpu.core_type<tc>, window_params = [{transform_indices = @transform_0, window_bounds = array<i64: 1, 160, 128>}, {pipeline_mode = #tpu.pipeline_mode<synchronous>, transform_indices = @transform_1, window_bounds = array<i64: 1, 128>}, {pipeline_mode = #tpu.pipeline_mode<synchronous>, transform_indices = @transform_2, window_bounds = array<i64: 1, 128>}, {pipeline_mode = #tpu.pipeline_mode<synchronous>, transform_indices = @transform_3, window_bounds = array<i64: 128, 128>}, {transform_indices = @transform_4, window_bounds = array<i64: 1, 160, 128>}, {transform_indices = @transform_5, window_bounds = array<i64: 1, 8, 128>}]} {
    %c0_i32 = arith.constant 0 : i32
    %0 = arith.cmpi eq, %arg1, %c0_i32 : i32
    %1 = arith.extui %0 : i1 to i32
    %c0_i32_0 = arith.constant 0 : i32
    %2 = arith.cmpi ne, %1, %c0_i32_0 : i32
    scf.if %2 {
      %cst_26 = arith.constant 0.000000e+00 : f32
      %59 = vector.broadcast %cst_26 : f32 to vector<8x128xf32>
      %c0_27 = arith.constant 0 : index
      %c0_28 = arith.constant 0 : index
      %c0_29 = arith.constant 0 : index
      %60 = vector.load %arg7[%c0_27, %c0_28, %c0_29] : memref<1x8x128xf32, #tpu.memory_space<vmem>>, vector<1x8x128xf32>
      %61 = vector.shape_cast %60 : vector<1x8x128xf32> to vector<8x128xf32>
      %62 = vector.shape_cast %59 : vector<8x128xf32> to vector<1x8x128xf32>
      tpu.vector_store %arg7[%c0_27, %c0_28, %c0_29], %62 {strides = array<i32>} : memref<1x8x128xf32, #tpu.memory_space<vmem>>, vector<1x8x128xf32>,
    } else {
    }
    %c0 = arith.constant 0 : index
    %c0_1 = arith.constant 0 : index
    %c0_2 = arith.constant 0 : index
    %3 = vector.load %arg2[%c0, %c0_1, %c0_2] : memref<1x160x128xbf16, #tpu.memory_space<vmem>>, vector<1x160x128xbf16>
    %4 = vector.shape_cast %3 : vector<1x160x128xbf16> to vector<160x128xbf16>
    %5 = arith.extf %4 : vector<160x128xbf16> to vector<160x128xf32>
    %c0_3 = arith.constant 0 : index
    %c0_4 = arith.constant 0 : index
    %6 = vector.load %arg3[%c0_3, %c0_4] : memref<1x128xf32, #tpu.memory_space<vmem>>, vector<1x128xf32>
    %7 = vector.broadcast %6 : vector<1x128xf32> to vector<160x128xf32>
    %8 = arith.mulf %5, %7 : vector<160x128xf32>
    %c0_5 = arith.constant 0 : index
    %c0_6 = arith.constant 0 : index
    %9 = vector.load %arg4[%c0_5, %c0_6] : memref<1x128xf32, #tpu.memory_space<vmem>>, vector<1x128xf32>
    %10 = vector.broadcast %9 : vector<1x128xf32> to vector<160x128xf32>
    %11 = arith.addf %8, %10 : vector<160x128xf32>
    %cst = arith.constant 0.000000e+00 : f32
    %12 = vector.broadcast %cst : f32 to vector<160x128xf32>
    %13 = arith.maximumf %11, %12 : vector<160x128xf32>
    %14 = arith.truncf %13 : vector<160x128xf32> to vector<160x128xbf16>
    %c0_7 = arith.constant 0 : index
    %c0_8 = arith.constant 0 : index
    %15 = vector.load %arg5[%c0_7, %c0_8] : memref<128x128xbf16, #tpu.memory_space<vmem>>, vector<128x128xbf16>
    %cst_9 = arith.constant dense<0.000000e+00> : vector<160x128xf32>
    %16 = tpu.matmul %14, %15, %cst_9 {dimension_numbers = #tpu.dot_dimension_numbers<[1], [0], [0], [1], [0, 0, 1, 1], [], []>} : vector<160x128xbf16>, vector<128x128xbf16>, vector<160x128xf32> -> vector<160x128xf32>
    %17 = arith.truncf %16 : vector<160x128xf32> to vector<160x128xbf16>
    %c0_10 = arith.constant 0 : index
    %c0_11 = arith.constant 0 : index
    %c0_12 = arith.constant 0 : index
    %18 = vector.load %arg6[%c0_10, %c0_11, %c0_12] : memref<1x160x128xbf16, #tpu.memory_space<vmem>>, vector<1x160x128xbf16>
    %19 = vector.shape_cast %18 : vector<1x160x128xbf16> to vector<160x128xbf16>
    %20 = vector.shape_cast %17 : vector<160x128xbf16> to vector<1x160x128xbf16>
    tpu.vector_store %arg6[%c0_10, %c0_11, %c0_12], %20 {strides = array<i32>} : memref<1x160x128xbf16, #tpu.memory_space<vmem>>, vector<1x160x128xbf16>,
    %c160_i32 = arith.constant 160 : i32
    %21 = arith.muli %arg1, %c160_i32 : i32
    %22 = tpu.iota {dimensions = array<i32: 0>} : vector<160x1xi32>
    %23 = vector.broadcast %21 : i32 to vector<160x1xi32>
    %24 = arith.addi %22, %23 : vector<160x1xi32>
    %c4_i32 = arith.constant 4 : i32
    %25 = vector.broadcast %c4_i32 : i32 to vector<160x1xi32>
    %26 = arith.shrsi %24, %25 : vector<160x1xi32>
    %c15_i32 = arith.constant 15 : i32
    %27 = vector.broadcast %c15_i32 : i32 to vector<160x1xi32>
    %28 = arith.andi %24, %27 : vector<160x1xi32>
    %c1_i32 = arith.constant 1 : i32
    %29 = vector.broadcast %c1_i32 : i32 to vector<160x1xi32>
    %30 = arith.cmpi sge, %26, %29 : vector<160x1xi32>
    %c8_i32 = arith.constant 8 : i32
    %31 = vector.broadcast %c8_i32 : i32 to vector<160x1xi32>
    %32 = arith.cmpi sle, %26, %31 : vector<160x1xi32>
    %33 = arith.andi %30, %32 : vector<160x1xi1>
    %c1_i32_13 = arith.constant 1 : i32
    %34 = vector.broadcast %c1_i32_13 : i32 to vector<160x1xi32>
    %35 = arith.cmpi sge, %28, %34 : vector<160x1xi32>
    %36 = arith.andi %33, %35 : vector<160x1xi1>
    %c8_i32_14 = arith.constant 8 : i32
    %37 = vector.broadcast %c8_i32_14 : i32 to vector<160x1xi32>
    %38 = arith.cmpi sle, %28, %37 : vector<160x1xi32>
    %39 = arith.andi %36, %38 : vector<160x1xi1>
    %cst_15 = arith.constant 1.000000e+00 : f32
    %cst_16 = arith.constant 0.000000e+00 : f32
    %40 = vector.broadcast %cst_15 : f32 to vector<160x1xf32>
    %41 = vector.broadcast %cst_16 : f32 to vector<160x1xf32>
    %42 = arith.select %39, %40, %41 : vector<160x1xi1>, vector<160x1xf32>
    %c0_17 = arith.constant 0 : index
    %c0_18 = arith.constant 0 : index
    %c0_19 = arith.constant 0 : index
    %43 = vector.load %arg7[%c0_17, %c0_18, %c0_19] : memref<1x8x128xf32, #tpu.memory_space<vmem>>, vector<1x8x128xf32>
    %44 = vector.shape_cast %43 : vector<1x8x128xf32> to vector<8x128xf32>
    %45 = arith.extf %17 : vector<160x128xbf16> to vector<160x128xf32>
    %46 = vector.broadcast %42 : vector<160x1xf32> to vector<160x128xf32>
    %47 = arith.mulf %45, %46 : vector<160x128xf32>
    %cst_20 = arith.constant dense<0.000000e+00> : vector<128xf32>
    %48 = vector.multi_reduction <add>, %47, %cst_20 [0] : vector<160x128xf32> to vector<128xf32>
    %49 = vector.shape_cast %48 : vector<128xf32> to vector<1x128xf32>
    %50 = arith.mulf %47, %47 : vector<160x128xf32>
    %cst_21 = arith.constant dense<0.000000e+00> : vector<128xf32>
    %51 = vector.multi_reduction <add>, %50, %cst_21 [0] : vector<160x128xf32> to vector<128xf32>
    %52 = vector.shape_cast %51 : vector<128xf32> to vector<1x128xf32>
    %cst_22 = arith.constant 0.000000e+00 : f32
    %53 = vector.broadcast %cst_22 : f32 to vector<6x128xf32>
    %54 = tpu.concatenate %49, %52, %53 in 0 : vector<1x128xf32>, vector<1x128xf32>, vector<6x128xf32> -> vector<8x128xf32>
    %55 = arith.addf %44, %54 : vector<8x128xf32>
    %c0_23 = arith.constant 0 : index
    %c0_24 = arith.constant 0 : index
    %c0_25 = arith.constant 0 : index
    %56 = vector.load %arg7[%c0_23, %c0_24, %c0_25] : memref<1x8x128xf32, #tpu.memory_space<vmem>>, vector<1x8x128xf32>
    %57 = vector.shape_cast %56 : vector<1x8x128xf32> to vector<8x128xf32>
    %58 = vector.shape_cast %55 : vector<8x128xf32> to vector<1x8x128xf32>
    tpu.vector_store %arg7[%c0_23, %c0_24, %c0_25], %58 {strides = array<i32>} : memref<1x8x128xf32, #tpu.memory_space<vmem>>, vector<1x8x128xf32>,
    return
  }
  func.func @transform_0(%arg0: i32, %arg1: i32) -> (i32, i32, i32) {
    %c0_i32 = arith.constant 0 : i32
    %c0_i32_0 = arith.constant 0 : i32
    return %arg0, %arg1, %c0_i32 : i32, i32, i32
  }
  func.func @transform_1(%arg0: i32, %arg1: i32) -> (i32, i32) {
    %c0_i32 = arith.constant 0 : i32
    %c0_i32_0 = arith.constant 0 : i32
    %c0_i32_1 = arith.constant 0 : i32
    return %c0_i32, %c0_i32_0 : i32, i32
  }
  func.func @transform_2(%arg0: i32, %arg1: i32) -> (i32, i32) {
    %c0_i32 = arith.constant 0 : i32
    %c0_i32_0 = arith.constant 0 : i32
    %c0_i32_1 = arith.constant 0 : i32
    return %c0_i32, %c0_i32_0 : i32, i32
  }
  func.func @transform_3(%arg0: i32, %arg1: i32) -> (i32, i32) {
    %c0_i32 = arith.constant 0 : i32
    %c0_i32_0 = arith.constant 0 : i32
    %c0_i32_1 = arith.constant 0 : i32
    return %c0_i32, %c0_i32_0 : i32, i32
  }
  func.func @transform_4(%arg0: i32, %arg1: i32) -> (i32, i32, i32) {
    %c0_i32 = arith.constant 0 : i32
    %c0_i32_0 = arith.constant 0 : i32
    return %arg0, %arg1, %c0_i32 : i32, i32, i32
  }
  func.func @transform_5(%arg0: i32, %arg1: i32) -> (i32, i32, i32) {
    %c0_i32 = arith.constant 0 : i32
    %c0_i32_0 = arith.constant 0 : i32
    %c0_i32_1 = arith.constant 0 : i32
    return %arg0, %c0_i32, %c0_i32_0 : i32, i32, i32
  }
}

module attributes {stable_mosaic.version = 11 : i64} {
  func.func @kernel(%arg0: i32, %arg1: i32, %arg2: memref<1x160x128xbf16, #tpu.memory_space<vmem>>, %arg3: memref<1x160x128xbf16, #tpu.memory_space<vmem>>, %arg4: memref<1x128xf32, #tpu.memory_space<vmem>>, %arg5: memref<1x128xf32, #tpu.memory_space<vmem>>, %arg6: memref<128x128xbf16, #tpu.memory_space<vmem>>, %arg7: memref<1x160x128xbf16, #tpu.memory_space<vmem>>, %arg8: memref<1x160x128xbf16, #tpu.memory_space<vmem>>, %arg9: memref<1x8x128xf32, #tpu.memory_space<vmem>>) attributes {dimension_semantics = [#tpu.dimension_semantics<parallel>, #tpu.dimension_semantics<arbitrary>], iteration_bounds = array<i64: 2, 1>, scalar_prefetch = 0 : i64, scratch_operands = 0 : i64, tpu.core_type = #tpu.core_type<tc>, window_params = [{transform_indices = @transform_0, window_bounds = array<i64: 1, 160, 128>}, {transform_indices = @transform_1, window_bounds = array<i64: 1, 160, 128>}, {pipeline_mode = #tpu.pipeline_mode<synchronous>, transform_indices = @transform_2, window_bounds = array<i64: 1, 128>}, {pipeline_mode = #tpu.pipeline_mode<synchronous>, transform_indices = @transform_3, window_bounds = array<i64: 1, 128>}, {pipeline_mode = #tpu.pipeline_mode<synchronous>, transform_indices = @transform_4, window_bounds = array<i64: 128, 128>}, {transform_indices = @transform_5, window_bounds = array<i64: 1, 160, 128>}, {transform_indices = @transform_6, window_bounds = array<i64: 1, 160, 128>}, {transform_indices = @transform_7, window_bounds = array<i64: 1, 8, 128>}]} {
    %c0_i32 = arith.constant 0 : i32
    %0 = arith.cmpi eq, %arg1, %c0_i32 : i32
    %1 = arith.extui %0 : i1 to i32
    %c0_i32_0 = arith.constant 0 : i32
    %2 = arith.cmpi ne, %1, %c0_i32_0 : i32
    scf.if %2 {
      %cst_32 = arith.constant 0.000000e+00 : f32
      %66 = vector.broadcast %cst_32 : f32 to vector<8x128xf32>
      %c0_33 = arith.constant 0 : index
      %c0_34 = arith.constant 0 : index
      %c0_35 = arith.constant 0 : index
      %67 = vector.load %arg9[%c0_33, %c0_34, %c0_35] : memref<1x8x128xf32, #tpu.memory_space<vmem>>, vector<1x8x128xf32>
      %68 = vector.shape_cast %67 : vector<1x8x128xf32> to vector<8x128xf32>
      %69 = vector.shape_cast %66 : vector<8x128xf32> to vector<1x8x128xf32>
      tpu.vector_store %arg9[%c0_33, %c0_34, %c0_35], %69 {strides = array<i32>} : memref<1x8x128xf32, #tpu.memory_space<vmem>>, vector<1x8x128xf32>,
    } else {
    }
    %c0 = arith.constant 0 : index
    %c0_1 = arith.constant 0 : index
    %c0_2 = arith.constant 0 : index
    %3 = vector.load %arg2[%c0, %c0_1, %c0_2] : memref<1x160x128xbf16, #tpu.memory_space<vmem>>, vector<1x160x128xbf16>
    %4 = vector.shape_cast %3 : vector<1x160x128xbf16> to vector<160x128xbf16>
    %5 = arith.extf %4 : vector<160x128xbf16> to vector<160x128xf32>
    %c0_3 = arith.constant 0 : index
    %c0_4 = arith.constant 0 : index
    %6 = vector.load %arg4[%c0_3, %c0_4] : memref<1x128xf32, #tpu.memory_space<vmem>>, vector<1x128xf32>
    %7 = vector.broadcast %6 : vector<1x128xf32> to vector<160x128xf32>
    %8 = arith.mulf %5, %7 : vector<160x128xf32>
    %c0_5 = arith.constant 0 : index
    %c0_6 = arith.constant 0 : index
    %9 = vector.load %arg5[%c0_5, %c0_6] : memref<1x128xf32, #tpu.memory_space<vmem>>, vector<1x128xf32>
    %10 = vector.broadcast %9 : vector<1x128xf32> to vector<160x128xf32>
    %11 = arith.addf %8, %10 : vector<160x128xf32>
    %c0_7 = arith.constant 0 : index
    %c0_8 = arith.constant 0 : index
    %c0_9 = arith.constant 0 : index
    %12 = vector.load %arg3[%c0_7, %c0_8, %c0_9] : memref<1x160x128xbf16, #tpu.memory_space<vmem>>, vector<1x160x128xbf16>
    %13 = vector.shape_cast %12 : vector<1x160x128xbf16> to vector<160x128xbf16>
    %14 = arith.extf %13 : vector<160x128xbf16> to vector<160x128xf32>
    %15 = arith.addf %11, %14 : vector<160x128xf32>
    %cst = arith.constant 0.000000e+00 : f32
    %16 = vector.broadcast %cst : f32 to vector<160x128xf32>
    %17 = arith.maximumf %15, %16 : vector<160x128xf32>
    %18 = arith.truncf %17 : vector<160x128xf32> to vector<160x128xbf16>
    %c0_10 = arith.constant 0 : index
    %c0_11 = arith.constant 0 : index
    %c0_12 = arith.constant 0 : index
    %19 = vector.load %arg8[%c0_10, %c0_11, %c0_12] : memref<1x160x128xbf16, #tpu.memory_space<vmem>>, vector<1x160x128xbf16>
    %20 = vector.shape_cast %19 : vector<1x160x128xbf16> to vector<160x128xbf16>
    %21 = vector.shape_cast %18 : vector<160x128xbf16> to vector<1x160x128xbf16>
    tpu.vector_store %arg8[%c0_10, %c0_11, %c0_12], %21 {strides = array<i32>} : memref<1x160x128xbf16, #tpu.memory_space<vmem>>, vector<1x160x128xbf16>,
    %c0_13 = arith.constant 0 : index
    %c0_14 = arith.constant 0 : index
    %22 = vector.load %arg6[%c0_13, %c0_14] : memref<128x128xbf16, #tpu.memory_space<vmem>>, vector<128x128xbf16>
    %cst_15 = arith.constant dense<0.000000e+00> : vector<160x128xf32>
    %23 = tpu.matmul %18, %22, %cst_15 {dimension_numbers = #tpu.dot_dimension_numbers<[1], [0], [0], [1], [0, 0, 1, 1], [], []>} : vector<160x128xbf16>, vector<128x128xbf16>, vector<160x128xf32> -> vector<160x128xf32>
    %24 = arith.truncf %23 : vector<160x128xf32> to vector<160x128xbf16>
    %c0_16 = arith.constant 0 : index
    %c0_17 = arith.constant 0 : index
    %c0_18 = arith.constant 0 : index
    %25 = vector.load %arg7[%c0_16, %c0_17, %c0_18] : memref<1x160x128xbf16, #tpu.memory_space<vmem>>, vector<1x160x128xbf16>
    %26 = vector.shape_cast %25 : vector<1x160x128xbf16> to vector<160x128xbf16>
    %27 = vector.shape_cast %24 : vector<160x128xbf16> to vector<1x160x128xbf16>
    tpu.vector_store %arg7[%c0_16, %c0_17, %c0_18], %27 {strides = array<i32>} : memref<1x160x128xbf16, #tpu.memory_space<vmem>>, vector<1x160x128xbf16>,
    %c160_i32 = arith.constant 160 : i32
    %28 = arith.muli %arg1, %c160_i32 : i32
    %29 = tpu.iota {dimensions = array<i32: 0>} : vector<160x1xi32>
    %30 = vector.broadcast %28 : i32 to vector<160x1xi32>
    %31 = arith.addi %29, %30 : vector<160x1xi32>
    %c4_i32 = arith.constant 4 : i32
    %32 = vector.broadcast %c4_i32 : i32 to vector<160x1xi32>
    %33 = arith.shrsi %31, %32 : vector<160x1xi32>
    %c15_i32 = arith.constant 15 : i32
    %34 = vector.broadcast %c15_i32 : i32 to vector<160x1xi32>
    %35 = arith.andi %31, %34 : vector<160x1xi32>
    %c1_i32 = arith.constant 1 : i32
    %36 = vector.broadcast %c1_i32 : i32 to vector<160x1xi32>
    %37 = arith.cmpi sge, %33, %36 : vector<160x1xi32>
    %c8_i32 = arith.constant 8 : i32
    %38 = vector.broadcast %c8_i32 : i32 to vector<160x1xi32>
    %39 = arith.cmpi sle, %33, %38 : vector<160x1xi32>
    %40 = arith.andi %37, %39 : vector<160x1xi1>
    %c1_i32_19 = arith.constant 1 : i32
    %41 = vector.broadcast %c1_i32_19 : i32 to vector<160x1xi32>
    %42 = arith.cmpi sge, %35, %41 : vector<160x1xi32>
    %43 = arith.andi %40, %42 : vector<160x1xi1>
    %c8_i32_20 = arith.constant 8 : i32
    %44 = vector.broadcast %c8_i32_20 : i32 to vector<160x1xi32>
    %45 = arith.cmpi sle, %35, %44 : vector<160x1xi32>
    %46 = arith.andi %43, %45 : vector<160x1xi1>
    %cst_21 = arith.constant 1.000000e+00 : f32
    %cst_22 = arith.constant 0.000000e+00 : f32
    %47 = vector.broadcast %cst_21 : f32 to vector<160x1xf32>
    %48 = vector.broadcast %cst_22 : f32 to vector<160x1xf32>
    %49 = arith.select %46, %47, %48 : vector<160x1xi1>, vector<160x1xf32>
    %c0_23 = arith.constant 0 : index
    %c0_24 = arith.constant 0 : index
    %c0_25 = arith.constant 0 : index
    %50 = vector.load %arg9[%c0_23, %c0_24, %c0_25] : memref<1x8x128xf32, #tpu.memory_space<vmem>>, vector<1x8x128xf32>
    %51 = vector.shape_cast %50 : vector<1x8x128xf32> to vector<8x128xf32>
    %52 = arith.extf %24 : vector<160x128xbf16> to vector<160x128xf32>
    %53 = vector.broadcast %49 : vector<160x1xf32> to vector<160x128xf32>
    %54 = arith.mulf %52, %53 : vector<160x128xf32>
    %cst_26 = arith.constant dense<0.000000e+00> : vector<128xf32>
    %55 = vector.multi_reduction <add>, %54, %cst_26 [0] : vector<160x128xf32> to vector<128xf32>
    %56 = vector.shape_cast %55 : vector<128xf32> to vector<1x128xf32>
    %57 = arith.mulf %54, %54 : vector<160x128xf32>
    %cst_27 = arith.constant dense<0.000000e+00> : vector<128xf32>
    %58 = vector.multi_reduction <add>, %57, %cst_27 [0] : vector<160x128xf32> to vector<128xf32>
    %59 = vector.shape_cast %58 : vector<128xf32> to vector<1x128xf32>
    %cst_28 = arith.constant 0.000000e+00 : f32
    %60 = vector.broadcast %cst_28 : f32 to vector<6x128xf32>
    %61 = tpu.concatenate %56, %59, %60 in 0 : vector<1x128xf32>, vector<1x128xf32>, vector<6x128xf32> -> vector<8x128xf32>
    %62 = arith.addf %51, %61 : vector<8x128xf32>
    %c0_29 = arith.constant 0 : index
    %c0_30 = arith.constant 0 : index
    %c0_31 = arith.constant 0 : index
    %63 = vector.load %arg9[%c0_29, %c0_30, %c0_31] : memref<1x8x128xf32, #tpu.memory_space<vmem>>, vector<1x8x128xf32>
    %64 = vector.shape_cast %63 : vector<1x8x128xf32> to vector<8x128xf32>
    %65 = vector.shape_cast %62 : vector<8x128xf32> to vector<1x8x128xf32>
    tpu.vector_store %arg9[%c0_29, %c0_30, %c0_31], %65 {strides = array<i32>} : memref<1x8x128xf32, #tpu.memory_space<vmem>>, vector<1x8x128xf32>,
    return
  }
  func.func @transform_0(%arg0: i32, %arg1: i32) -> (i32, i32, i32) {
    %c0_i32 = arith.constant 0 : i32
    %c0_i32_0 = arith.constant 0 : i32
    return %arg0, %arg1, %c0_i32 : i32, i32, i32
  }
  func.func @transform_1(%arg0: i32, %arg1: i32) -> (i32, i32, i32) {
    %c0_i32 = arith.constant 0 : i32
    %c0_i32_0 = arith.constant 0 : i32
    return %arg0, %arg1, %c0_i32 : i32, i32, i32
  }
  func.func @transform_2(%arg0: i32, %arg1: i32) -> (i32, i32) {
    %c0_i32 = arith.constant 0 : i32
    %c0_i32_0 = arith.constant 0 : i32
    %c0_i32_1 = arith.constant 0 : i32
    return %c0_i32, %c0_i32_0 : i32, i32
  }
  func.func @transform_3(%arg0: i32, %arg1: i32) -> (i32, i32) {
    %c0_i32 = arith.constant 0 : i32
    %c0_i32_0 = arith.constant 0 : i32
    %c0_i32_1 = arith.constant 0 : i32
    return %c0_i32, %c0_i32_0 : i32, i32
  }
  func.func @transform_4(%arg0: i32, %arg1: i32) -> (i32, i32) {
    %c0_i32 = arith.constant 0 : i32
    %c0_i32_0 = arith.constant 0 : i32
    %c0_i32_1 = arith.constant 0 : i32
    return %c0_i32, %c0_i32_0 : i32, i32
  }
  func.func @transform_5(%arg0: i32, %arg1: i32) -> (i32, i32, i32) {
    %c0_i32 = arith.constant 0 : i32
    %c0_i32_0 = arith.constant 0 : i32
    return %arg0, %arg1, %c0_i32 : i32, i32, i32
  }
  func.func @transform_6(%arg0: i32, %arg1: i32) -> (i32, i32, i32) {
    %c0_i32 = arith.constant 0 : i32
    %c0_i32_0 = arith.constant 0 : i32
    return %arg0, %arg1, %c0_i32 : i32, i32, i32
  }
  func.func @transform_7(%arg0: i32, %arg1: i32) -> (i32, i32, i32) {
    %c0_i32 = arith.constant 0 : i32
    %c0_i32_0 = arith.constant 0 : i32
    %c0_i32_1 = arith.constant 0 : i32
    return %arg0, %c0_i32, %c0_i32_0 : i32, i32, i32
  }
}

module attributes {stable_mosaic.version = 11 : i64} {
  func.func @kernel(%arg0: i32, %arg1: i32, %arg2: memref<1x160x128xbf16, #tpu.memory_space<vmem>>, %arg3: memref<1x160x128xbf16, #tpu.memory_space<vmem>>, %arg4: memref<1x128xf32, #tpu.memory_space<vmem>>, %arg5: memref<1x128xf32, #tpu.memory_space<vmem>>, %arg6: memref<1x160x128xbf16, #tpu.memory_space<vmem>>) attributes {dimension_semantics = [#tpu.dimension_semantics<parallel>, #tpu.dimension_semantics<parallel>], iteration_bounds = array<i64: 2, 1>, scalar_prefetch = 0 : i64, scratch_operands = 0 : i64, tpu.core_type = #tpu.core_type<tc>, window_params = [{transform_indices = @transform_0, window_bounds = array<i64: 1, 160, 128>}, {transform_indices = @transform_1, window_bounds = array<i64: 1, 160, 128>}, {pipeline_mode = #tpu.pipeline_mode<synchronous>, transform_indices = @transform_2, window_bounds = array<i64: 1, 128>}, {pipeline_mode = #tpu.pipeline_mode<synchronous>, transform_indices = @transform_3, window_bounds = array<i64: 1, 128>}, {transform_indices = @transform_4, window_bounds = array<i64: 1, 160, 128>}]} {
    %c0 = arith.constant 0 : index
    %c0_0 = arith.constant 0 : index
    %c0_1 = arith.constant 0 : index
    %0 = vector.load %arg2[%c0, %c0_0, %c0_1] : memref<1x160x128xbf16, #tpu.memory_space<vmem>>, vector<1x160x128xbf16>
    %1 = vector.shape_cast %0 : vector<1x160x128xbf16> to vector<160x128xbf16>
    %2 = arith.extf %1 : vector<160x128xbf16> to vector<160x128xf32>
    %c0_2 = arith.constant 0 : index
    %c0_3 = arith.constant 0 : index
    %3 = vector.load %arg4[%c0_2, %c0_3] : memref<1x128xf32, #tpu.memory_space<vmem>>, vector<1x128xf32>
    %4 = vector.broadcast %3 : vector<1x128xf32> to vector<160x128xf32>
    %5 = arith.mulf %2, %4 : vector<160x128xf32>
    %c0_4 = arith.constant 0 : index
    %c0_5 = arith.constant 0 : index
    %6 = vector.load %arg5[%c0_4, %c0_5] : memref<1x128xf32, #tpu.memory_space<vmem>>, vector<1x128xf32>
    %7 = vector.broadcast %6 : vector<1x128xf32> to vector<160x128xf32>
    %8 = arith.addf %5, %7 : vector<160x128xf32>
    %c0_6 = arith.constant 0 : index
    %c0_7 = arith.constant 0 : index
    %c0_8 = arith.constant 0 : index
    %9 = vector.load %arg3[%c0_6, %c0_7, %c0_8] : memref<1x160x128xbf16, #tpu.memory_space<vmem>>, vector<1x160x128xbf16>
    %10 = vector.shape_cast %9 : vector<1x160x128xbf16> to vector<160x128xbf16>
    %11 = arith.extf %10 : vector<160x128xbf16> to vector<160x128xf32>
    %12 = arith.addf %8, %11 : vector<160x128xf32>
    %cst = arith.constant 0.000000e+00 : f32
    %13 = vector.broadcast %cst : f32 to vector<160x128xf32>
    %14 = arith.maximumf %12, %13 : vector<160x128xf32>
    %15 = arith.truncf %14 : vector<160x128xf32> to vector<160x128xbf16>
    %c0_9 = arith.constant 0 : index
    %c0_10 = arith.constant 0 : index
    %c0_11 = arith.constant 0 : index
    %16 = vector.load %arg6[%c0_9, %c0_10, %c0_11] : memref<1x160x128xbf16, #tpu.memory_space<vmem>>, vector<1x160x128xbf16>
    %17 = vector.shape_cast %16 : vector<1x160x128xbf16> to vector<160x128xbf16>
    %18 = vector.shape_cast %15 : vector<160x128xbf16> to vector<1x160x128xbf16>
    tpu.vector_store %arg6[%c0_9, %c0_10, %c0_11], %18 {strides = array<i32>} : memref<1x160x128xbf16, #tpu.memory_space<vmem>>, vector<1x160x128xbf16>,
    return
  }
  func.func @transform_0(%arg0: i32, %arg1: i32) -> (i32, i32, i32) {
    %c0_i32 = arith.constant 0 : i32
    %c0_i32_0 = arith.constant 0 : i32
    return %arg0, %arg1, %c0_i32 : i32, i32, i32
  }
  func.func @transform_1(%arg0: i32, %arg1: i32) -> (i32, i32, i32) {
    %c0_i32 = arith.constant 0 : i32
    %c0_i32_0 = arith.constant 0 : i32
    return %arg0, %arg1, %c0_i32 : i32, i32, i32
  }
  func.func @transform_2(%arg0: i32, %arg1: i32) -> (i32, i32) {
    %c0_i32 = arith.constant 0 : i32
    %c0_i32_0 = arith.constant 0 : i32
    %c0_i32_1 = arith.constant 0 : i32
    return %c0_i32, %c0_i32_0 : i32, i32
  }
  func.func @transform_3(%arg0: i32, %arg1: i32) -> (i32, i32) {
    %c0_i32 = arith.constant 0 : i32
    %c0_i32_0 = arith.constant 0 : i32
    %c0_i32_1 = arith.constant 0 : i32
    return %c0_i32, %c0_i32_0 : i32, i32
  }
  func.func @transform_4(%arg0: i32, %arg1: i32) -> (i32, i32, i32) {
    %c0_i32 = arith.constant 0 : i32
    %c0_i32_0 = arith.constant 0 : i32
    return %arg0, %arg1, %c0_i32 : i32, i32, i32
  }
}

</mosaic_0001>

<bundles_post_ra>
// kernel: bottleneck_stage_forward.7
= control target key start
LH: loop header
LB: loop body
LE: loop exit
PB: predicated region body
PF: predicated region fallthrough
CT: control target
= control target key end

     0   :  { %s1084_s12 = smov 0   ;;  %s1086_s13 = smov 0   ;;  %s1191_s0 = inlined_call_operand.vmem [shape: bf16[2,160,128], index: 0, kind: input, shape index: {}]   ;;  %s1192_s1 = inlined_call_operand.vmem [shape: bf16[128,128], index: 1, kind: input, shape index: {}]   ;;  %s1193_s2 = inlined_call_operand.vmem [shape: bf16[2,160,128], index: 2, kind: output, shape index: {0}]   ;;  %s1194_s3 = inlined_call_operand.vmem [shape: f32[2,8,128], index: 3, kind: output, shape index: {1}]  }
   0x1   :  { %s1088_s14 = smov 0  }
   0x2 LB: > { %s26_s15 = sadd.s32 1, %s1058_s13  ;;  %p803_p0 = scmp.ge.s32.totalorder %s1062_s14, 1  ;;  %s1062_s14 = sphi %s1088_s14, %s14_s14   ;;  %s1058_s13 = sphi %s1086_s13, %s1196_s13   ;;  %s1054_s12 = sphi %s1084_s12, %s1195_s12  }
   0x3   : > { %p28_p1 = scmp.ge.s32.totalorder %s26_s15, 2  ;;  %p161_p2 = scmp.lt.s32.totalorder %s1062_s14, 3 }
   0x5   : > { %s1198_s15 = smov (%p28_p1, %s26_s15), 0  ;;  %p162_p3 = pnand %p803_p0, %p161_p2 }
   0x6   : > { %v1022_v0 = vld [vmem:[%s1192_s1] sm:$0xff] (!%p162_p3)   ;;  %p198_p4 = scmp.lt.s32.totalorder (!%p162_p3), %s1054_s12, 1  ;;  %v1023_v1 = vld [vmem:[%s1192_s1 + $0x8] sm:$0xff] (!%p162_p3)   ;;  %v1024_v2 = vld [vmem:[%s1192_s1 + $0x10] sm:$0xff] (!%p162_p3)   ;;  %vm675_vm0 = vcmask (!%p162_p3), 1040384   ;;  %vm677_vm1 = vcmask (!%p162_p3), 1041408  }
   0x7   : > { %165 = sbr.rel (%p162_p3) target bundleno = 315 (0x13b), region = 28  ;;  %944 = vmatprep.subr.bf16.mxu0 (!%p162_p3), %v1022_v0  ;;  %980 = vmatprep.subr.bf16.mxu1 (!%p162_p3), %v1022_v0  ;;  %v1025_v3 = vld [vmem:[%s1192_s1 + $0x18] sm:$0xff] (!%p162_p3)   ;;  %v1026_v5 = vld [vmem:[%s1192_s1 + $0x20] sm:$0xff] (!%p162_p3)   ;;  %v1027_v7 = vld [vmem:[%s1192_s1 + $0x28] sm:$0xff] (!%p162_p3)  }
   0x8   : > { %945 = vmatpush3.bf16.msra.mxu0 (!%p162_p3), %v1022_v0  ;;  %988 = vmatpush3.bf16.msra.mxu1 (!%p162_p3), %v1022_v0  ;;  %v1028_v8 = vld [vmem:[%s1192_s1 + $0x30] sm:$0xff] (!%p162_p3)   ;;  %v1029_v9 = vld [vmem:[%s1192_s1 + $0x38] sm:$0xff] (!%p162_p3)  }
   0x9   : > { %946 = vmatprep.subr.bf16.mxu0 (!%p162_p3), %v1023_v1  ;;  %981 = vmatprep.subr.bf16.mxu1 (!%p162_p3), %v1023_v1 }
   0xc   : > { %947 = vmatpush3.bf16.msra.mxu0 (!%p162_p3), %v1023_v1  ;;  %989 = vmatpush3.bf16.msra.mxu1 (!%p162_p3), %v1023_v1 }
   0xd   : > { %948 = vmatprep.subr.bf16.mxu0 (!%p162_p3), %v1024_v2  ;;  %982 = vmatprep.subr.bf16.mxu1 (!%p162_p3), %v1024_v2 }
   0xe   : > { %s1200_s12 = smov (!%p198_p4, %s1054_s12), 1 }
   0xf   : > { %s996_s22 = smul.u32 80, %s1200_s12  ;;  %s806_s16 = sshll.u32 %s1200_s12, 3 }
  0x10   : > { %949 = vmatpush3.bf16.msra.mxu0 %v1024_v2  ;;  %990 = vmatpush3.bf16.msra.mxu1 %v1024_v2  ;;  %s220_s19 = scalar_lea.vmem %s1194_s3, %s806_s16 }
  0x11   : > { %s1119_s25 = scalar_lea.vmem %s1191_s0, %s996_s22  ;;  %950 = vmatprep.subr.bf16.mxu0 %v1025_v3  ;;  %983 = vmatprep.subr.bf16.mxu1 %v1025_v3  ;;  %s1151_s11 = scalar_lea.vmem %s1193_s2, %s996_s22 }
  0x12   : > { %v1030_v4 = vld [vmem:[%s1119_s25] sm:$0xff]   ;;  %v1036_v6 = vld [vmem:[%s1119_s25 + $0x30] sm:$0xff]   ;;  %v1031_v10 = vld [vmem:[%s1119_s25 + $0x8] sm:$0xff]  }
  0x13   : > { %960 = vmatprep.mubr.bf16.mxu0 %v1030_v4  ;;  %972 = vmatprep.mubr.bf16.mxu1 %v1036_v6  ;;  %v1037_v11 = vld [vmem:[%s1119_s25 + $0x38] sm:$0xff]   ;;  %v1032_v12 = vld [vmem:[%s1119_s25 + $0x10] sm:$0xff]   ;;  %v1038_v13 = vld [vmem:[%s1119_s25 + $0x40] sm:$0xff]  }
  0x14   : > { %951 = vmatpush3.bf16.msra.mxu0 %v1025_v3  ;;  %991 = vmatpush3.bf16.msra.mxu1 %v1025_v3  ;;  %v1033_v14 = vld [vmem:[%s1119_s25 + $0x18] sm:$0xff]   ;;  %v1039_v15 = vld [vmem:[%s1119_s25 + $0x48] sm:$0xff]   ;;  %v1034_v16 = vld [vmem:[%s1119_s25 + $0x20] sm:$0xff]  }
  0x15   : > { %952 = vmatprep.subr.bf16.mxu0 %v1026_v5  ;;  %984 = vmatprep.subr.bf16.mxu1 %v1026_v5  ;;  %v1035_v17 = vld [vmem:[%s1119_s25 + $0x28] sm:$0xff]  }
  0x18   : > { %953 = vmatpush3.bf16.msra.mxu0 %v1026_v5  ;;  %992 = vmatpush3.bf16.msra.mxu1 %v1026_v5 }
  0x19   : > { %954 = vmatprep.subr.bf16.mxu0 %v1027_v7  ;;  %985 = vmatprep.subr.bf16.mxu1 %v1027_v7 }
  0x1c   : > { %955 = vmatpush3.bf16.msra.mxu0 %v1027_v7  ;;  %993 = vmatpush3.bf16.msra.mxu1 %v1027_v7 }
  0x1d   : > { %956 = vmatprep.subr.bf16.mxu0 %v1028_v8  ;;  %986 = vmatprep.subr.bf16.mxu1 %v1028_v8 }
  0x20   : > { %957 = vmatpush3.bf16.msra.mxu0 %v1028_v8  ;;  %994 = vmatpush3.bf16.msra.mxu1 %v1028_v8 }
  0x21   : > { %958 = vmatprep.subr.bf16.mxu0 %v1029_v9  ;;  %987 = vmatprep.subr.bf16.mxu1 %v1029_v9 }
  0x24   : > { %959 = vmatpush3.bf16.msra.mxu0 %v1029_v9  ;;  %995 = vmatpush3.bf16.msra.mxu1 %v1029_v9 }
  0x27   : > { %961 = vmatmul.mubr.bf16.vlgmr.msra.gmra.mrb[0].mxu0 %v1031_v10  ;;  %973 = vmatmul.mubr.bf16.vlgmr.msra.gmra.mrb[0].mxu1 %v1037_v11 }
  0x28   : > { %964 = vmatprep.mubr.bf16.mxu0 %v1032_v12  ;;  %976 = vmatprep.mubr.bf16.mxu1 %v1038_v13 }
  0x2f   : > { %965 = vmatmul.mubr.bf16.gmra.mrb[4].mxu0 %v1033_v14  ;;  %977 = vmatmul.mubr.bf16.gmra.mrb[4].mxu1 %v1039_v15 }
  0x30   : > { %968 = vmatprep.mubr.bf16.mxu0 %v1034_v16 }
  0x37   : > { %969 = vmatmul.mubr.bf16.gmra.mrb[8].mxu0 %v1035_v17 }
  0xfa   : > { %v962_v18 = vpop.f32.mrb[0].mxu0  ;;  %v974_v19 = vpop.f32.mrb[0].mxu1 }
  0xfb   : > { %v405_v20 = vpop.f32.mrb[1].mxu0  ;;  %v453_v21 = vpop.f32.mrb[1].mxu1 }
  0xfc   : > { %v963_v22 = vpop.f32.mrb[2].mxu0  ;;  %v975_v23 = vpop.f32.mrb[2].mxu1 }
  0xfd   : > { %v485_v24 = vpack.c.bf16 %v963_v22, %v962_v18  ;;  %v408_v25 = vpop.f32.mrb[3].mxu0  ;;  %v1153_v26 = vpack.c.bf16 %v975_v23, %v974_v19  ;;  %v456_v27 = vpop.f32.mrb[3].mxu1 }
  0xfe   : > { %v484_v28 = vpack.c.bf16 %v408_v25, %v405_v20  ;;  %v1155_v29 = vpack.c.bf16 %v456_v27, %v453_v21 }
  0xff   : > { %917 = vst [vmem:[%s1151_s11 + $0x8] sm:$0xff] %v485_v24   ;;  %923 = vst [vmem:[%s1151_s11 + $0x38] sm:$0xff] %v1153_v26   ;;  %v587_v30 = vunpack.c.l.bf16 %v485_v24  ;;  %v588_v33 = vunpack.c.h.bf16 %v485_v24 }
 0x100   : > { %871 = vst [vmem:[%s1151_s11] sm:$0xff] %v484_v28   ;;  %v585_v31 = vunpack.c.l.bf16 %v484_v28  ;;  %v586_v32 = vunpack.c.h.bf16 %v484_v28  ;;  %922 = vst [vmem:[%s1151_s11 + $0x30] sm:$0xff] %v1155_v29   ;;  %v597_v27 = vunpack.c.l.bf16 %v1155_v29 }
 0x101   : > { %v632_v41 = vmul.f32 %v587_v30, %v587_v30  ;;  %v633_v46 = vmul.f32 %v588_v33, %v588_v33 }
 0x102   : > { %v605_v34 = vadd.f32 %v586_v32, %v585_v31  ;;  %v630_v35 = vmul.f32 %v585_v31, %v585_v31  ;;  %v631_v36 = vmul.f32 %v586_v32, %v586_v32  ;;  %v966_v37 = vpop.f32.mrb[4].mxu0  ;;  %v978_v38 = vpop.f32.mrb[4].mxu1  ;;  %v598_v31 = vunpack.c.h.bf16 %v1155_v29 }
 0x103   : > { %v421_v39 = vpop.f32.mrb[5].mxu0  ;;  %v469_v40 = vpop.f32.mrb[5].mxu1 }
 0x104   : > { %v606_v42 = vadd.f32 %v605_v34, %v587_v30  ;;  %v650_v43 = vadd.f32 %v631_v36, %v630_v35  ;;  %v967_v44 = vpop.f32.mrb[6].mxu0  ;;  %v979_v45 = vpop.f32.mrb[6].mxu1  ;;  %v642_v35 = vmul.f32 %v597_v27, %v597_v27 }
 0x105   : > { %v487_v47 = vpack.c.bf16 %v967_v44, %v966_v37  ;;  %v424_v48 = vpop.f32.mrb[7].mxu0  ;;  %v1163_v49 = vpack.c.bf16 %v979_v45, %v978_v38  ;;  %v472_v50 = vpop.f32.mrb[7].mxu1  ;;  %v600_v37 = vunpack.c.h.bf16 %v1153_v26 }
 0x106   : > { %v651_v51 = vadd.f32 %v650_v43, %v632_v41  ;;  %v486_v52 = vpack.c.bf16 %v424_v48, %v421_v39  ;;  %v607_v53 = vadd.f32 %v606_v42, %v588_v33  ;;  %v492_v54 = vpack.c.bf16 %v472_v50, %v469_v40 }
 0x107   : > { %919 = vst [vmem:[%s1151_s11 + $0x18] sm:$0xff] %v487_v47   ;;  %925 = vst [vmem:[%s1151_s11 + $0x48] sm:$0xff] %v1163_v49   ;;  %v591_v58 = vunpack.c.l.bf16 %v487_v47  ;;  %v592_v62 = vunpack.c.h.bf16 %v487_v47  ;;  %v599_v33 = vunpack.c.l.bf16 %v1153_v26  ;;  %v643_v39 = vmul.f32 %v598_v31, %v598_v31 }
 0x108   : > { %918 = vst [vmem:[%s1151_s11 + $0x10] sm:$0xff] %v486_v52   ;;  %v589_v55 = vunpack.c.l.bf16 %v486_v52  ;;  %v590_v56 = vunpack.c.h.bf16 %v486_v52  ;;  %v652_v57 = vadd.f32 %v651_v51, %v633_v46  ;;  %924 = vst [vmem:[%s1151_s11 + $0x40] sm:$0xff] %v492_v54   ;;  %v601_v44 = vunpack.c.l.bf16 %v492_v54 }
 0x109   : > { %v636_v6 = vmul.f32 %v591_v58, %v591_v58  ;;  %v637_v10 = vmul.f32 %v592_v62, %v592_v62  ;;  %v644_v41 = vmul.f32 %v599_v33, %v599_v33  ;;  %v645_v45 = vmul.f32 %v600_v37, %v600_v37 }
 0x10a   : > { %v608_v59 = vadd.f32 %v607_v53, %v589_v55  ;;  %v634_v60 = vmul.f32 %v589_v55, %v589_v55  ;;  %v970_v61 = vpop.f32.mrb[8].mxu0  ;;  %v635_v1 = vmul.f32 %v590_v56, %v590_v56  ;;  %v602_v47 = vunpack.c.h.bf16 %v492_v54 }
 0x10b   : > { %v437_v63 = vpop.f32.mrb[9].mxu0  ;;  %v603_v29 = vunpack.c.l.bf16 %v1163_v49  ;;  %v646_v51 = vmul.f32 %v601_v44, %v601_v44  ;;  %v604_v53 = vunpack.c.h.bf16 %v1163_v49 }
 0x10c   : > { %v609_v0 = vadd.f32 %v608_v59, %v590_v56  ;;  %v653_v2 = vadd.f32 %v652_v57, %v634_v60  ;;  %v971_v3 = vpop.f32.mrb[10].mxu0  ;;  %v647_v26 = vmul.f32 %v602_v47, %v602_v47 }
 0x10d   : > { %v489_v4 = vpack.c.bf16 %v971_v3, %v970_v61  ;;  %v440_v5 = vpop.f32.mrb[11].mxu0  ;;  %v648_v57 = vmul.f32 %v603_v29, %v603_v29  ;;  %v649_v60 = vmul.f32 %v604_v53, %v604_v53 }
 0x10e   : > { %v610_v7 = vadd.f32 %v609_v0, %v591_v58  ;;  %v654_v8 = vadd.f32 %v653_v2, %v635_v1  ;;  %v488_v9 = vpack.c.bf16 %v440_v5, %v437_v63 }
 0x10f   : > { %921 = vst [vmem:[%s1151_s11 + $0x28] sm:$0xff] %v489_v4   ;;  %v595_v15 = vunpack.c.l.bf16 %v489_v4  ;;  %v596_v19 = vunpack.c.h.bf16 %v489_v4 }
 0x110   : > { %v655_v11 = vadd.f32 %v654_v8, %v636_v6  ;;  %920 = vst [vmem:[%s1151_s11 + $0x20] sm:$0xff] %v488_v9   ;;  %v593_v12 = vunpack.c.l.bf16 %v488_v9  ;;  %v594_v13 = vunpack.c.h.bf16 %v488_v9  ;;  %v611_v14 = vadd.f32 %v610_v7, %v592_v62 }
 0x111   : > { %v640_v23 = vmul.f32 %v595_v15, %v595_v15  ;;  %v641_v28 = vmul.f32 %v596_v19, %v596_v19 }
 0x112   : > { %v612_v16 = vadd.f32 %v611_v14, %v593_v12  ;;  %v638_v17 = vmul.f32 %v593_v12, %v593_v12  ;;  %v656_v18 = vadd.f32 %v655_v11, %v637_v10  ;;  %v639_v21 = vmul.f32 %v594_v13, %v594_v13 }
 0x114   : > { %v613_v20 = vadd.f32 %v612_v16, %v594_v13  ;;  %v657_v22 = vadd.f32 %v656_v18, %v638_v17 }
 0x116   : > { %v614_v24 = vadd.f32 %v613_v20, %v595_v15  ;;  %v658_v25 = vadd.f32 %v657_v22, %v639_v21 }
 0x118   : > { %v659_v30 = vadd.f32 %v658_v25, %v640_v23  ;;  %v615_v32 = vadd.f32 %v614_v24, %v596_v19 }
 0x11a   : > { %v616_v34 = vadd.f32 %v615_v32, %v597_v27  ;;  %v660_v36 = vadd.f32 %v659_v30, %v641_v28 }
 0x11c   : > { %v617_v38 = vadd.f32 %v616_v34, %v598_v31  ;;  %v661_v40 = vadd.f32 %v660_v36, %v642_v35 }
 0x11e   : > { %v618_v42 = vadd.f32 %v617_v38, %v599_v33  ;;  %v662_v43 = vadd.f32 %v661_v40, %v643_v39 }
 0x120   : > { %v663_v46 = vadd.f32 %v662_v43, %v644_v41  ;;  %v619_v48 = vadd.f32 %v618_v42, %v600_v37 }
 0x122   : > { %v620_v50 = vadd.f32 %v619_v48, %v601_v44  ;;  %v664_v52 = vadd.f32 %v663_v46, %v645_v45 }
 0x124   : > { %v621_v55 = vadd.f32 %v620_v50, %v602_v47  ;;  %v665_v56 = vadd.f32 %v664_v52, %v646_v51 }
 0x126   : > { %v622_v58 = vadd.f32 %v621_v55, %v603_v29  ;;  %v666_v59 = vadd.f32 %v665_v56, %v647_v26 }
 0x128   : > { %v623_v61 = vadd.f32 %v622_v58, %v604_v53  ;;  %v667_v62 = vadd.f32 %v666_v59, %v648_v57 }
 0x12a   : > { %v624_v63 = vrot.slane %v623_v61, 4  ;;  %v668_v54 = vadd.f32 %v667_v62, %v649_v60 }
 0x12c   : > { %v625_v0 = vadd.f32 %v624_v63, %v623_v61  ;;  %v669_v1 = vrot.slane %v668_v54, 4 }
 0x12e   : > { %v626_v2 = vrot.slane %v625_v0, 2  ;;  %v670_v3 = vadd.f32 %v669_v1, %v668_v54 }
 0x130   : > { %v627_v4 = vadd.f32 %v626_v2, %v625_v0  ;;  %v671_v5 = vrot.slane %v670_v3, 2 }
 0x132   : > { %v628_v6 = vrot.slane %v627_v4, 1  ;;  %v672_v49 = vadd.f32 %v671_v5, %v670_v3 }
 0x134   : > { %v673_v7 = vrot.slane %v672_v49, 1  ;;  %v629_v8 = vadd.f32 %v628_v6, %v627_v4 }
 0x136   : > { %v674_v9 = vadd.f32 %v673_v7, %v672_v49 }
 0x138   : > { %v676_v10 = vsel %vm675_vm0, %v629_v8, %v674_v9 }
 0x139   : > { %v678_v11 = vsel %vm677_vm1, %v676_v10, 0.0 }
 0x13a   : > { %680 = vst [vmem:[%s220_s19] sm:$0xff] %v678_v11 }
 0x13b PF: > { %s14_s14 = sadd.s32 1, %s1062_s14   ;;  %s1195_s12 = smov %s1058_s13 }
 0x13c   : > { %p11_p5 = scmp.ge.s32.totalorder %s14_s14, 4   ;;  %s1196_s13 = smov %s1198_s15 }
 0x13e   :  { %13 = sbr.rel (!%p11_p5) target bundleno = 2 (0x2), region = 74 }

// kernel: bottleneck_stage_forward.9
= control target key start
LH: loop header
LB: loop body
LE: loop exit
PB: predicated region body
PF: predicated region fallthrough
CT: control target
= control target key end

     0   :  { %s1487_s18 = smov 0   ;;  %s1489_s19 = smov 0   ;;  %s2178_s0 = inlined_call_operand.vmem [shape: bf16[2,160,128], index: 0, kind: input, shape index: {}]   ;;  %s2179_s1 = inlined_call_operand.vmem [shape: f32[1,128], index: 1, kind: input, shape index: {}]   ;;  %s2180_s2 = inlined_call_operand.vmem [shape: f32[1,128], index: 2, kind: input, shape index: {}]   ;;  %s2181_s3 = inlined_call_operand.vmem [shape: bf16[128,128], index: 3, kind: input, shape index: {}]   ;;  %s2182_s4 = inlined_call_operand.vmem [shape: bf16[2,160,128], index: 4, kind: output, shape index: {0}]   ;;  %s2183_s5 = inlined_call_operand.vmem [shape: f32[2,8,128], index: 5, kind: output, shape index: {1}]  }
   0x1   :  { %s1491_s20 = smov 0  }
   0x2 LB: > { %s28_s21 = sadd.s32 1, %s1450_s19  ;;  %p1164_p0 = scmp.ge.s32.totalorder %s1454_s20, 1  ;;  %s1454_s20 = sphi %s1491_s20, %s16_s20   ;;  %s1450_s19 = sphi %s1489_s19, %s2325_s19   ;;  %s1446_s18 = sphi %s1487_s18, %s2324_s18  }
   0x3   : > { %p30_p1 = scmp.ge.s32.totalorder %s28_s21, 2  ;;  %p211_p2 = scmp.lt.s32.totalorder %s1454_s20, 3 }
   0x5   : > { %s2327_s21 = smov (%p30_p1, %s28_s21), 0  ;;  %p212_p3 = pnand %p1164_p0, %p211_p2 }
   0x6   : > { %v1424_v0 = vld [vmem:[%s2181_s3] sm:$0xff] (!%p212_p3)   ;;  %p252_p4 = scmp.lt.s32.totalorder (!%p212_p3), %s1446_s18, 1  ;;  %v1425_v1 = vld [vmem:[%s2181_s3 + $0x8] sm:$0xff] (!%p212_p3)   ;;  %v1426_v2 = vld [vmem:[%s2181_s3 + $0x10] sm:$0xff] (!%p212_p3)  }
   0x7   : > { %215 = sbr.rel (%p212_p3) target bundleno = 317 (0x13d), region = 36  ;;  %1346 = vmatprep.subr.bf16.mxu0 (!%p212_p3), %v1424_v0  ;;  %1382 = vmatprep.subr.bf16.mxu1 (!%p212_p3), %v1424_v0  ;;  %v1427_v3 = vld [vmem:[%s2181_s3 + $0x18] sm:$0xff] (!%p212_p3)   ;;  %v1531_v5 = vld [vmem:[%s2179_s1] ss:$0 sm:$0xff] (!%p212_p3)  ;;  %v1429_v28 = vld [vmem:[%s2181_s3 + $0x28] sm:$0xff] (!%p212_p3)  }
   0x8   : > { %1347 = vmatpush3.bf16.msra.mxu0 (!%p212_p3), %v1424_v0  ;;  %1390 = vmatpush3.bf16.msra.mxu1 (!%p212_p3), %v1424_v0  ;;  %v1538_v10 = vld [vmem:[%s2180_s2] ss:$0 sm:$0xff] (!%p212_p3)  ;;  %v1430_v40 = vld [vmem:[%s2181_s3 + $0x30] sm:$0xff] (!%p212_p3)   ;;  %v1431_v57 = vld [vmem:[%s2181_s3 + $0x38] sm:$0xff] (!%p212_p3)  }
   0x9   : > { %1348 = vmatprep.subr.bf16.mxu0 (!%p212_p3), %v1425_v1  ;;  %1383 = vmatprep.subr.bf16.mxu1 (!%p212_p3), %v1425_v1  ;;  %v1428_v17 = vld [vmem:[%s2181_s3 + $0x20] sm:$0xff] (!%p212_p3)  }
   0xc   : > { %1349 = vmatpush3.bf16.msra.mxu0 (!%p212_p3), %v1425_v1  ;;  %1391 = vmatpush3.bf16.msra.mxu1 (!%p212_p3), %v1425_v1 }
   0xd   : > { %1350 = vmatprep.subr.bf16.mxu0 (!%p212_p3), %v1426_v2  ;;  %1384 = vmatprep.subr.bf16.mxu1 (!%p212_p3), %v1426_v2 }
   0xe   : > { %s2329_s18 = smov (!%p252_p4, %s1446_s18), 1 }
   0xf   : > { %s1398_s28 = smul.u32 80, %s2329_s18 }
  0x10   : > { %1351 = vmatpush3.bf16.msra.mxu0 %v1426_v2  ;;  %1392 = vmatpush3.bf16.msra.mxu1 %v1426_v2 }
  0x11   : > { %s1522_s6 = scalar_lea.vmem %s2178_s0, %s1398_s28  ;;  %1352 = vmatprep.subr.bf16.mxu0 %v1427_v3  ;;  %1385 = vmatprep.subr.bf16.mxu1 %v1427_v3  ;;  %s1880_s27 = scalar_lea.vmem %s2182_s4, %s1398_s28 }
  0x12   : > { %v1221_v4 = vld [vmem:[%s1522_s6] sm:$0xff]   ;;  %v1310_v8 = vld [vmem:[%s1522_s6 + $0x8] sm:$0xff]   ;;  %v1311_v9 = vld [vmem:[%s1522_s6 + $0x10] sm:$0xff]   ;;  %s1167_s28 = sshll.u32 %s2329_s18, 3 }
  0x13   : > { %v1222_v6 = vunpack.c.l.bf16 %v1221_v4  ;;  %v1223_v7 = vunpack.c.h.bf16 %v1221_v4  ;;  %v1226_v11 = vunpack.c.l.bf16 %v1310_v8  ;;  %v1227_v12 = vunpack.c.h.bf16 %v1310_v8  ;;  %v1312_v16 = vld [vmem:[%s1522_s6 + $0x18] sm:$0xff]   ;;  %v1315_v30 = vld [vmem:[%s1522_s6 + $0x30] sm:$0xff]   ;;  %v1313_v34 = vld [vmem:[%s1522_s6 + $0x20] sm:$0xff]  }
  0x14   : > { %v1230_v13 = vunpack.c.l.bf16 %v1311_v9  ;;  %v1231_v18 = vunpack.c.h.bf16 %v1311_v9  ;;  %v1234_v24 = vunpack.c.l.bf16 %v1312_v16  ;;  %1353 = vmatpush3.bf16.msra.mxu0 %v1427_v3  ;;  %1393 = vmatpush3.bf16.msra.mxu1 %v1427_v3  ;;  %v1235_v27 = vunpack.c.h.bf16 %v1312_v16  ;;  %v1316_v37 = vld [vmem:[%s1522_s6 + $0x38] sm:$0xff]   ;;  %v1317_v48 = vld [vmem:[%s1522_s6 + $0x40] sm:$0xff]   ;;  %v1318_v62 = vld [vmem:[%s1522_s6 + $0x48] sm:$0xff]  }
  0x15   : > { %v328_v14 = vmul.f32 %v1222_v6, %v1531_v5  ;;  %v329_v15 = vmul.f32 %v1223_v7, %v1531_v5  ;;  %v330_v21 = vmul.f32 %v1226_v11, %v1531_v5  ;;  %v331_v22 = vmul.f32 %v1227_v12, %v1531_v5  ;;  %1354 = vmatprep.subr.bf16.mxu0 %v1428_v17  ;;  %v1314_v3 = vld [vmem:[%s1522_s6 + $0x28] sm:$0xff]   ;;  %s274_s6 = scalar_lea.vmem %s2183_s5, %s1167_s28 }
  0x16   : > { %v332_v23 = vmul.f32 %v1230_v13, %v1531_v5  ;;  %1386 = vmatprep.subr.bf16.mxu1 %v1428_v17  ;;  %v333_v29 = vmul.f32 %v1231_v18, %v1531_v5  ;;  %v334_v36 = vmul.f32 %v1234_v24, %v1531_v5  ;;  %v335_v38 = vmul.f32 %v1235_v27, %v1531_v5 }
  0x17   : > { %v355_v19 = vadd.f32 %v1538_v10, %v328_v14  ;;  %v356_v20 = vadd.f32 %v1538_v10, %v329_v15  ;;  %v357_v32 = vadd.f32 %v1538_v10, %v330_v21  ;;  %v358_v33 = vadd.f32 %v1538_v10, %v331_v22 }
  0x18   : > { %v359_v35 = vadd.f32 %v1538_v10, %v332_v23  ;;  %1355 = vmatpush3.bf16.msra.mxu0 %v1428_v17  ;;  %v1246_v39 = vunpack.c.l.bf16 %v1315_v30  ;;  %1394 = vmatpush3.bf16.msra.mxu1 %v1428_v17  ;;  %v360_v41 = vadd.f32 %v1538_v10, %v333_v29  ;;  %v1238_v42 = vunpack.c.l.bf16 %v1313_v34 }
  0x19   : > { %v375_v25 = vmax.f32 %v355_v19, 0.0  ;;  %v376_v26 = vmax.f32 %v356_v20, 0.0  ;;  %1356 = vmatprep.subr.bf16.mxu0 %v1429_v28  ;;  %v1247_v43 = vunpack.c.h.bf16 %v1315_v30  ;;  %v377_v44 = vmax.f32 %v357_v32, 0.0  ;;  %1387 = vmatprep.subr.bf16.mxu1 %v1429_v28 }
  0x1a   : > { %v378_v45 = vmax.f32 %v358_v33, 0.0  ;;  %v340_v46 = vmul.f32 %v1246_v39, %v1531_v5  ;;  %v1250_v47 = vunpack.c.l.bf16 %v1316_v37  ;;  %v379_v49 = vmax.f32 %v359_v35, 0.0 }
  0x1b   : > { %v395_v31 = vpack.c.bf16 %v376_v26, %v375_v25  ;;  %v1570_v50 = vadd.f32 %v1538_v10, %v334_v36  ;;  %v341_v51 = vmul.f32 %v1247_v43, %v1531_v5  ;;  %v1251_v52 = vunpack.c.h.bf16 %v1316_v37 }
  0x1c   : > { %1357 = vmatpush3.bf16.msra.mxu0 %v1429_v28  ;;  %v1574_v53 = vadd.f32 %v1538_v10, %v335_v38  ;;  %v1239_v54 = vunpack.c.h.bf16 %v1313_v34  ;;  %v367_v55 = vadd.f32 %v1538_v10, %v340_v46  ;;  %v342_v56 = vmul.f32 %v1250_v47, %v1531_v5  ;;  %1395 = vmatpush3.bf16.msra.mxu1 %v1429_v28 }
  0x1d   : > { %1362 = vmatprep.mubr.bf16.mxu0 %v395_v31  ;;  %1358 = vmatprep.subr.bf16.mxu0 %v1430_v40  ;;  %v380_v58 = vmax.f32 %v360_v41, 0.0  ;;  %v368_v59 = vadd.f32 %v1538_v10, %v341_v51  ;;  %v343_v60 = vmul.f32 %v1251_v52, %v1531_v5  ;;  %v1254_v61 = vunpack.c.l.bf16 %v1317_v48 }
  0x1e   : > { %v396_v63 = vpack.c.bf16 %v378_v45, %v377_v44  ;;  %1388 = vmatprep.subr.bf16.mxu1 %v1430_v40  ;;  %v336_v0 = vmul.f32 %v1238_v42, %v1531_v5  ;;  %v387_v1 = vmax.f32 %v367_v55, 0.0  ;;  %v369_v2 = vadd.f32 %v1538_v10, %v342_v56 }
  0x1f   : > { %v388_v4 = vmax.f32 %v368_v59, 0.0  ;;  %v370_v6 = vadd.f32 %v1538_v10, %v343_v60  ;;  %v1255_v7 = vunpack.c.h.bf16 %v1317_v48  ;;  %v344_v8 = vmul.f32 %v1254_v61, %v1531_v5 }
  0x20   : > { %1359 = vmatpush3.bf16.msra.mxu0 %v1430_v40  ;;  %v337_v9 = vmul.f32 %v1239_v54, %v1531_v5  ;;  %v389_v11 = vmax.f32 %v369_v2, 0.0  ;;  %v1258_v12 = vunpack.c.l.bf16 %v1318_v62  ;;  %v1259_v13 = vunpack.c.h.bf16 %v1318_v62  ;;  %1396 = vmatpush3.bf16.msra.mxu1 %v1430_v40 }
  0x21   : > { %1360 = vmatprep.subr.bf16.mxu0 %v1431_v57  ;;  %v401_v14 = vpack.c.bf16 %v388_v4, %v387_v1  ;;  %v390_v15 = vmax.f32 %v370_v6, 0.0  ;;  %v345_v16 = vmul.f32 %v1255_v7, %v1531_v5  ;;  %v371_v17 = vadd.f32 %v1538_v10, %v344_v8  ;;  %1389 = vmatprep.subr.bf16.mxu1 %v1431_v57 }
  0x22   : > { %v397_v18 = vpack.c.bf16 %v380_v58, %v379_v49  ;;  %v1242_v19 = vunpack.c.l.bf16 %v1314_v3  ;;  %v346_v20 = vmul.f32 %v1258_v12, %v1531_v5  ;;  %v347_v21 = vmul.f32 %v1259_v13, %v1531_v5 }
  0x23   : > { %v363_v22 = vadd.f32 %v1538_v10, %v336_v0  ;;  %v1243_v23 = vunpack.c.h.bf16 %v1314_v3  ;;  %1374 = vmatprep.mubr.bf16.mxu1 %v401_v14  ;;  %v372_v24 = vadd.f32 %v1538_v10, %v345_v16  ;;  %v391_v25 = vmax.f32 %v371_v17, 0.0 }
  0x24   : > { %1361 = vmatpush3.bf16.msra.mxu0 %v1431_v57  ;;  %v364_v26 = vadd.f32 %v1538_v10, %v337_v9  ;;  %v402_v27 = vpack.c.bf16 %v390_v15, %v389_v11  ;;  %v373_v28 = vadd.f32 %v1538_v10, %v346_v20  ;;  %v374_v29 = vadd.f32 %v1538_v10, %v347_v21 }
  0x25   : > { %1397 = vmatpush3.bf16.msra.mxu1 %v1431_v57  ;;  %v392_v30 = vmax.f32 %v372_v24, 0.0  ;;  %v381_v31 = vmax.f32 %v1570_v50, 0.0  ;;  %v382_v32 = vmax.f32 %v1574_v53, 0.0  ;;  %v338_v33 = vmul.f32 %v1242_v19, %v1531_v5 }
  0x26   : > { %v339_v34 = vmul.f32 %v1243_v23, %v1531_v5  ;;  %v383_v36 = vmax.f32 %v363_v22, 0.0  ;;  %v384_v37 = vmax.f32 %v364_v26, 0.0  ;;  %v393_v38 = vmax.f32 %v373_v28, 0.0 }
  0x27   : > { %1363 = vmatmul.mubr.bf16.vlgmr.msra.gmra.mrb[0].mxu0 %v396_v63  ;;  %v403_v35 = vpack.c.bf16 %v392_v30, %v391_v25  ;;  %v394_v39 = vmax.f32 %v374_v29, 0.0  ;;  %v398_v40 = vpack.c.bf16 %v382_v32, %v381_v31  ;;  %v365_v41 = vadd.f32 %v1538_v10, %v338_v33 }
  0x28   : > { %1366 = vmatprep.mubr.bf16.mxu0 %v397_v18  ;;  %1375 = vmatmul.mubr.bf16.vlgmr.msra.gmra.mrb[0].mxu1 %v402_v27  ;;  %v366_v42 = vadd.f32 %v1538_v10, %v339_v34  ;;  %v399_v43 = vpack.c.bf16 %v384_v37, %v383_v36  ;;  %v683_v47 = vlaneseq  ;;  %v2194_v3 = vmov 0 }
  0x29   : > { %1378 = vmatprep.mubr.bf16.mxu1 %v403_v35  ;;  %v404_v44 = vpack.c.bf16 %v394_v39, %v393_v38  ;;  %v385_v45 = vmax.f32 %v365_v41, 0.0  ;;  %v2196_v4 = vmov 0  ;;  %v2204_v13 = vmov 0 }
  0x2a   : > { %v386_v46 = vmax.f32 %v366_v42, 0.0  ;;  %v1605_v48 = vshrl.u32 %v683_v47, 7  ;;  %v2209_v19 = vmov 0  ;;  %v2211_v20 = vmov 0 }
  0x2b   : > { %v2213_v21 = vmov 0  ;;  %v2224_v26 = vmov 0  ;;  %v2232_v32 = vmov 0  ;;  %v2238_v38 = vmov 0 }
  0x2c   : > { %v400_v5 = vpack.c.bf16 %v386_v46, %v385_v45  ;;  %v686_v49 = vadd.s32 16, %v1605_v48  ;;  %v687_v50 = vadd.s32 24, %v1605_v48  ;;  %v685_v51 = vadd.s32 8, %v1605_v48 }
  0x2d   : > { %v690_v53 = vadd.s32 48, %v1605_v48  ;;  %v725_v54 = vshra.s32 %v1605_v48, 4  ;;  %v691_v56 = vadd.s32 56, %v1605_v48  ;;  %v688_v0 = vadd.s32 32, %v1605_v48 }
  0x2e   : > { %v727_v52 = vshra.s32 %v686_v49, 4  ;;  %v728_v10 = vshra.s32 %v687_v50, 4  ;;  %v726_v55 = vshra.s32 %v685_v51, 4  ;;  %v747_v57 = vand.u32 15, %v686_v49 }
  0x2f   : > { %1367 = vmatmul.mubr.bf16.gmra.mrb[4].mxu0 %v398_v40  ;;  %v748_v58 = vand.u32 15, %v687_v50  ;;  %v731_v63 = vshra.s32 %v690_v53, 4  ;;  %v745_v1 = vand.u32 15, %v1605_v48  ;;  %v746_v2 = vand.u32 15, %v685_v51 }
  0x30   : > { %1370 = vmatprep.mubr.bf16.mxu0 %v399_v43  ;;  %1379 = vmatmul.mubr.bf16.gmra.mrb[4].mxu1 %v404_v44  ;;  %vm1613_vm0 = vcmp.ge.s32.totalorder %v727_v52, 1  ;;  %vm1617_vm1 = vcmp.le.s32.totalorder %v727_v52, 8  ;;  %vm1621_vm2 = vcmp.ge.s32.totalorder %v728_v10, 1  ;;  %vm1625_vm3 = vcmp.le.s32.totalorder %v728_v10, 8 }
  0x31   : > { %vm1631_vm4 = vcmp.ge.s32.totalorder %v725_v54, 1  ;;  %vm1635_vm5 = vcmp.le.s32.totalorder %v725_v54, 8  ;;  %vm1643_vm7 = vcmp.ge.s32.totalorder %v726_v55, 1  ;;  %vm1647_vm8 = vcmp.le.s32.totalorder %v726_v55, 8  ;;  %vm2208_vm12 = vmand %vm1613_vm0, %vm1617_vm1 }
  0x32   : > { %v2195_v3 = vsel %vm1631_vm4, 4294967295, %v2194_v3  ;;  %v2197_v4 = vsel %vm1635_vm5, 4294967295, %v2196_v4  ;;  %v732_v8 = vshra.s32 %v691_v56, 4  ;;  %v689_v9 = vadd.s32 40, %v1605_v48  ;;  %vm806_vm15 = vmand %vm1643_vm7, %vm1647_vm8 }
  0x33   : > { %vm827_vm10 = vcmp.ge.s32.totalorder %v747_v57, 1  ;;  %vm1656_vm11 = vcmp.le.s32.totalorder %v748_v58, 8  ;;  %v751_v12 = vand.u32 15, %v690_v53  ;;  %vm1664_vm13 = vcmp.ge.s32.totalorder %v731_v63, 1  ;;  %vm2215_vm0 = vmand %vm1621_vm2, %vm1625_vm3 }
  0x34   : > { %v2205_v13 = vsel %vm1664_vm13, 4294967295, %v2204_v13  ;;  %vm1668_vm14 = vcmp.le.s32.totalorder %v731_v63, 8  ;;  %v729_v15 = vshra.s32 %v688_v0, 4  ;;  %v694_v16 = vadd.s32 80, %v1605_v48  ;;  %vm1683_vm5 = vmand %vm2208_vm12, %vm827_vm10 }
  0x35   : > { %vm825_vm9 = vcmp.ge.s32.totalorder %v745_v1, 1  ;;  %vm866_vm6 = vcmp.le.s32.totalorder %v746_v2, 8  ;;  %v752_v17 = vand.u32 15, %v691_v56  ;;  %v695_v18 = vadd.s32 88, %v1605_v48  ;;  %vm1702_vm1 = vmand %vm2215_vm0, %vm1656_vm11 }
  0x36   : > { %v2210_v19 = vsel %vm1683_vm5, 4294967295, %v2209_v19  ;;  %vm1687_vm4 = vcmp.ge.s32.totalorder %v732_v8, 1  ;;  %vm1691_vm13 = vcmp.le.s32.totalorder %v732_v8, 8  ;;  %v730_v22 = vshra.s32 %v689_v9, 4  ;;  %vm1719_vm2 = vmand %vm806_vm15, %vm866_vm6 }
  0x37   : > { %1371 = vmatmul.mubr.bf16.gmra.mrb[8].mxu0 %v400_v5  ;;  %v2212_v20 = vsel %vm1687_vm4, 4294967295, %v2211_v20  ;;  %v2214_v21 = vsel %vm1691_vm13, 4294967295, %v2213_v21  ;;  %vm2218_vm7 = vnez %v2205_v13  ;;  %vm831_vm10 = vcmp.ge.s32.totalorder %v751_v12, 1 }
  0x38   : > { %vm811_vm8 = vmand %vm2218_vm7, %vm1668_vm14  ;;  %v749_v24 = vand.u32 15, %v688_v0  ;;  %vm2219_vm12 = vnez %v2195_v3  ;;  %vm2220_vm5 = vnez %v2197_v4  ;;  %v2225_v26 = vsel %vm1719_vm2, 4294967295, %v2224_v26 }
  0x39   : > { %vm2221_vm4 = vmand %vm2219_vm12, %vm2220_vm5  ;;  %vm1723_vm3 = vcmp.ge.s32.totalorder %v729_v15, 1  ;;  %vm1727_vm11 = vcmp.le.s32.totalorder %v729_v15, 8  ;;  %v735_v29 = vshra.s32 %v694_v16, 4  ;;  %vm2230_vm14 = vnez %v2214_v21 }
  0x3a   : > { %vm1715_vm13 = vmand %vm2221_vm4, %vm825_vm9  ;;  %vm2231_vm4 = vnez %v2212_v20  ;;  %vm872_vm9 = vcmp.le.s32.totalorder %v752_v17, 8  ;;  %v736_v30 = vshra.s32 %v695_v18, 4  ;;  %v692_v31 = vadd.s32 64, %v1605_v48 }
  0x3b   : > { %vm812_vm5 = vmand %vm2231_vm4, %vm2230_vm14  ;;  %v750_v33 = vand.u32 15, %v689_v9  ;;  %vm1740_vm15 = vcmp.ge.s32.totalorder %v730_v22, 1  ;;  %vm1744_vm0 = vcmp.le.s32.totalorder %v730_v22, 8  ;;  %v693_v36 = vadd.s32 72, %v1605_v48 }
  0x3c   : > { %vm1736_vm6 = vmand %vm811_vm8, %vm831_vm10  ;;  %vm829_vm8 = vcmp.ge.s32.totalorder %v749_v24, 1  ;;  %v755_v37 = vand.u32 15, %v694_v16  ;;  %v756_v39 = vand.u32 15, %v695_v18  ;;  %vm1757_vm12 = vcmp.ge.s32.totalorder %v735_v29, 1 }
  0x3d   : > { %v2233_v32 = vsel %vm1736_vm6, 4294967295, %v2232_v32  ;;  %vm809_vm7 = vmand %vm1723_vm3, %vm1727_vm11  ;;  %vm1761_vm14 = vcmp.le.s32.totalorder %v735_v29, 8  ;;  %vm1769_vm11 = vcmp.ge.s32.totalorder %v736_v30, 1  ;;  %vm1773_vm4 = vcmp.le.s32.totalorder %v736_v30, 8 }
  0x3e   : > { %vm1753_vm10 = vmand %vm812_vm5, %vm872_vm9  ;;  %v733_v44 = vshra.s32 %v692_v31, 4  ;;  %vm870_vm9 = vcmp.le.s32.totalorder %v750_v33, 8  ;;  %v734_v46 = vshra.s32 %v693_v36, 4  ;;  %v698_v5 = vadd.s32 112, %v1605_v48 }
  0x3f   : > { %v2239_v38 = vsel %vm1753_vm10, 4294967295, %v2238_v38  ;;  %vm1777_vm5 = vmand %vm809_vm7, %vm829_vm8  ;;  %vm835_vm10 = vcmp.ge.s32.totalorder %v755_v37, 1  ;;  %vm1790_vm2 = vcmp.le.s32.totalorder %v756_v39, 8  ;;  %v753_v49 = vand.u32 15, %v692_v31 }
  0x40   : > { %vm815_vm3 = vmand %vm1757_vm12, %vm1761_vm14  ;;  %v1456_v50 = vmov 0.0   ;;  %vm2252_vm7 = vnez %v2210_v19  ;;  %v754_v10 = vand.u32 15, %v693_v36  ;;  %vm1806_vm14 = vcmp.ge.s32.totalorder %v733_v44, 1 }
  0x41   : > { %v907_v51 = vsel %vm2252_vm7, 1.0, %v1456_v50  ;;  %vm2253_vm8 = vmand %vm1740_vm15, %vm1744_vm0  ;;  %vm1810_vm6 = vcmp.le.s32.totalorder %v733_v44, 8  ;;  %v908_v55 = vsel %vm1702_vm1, 1.0, %v1456_v50  ;;  %vm1821_vm15 = vcmp.ge.s32.totalorder %v734_v46, 1 }
  0x42   : > { %vm1802_vm12 = vmand %vm2253_vm8, %vm870_vm9  ;;  %vm1825_vm0 = vcmp.le.s32.totalorder %v734_v46, 8  ;;  %v699_v59 = vadd.s32 120, %v1605_v48  ;;  %v905_v61 = vsel %vm1715_vm13, 1.0, %v1456_v50  ;;  %vm2266_vm1 = vnez %v2225_v26 }
  0x43   : > { %vm1817_vm7 = vmand %vm815_vm3, %vm835_vm10  ;;  %v906_v62 = vsel %vm2266_vm1, 1.0, %v1456_v50  ;;  %vm2267_vm10 = vnez %v2233_v32  ;;  %v739_v1 = vshra.s32 %v698_v5, 4  ;;  %vm2271_vm13 = vnez %v2239_v38 }
  0x44   : > { %v1839_v63 = vsel %vm2267_vm10, 1.0, %v1456_v50  ;;  %vm2268_vm3 = vmand %vm1769_vm11, %vm1773_vm4  ;;  %v1855_v3 = vsel %vm2271_vm13, 1.0, %v1456_v50  ;;  %v1860_v4 = vsel %vm1777_vm5, 1.0, %v1456_v50  ;;  %v1865_v6 = vsel %vm1802_vm12, 1.0, %v1456_v50 }
  0x45   : > { %vm1848_vm9 = vmand %vm2268_vm3, %vm1790_vm2  ;;  %vm1871_vm11 = vcmp.ge.s32.totalorder %v753_v49, 1  ;;  %v1885_v11 = vsel %vm1817_vm7, 1.0, %v1456_v50  ;;  %vm1891_vm5 = vcmp.le.s32.totalorder %v754_v10, 8  ;;  %v759_v14 = vand.u32 15, %v698_v5 }
  0x46   : > { %vm813_vm2 = vmand %vm1806_vm14, %vm1810_vm6  ;;  %v1896_v15 = vadd.s32 96, %v1605_v48  ;;  %v1901_v18 = vsel %vm1848_vm9, 1.0, %v1456_v50  ;;  %v740_v20 = vshra.s32 %v699_v59, 4  ;;  %v760_v21 = vand.u32 15, %v699_v59 }
  0x47   : > { %vm814_vm4 = vmand %vm1821_vm15, %vm1825_vm0  ;;  %vm1916_vm12 = vcmp.ge.s32.totalorder %v739_v1, 1  ;;  %v1921_v27 = vadd.s32 104, %v1605_v48  ;;  %vm1935_vm14 = vcmp.le.s32.totalorder %v739_v1, 8  ;;  %vm1944_vm7 = vcmp.ge.s32.totalorder %v759_v14, 1 }
  0x48   : > { %vm1910_vm8 = vmand %vm813_vm2, %vm1871_vm11  ;;  %v737_v36 = vshra.s32 %v1896_v15, 4  ;;  %vm1954_vm15 = vcmp.ge.s32.totalorder %v740_v20, 1  ;;  %vm1958_vm0 = vcmp.le.s32.totalorder %v740_v20, 8  ;;  %vm1969_vm1 = vcmp.le.s32.totalorder %v760_v21, 8 }
  0x49   : > { %vm1931_vm6 = vmand %vm814_vm4, %vm1891_vm5  ;;  %v1952_v38 = vsel %vm1910_vm8, 1.0, %v1456_v50  ;;  %v738_v47 = vshra.s32 %v1921_v27, 4  ;;  %v757_v49 = vand.u32 15, %v1896_v15  ;;  %v1989_v0 = vadd.s32 144, %v1605_v48 }
  0x4a   : > { %v1967_v44 = vsel %vm1931_vm6, 1.0, %v1456_v50  ;;  %vm1976_vm10 = vcmp.ge.s32.totalorder %v737_v36, 1  ;;  %vm819_vm3 = vmand %vm1916_vm12, %vm1935_vm14  ;;  %vm1984_vm9 = vcmp.le.s32.totalorder %v737_v36, 8  ;;  %v1999_v14 = vadd.s32 152, %v1605_v48 }
  0x4b   : > { %vm820_vm13 = vmand %vm1954_vm15, %vm1958_vm0  ;;  %vm2024_vm4 = vcmp.ge.s32.totalorder %v738_v47, 1  ;;  %vm2028_vm5 = vcmp.le.s32.totalorder %v738_v47, 8  ;;  %vm2032_vm8 = vcmp.ge.s32.totalorder %v757_v49, 1  ;;  %v763_v45 = vand.u32 15, %v1989_v0 }
  0x4c   : > { %vm859_vm2 = vmand %vm819_vm3, %vm1944_vm7  ;;  %v744_v40 = vshra.s32 %v1999_v14, 4 }
  0x4d   : > { %vm2020_vm11 = vmand %vm820_vm13, %vm1969_vm1  ;;  %v2046_v35 = vsel %vm859_vm2, 1.0, %v1456_v50 }
  0x4e   : > { %vm817_vm6 = vmand %vm1976_vm10, %vm1984_vm9 }
  0x4f   : > { %vm2070_vm14 = vmand %vm817_vm6, %vm2032_vm8 }
  0x50   : > { %vm818_vm15 = vmand %vm2024_vm4, %vm2028_vm5  ;;  %vm2128_vm4 = vcmp.ge.s32.totalorder %v744_v40, 1  ;;  %vm2132_vm5 = vcmp.le.s32.totalorder %v744_v40, 8 }
  0xfa   : > { %v1364_v60 = vpop.f32.mrb[0].mxu0 }
  0xfb   : > { %v503_v2 = vpop.f32.mrb[1].mxu0  ;;  %v1376_v8 = vpop.f32.mrb[0].mxu1 }
  0xfc   : > { %v1365_v9 = vpop.f32.mrb[2].mxu0  ;;  %v551_v13 = vpop.f32.mrb[1].mxu1 }
  0xfd   : > { %v583_v16 = vpack.c.bf16 %v1365_v9, %v1364_v60  ;;  %v506_v17 = vpop.f32.mrb[3].mxu0  ;;  %v1377_v19 = vpop.f32.mrb[2].mxu1 }
  0xfe   : > { %v582_v22 = vpack.c.bf16 %v506_v17, %v503_v2  ;;  %v1914_v24 = vpack.c.bf16 %v1377_v19, %v1376_v8  ;;  %v554_v26 = vpop.f32.mrb[3].mxu1 }
  0xff   : > { %1319 = vst [vmem:[%s1880_s27 + $0x8] sm:$0xff] %v583_v16   ;;  %v928_v28 = vunpack.c.l.bf16 %v583_v16  ;;  %v929_v29 = vunpack.c.h.bf16 %v583_v16  ;;  %v1939_v32 = vpack.c.bf16 %v554_v26, %v551_v13 }
 0x100   : > { %1264 = vst [vmem:[%s1880_s27] sm:$0xff] %v582_v22   ;;  %v926_v33 = vunpack.c.l.bf16 %v582_v22  ;;  %v927_v34 = vunpack.c.h.bf16 %v582_v22  ;;  %1325 = vst [vmem:[%s1880_s27 + $0x38] sm:$0xff] %v1914_v24   ;;  %v940_v25 = vunpack.c.l.bf16 %v1914_v24 }
 0x101   : > { %v948_v37 = vmul.f32 %v928_v28, %v907_v51  ;;  %1324 = vst [vmem:[%s1880_s27 + $0x30] sm:$0xff] %v1939_v32   ;;  %v949_v46 = vmul.f32 %v929_v29, %v908_v55  ;;  %v758_v51 = vand.u32 15, %v1921_v27 }
 0x102   : > { %v946_v41 = vmul.f32 %v926_v33, %v905_v61  ;;  %v947_v42 = vmul.f32 %v927_v34, %v906_v62  ;;  %v1368_v43 = vpop.f32.mrb[4].mxu0  ;;  %v917_v61 = vsel %vm2070_vm14, 1.0, %v1456_v50 }
 0x103   : > { %v519_v5 = vpop.f32.mrb[5].mxu0  ;;  %v1380_v52 = vpop.f32.mrb[4].mxu1  ;;  %v993_v59 = vmul.f32 %v948_v37, %v948_v37  ;;  %v994_v12 = vmul.f32 %v949_v46, %v949_v46  ;;  %vm2040_vm12 = vcmp.le.s32.totalorder %v758_v51, 8 }
 0x104   : > { %v966_v10 = vadd.f32 %v947_v42, %v946_v41  ;;  %v991_v53 = vmul.f32 %v946_v41, %v946_v41  ;;  %v992_v54 = vmul.f32 %v947_v42, %v947_v42  ;;  %v1369_v56 = vpop.f32.mrb[6].mxu0  ;;  %v567_v58 = vpop.f32.mrb[5].mxu1  ;;  %vm898_vm10 = vmand %vm818_vm15, %vm2040_vm12  ;;  %vm843_vm15 = vcmp.ge.s32.totalorder %v763_v45, 1 }
 0x105   : > { %v585_v55 = vpack.c.bf16 %v1369_v56, %v1368_v43  ;;  %v522_v60 = vpop.f32.mrb[7].mxu0  ;;  %v1381_v62 = vpop.f32.mrb[6].mxu1 }
 0x106   : > { %v967_v1 = vadd.f32 %v966_v10, %v948_v37  ;;  %v1011_v2 = vadd.f32 %v992_v54, %v991_v53  ;;  %v584_v7 = vpack.c.bf16 %v522_v60, %v519_v5  ;;  %v1995_v8 = vpack.c.bf16 %v1381_v62, %v1380_v52  ;;  %v570_v9 = vpop.f32.mrb[7].mxu1 }
 0x107   : > { %1321 = vst [vmem:[%s1880_s27 + $0x18] sm:$0xff] %v585_v55   ;;  %v932_v13 = vunpack.c.l.bf16 %v585_v55  ;;  %v2001_v15 = vpack.c.bf16 %v570_v9, %v567_v58  ;;  %v933_v21 = vunpack.c.h.bf16 %v585_v55 }
 0x108   : > { %v1012_v16 = vadd.f32 %v1011_v2, %v993_v59  ;;  %1320 = vst [vmem:[%s1880_s27 + $0x10] sm:$0xff] %v584_v7   ;;  %v930_v17 = vunpack.c.l.bf16 %v584_v7  ;;  %v931_v19 = vunpack.c.h.bf16 %v584_v7  ;;  %v968_v20 = vadd.f32 %v967_v1, %v949_v46  ;;  %1327 = vst [vmem:[%s1880_s27 + $0x48] sm:$0xff] %v1995_v8  }
 0x109   : > { %1326 = vst [vmem:[%s1880_s27 + $0x40] sm:$0xff] %v2001_v15   ;;  %v952_v33 = vmul.f32 %v932_v13, %v1839_v63  ;;  %v2057_v63 = vsel %vm2020_vm11, 1.0, %v1456_v50  ;;  %v953_v41 = vmul.f32 %v933_v21, %v1855_v3  ;;  %v701_v46 = vadd.s32 136, %v1605_v48 }
 0x10a   : > { %v950_v27 = vmul.f32 %v930_v17, %v1860_v4  ;;  %v951_v28 = vmul.f32 %v931_v19, %v1865_v6  ;;  %v1013_v29 = vadd.f32 %v1012_v16, %v994_v12  ;;  %v1372_v30 = vpop.f32.mrb[8].mxu0  ;;  %v743_v4 = vshra.s32 %v1989_v0, 4 }
 0x10b   : > { %v535_v34 = vpop.f32.mrb[9].mxu0  ;;  %v700_v6 = vadd.s32 128, %v1605_v48  ;;  %v997_v52 = vmul.f32 %v952_v33, %v952_v33  ;;  %v764_v48 = vand.u32 15, %v1999_v14  ;;  %v998_v55 = vmul.f32 %v953_v41, %v953_v41 }
 0x10c   : > { %v969_v36 = vadd.f32 %v968_v20, %v950_v27  ;;  %v995_v37 = vmul.f32 %v950_v27, %v950_v27  ;;  %v1373_v39 = vpop.f32.mrb[10].mxu0  ;;  %v996_v47 = vmul.f32 %v951_v28, %v951_v28  ;;  %vm2077_vm7 = vcmp.ge.s32.totalorder %v743_v4, 1 }
 0x10d   : > { %v587_v42 = vpack.c.bf16 %v1373_v39, %v1372_v30  ;;  %v538_v43 = vpop.f32.mrb[11].mxu0  ;;  %v741_v53 = vshra.s32 %v700_v6, 4  ;;  %v742_v62 = vshra.s32 %v701_v46, 4  ;;  %v938_v12 = vunpack.c.l.bf16 %v1939_v32 }
 0x10e   : > { %v970_v5 = vadd.f32 %v969_v36, %v951_v28  ;;  %v1014_v49 = vadd.f32 %v1013_v29, %v995_v37  ;;  %v586_v51 = vpack.c.bf16 %v538_v43, %v535_v34  ;;  %v761_v13 = vand.u32 15, %v700_v6 }
 0x10f   : > { %1323 = vst [vmem:[%s1880_s27 + $0x28] sm:$0xff] %v587_v42   ;;  %v936_v10 = vunpack.c.l.bf16 %v587_v42  ;;  %v937_v60 = vunpack.c.h.bf16 %v587_v42  ;;  %vm2091_vm0 = vcmp.ge.s32.totalorder %v741_v53, 1  ;;  %vm2095_vm1 = vcmp.le.s32.totalorder %v741_v53, 8 }
 0x110   : > { %v971_v54 = vadd.f32 %v970_v5, %v952_v33  ;;  %v1015_v56 = vadd.f32 %v1014_v49, %v996_v47  ;;  %1322 = vst [vmem:[%s1880_s27 + $0x20] sm:$0xff] %v586_v51   ;;  %v934_v58 = vunpack.c.l.bf16 %v586_v51  ;;  %v935_v59 = vunpack.c.h.bf16 %v586_v51  ;;  %vm821_vm2 = vmand %vm2091_vm0, %vm2095_vm1 }
 0x111   : > { %v956_v17 = vmul.f32 %v936_v10, %v1885_v11  ;;  %vm2108_vm3 = vcmp.ge.s32.totalorder %v742_v62, 1  ;;  %vm2112_vm9 = vcmp.le.s32.totalorder %v742_v62, 8  ;;  %v957_v26 = vmul.f32 %v937_v60, %v1901_v18  ;;  %vm824_vm0 = vmand %vm2128_vm4, %vm2132_vm5 }
 0x112   : > { %v1016_v1 = vadd.f32 %v1015_v56, %v997_v52  ;;  %v954_v2 = vmul.f32 %v934_v58, %v1952_v38  ;;  %v955_v7 = vmul.f32 %v935_v59, %v1967_v44  ;;  %v972_v9 = vadd.f32 %v971_v54, %v953_v41  ;;  %vm822_vm8 = vmand %vm2108_vm3, %vm2112_vm9 }
 0x113   : > { %v939_v38 = vunpack.c.h.bf16 %v1939_v32  ;;  %v762_v44 = vand.u32 15, %v701_v46  ;;  %v918_v29 = vsel %vm898_vm10, 1.0, %v1456_v50  ;;  %vm2119_vm13 = vcmp.le.s32.totalorder %v743_v4, 8 }
 0x114   : > { %v973_v19 = vadd.f32 %v972_v9, %v954_v2  ;;  %v999_v20 = vmul.f32 %v954_v2, %v954_v2  ;;  %v1017_v21 = vadd.f32 %v1016_v1, %v998_v55  ;;  %v1000_v28 = vmul.f32 %v955_v7, %v955_v7  ;;  %vm823_vm14 = vmand %vm2077_vm7, %vm2119_vm13 }
 0x115   : > { %vm841_vm11 = vcmp.ge.s32.totalorder %v761_v13, 1  ;;  %v1001_v30 = vmul.f32 %v956_v17, %v956_v17  ;;  %v958_v33 = vmul.f32 %v938_v12, %v917_v61  ;;  %v941_v34 = vunpack.c.h.bf16 %v1914_v24  ;;  %vm863_vm7 = vmand %vm823_vm14, %vm843_vm15 }
 0x116   : > { %v974_v27 = vadd.f32 %v973_v19, %v955_v7  ;;  %v1018_v23 = vadd.f32 %v1017_v21, %v999_v20  ;;  %vm882_vm12 = vcmp.le.s32.totalorder %v762_v44, 8  ;;  %v1002_v36 = vmul.f32 %v957_v26, %v957_v26  ;;  %vm861_vm6 = vmand %vm821_vm2, %vm841_vm11 }
 0x117   : > { %v959_v39 = vmul.f32 %v939_v38, %v918_v29  ;;  %v960_v24 = vmul.f32 %v940_v25, %v2046_v35  ;;  %v1003_v42 = vmul.f32 %v958_v33, %v958_v33  ;;  %vm902_vm10 = vmand %vm822_vm8, %vm882_vm12  ;;  %v942_v46 = vunpack.c.l.bf16 %v2001_v15 }
 0x118   : > { %v975_v31 = vadd.f32 %v974_v27, %v956_v17  ;;  %v1019_v18 = vadd.f32 %v1018_v23, %v1000_v28  ;;  %v961_v5 = vmul.f32 %v941_v34, %v2057_v63  ;;  %vm884_vm1 = vcmp.le.s32.totalorder %v764_v48, 8 }
 0x119   : > { %v921_v35 = vsel %vm861_vm6, 1.0, %v1456_v50  ;;  %v1004_v49 = vmul.f32 %v959_v39, %v959_v39  ;;  %v943_v45 = vunpack.c.h.bf16 %v2001_v15  ;;  %v1005_v51 = vmul.f32 %v960_v24, %v960_v24  ;;  %vm904_vm3 = vmand %vm824_vm0, %vm884_vm1 }
 0x11a   : > { %v1020_v37 = vadd.f32 %v1019_v18, %v1001_v30  ;;  %v976_v41 = vadd.f32 %v975_v31, %v957_v26  ;;  %v922_v3 = vsel %vm902_vm10, 1.0, %v1456_v50  ;;  %v944_v63 = vunpack.c.l.bf16 %v1995_v8 }
 0x11b   : > { %v962_v53 = vmul.f32 %v942_v46, %v921_v35  ;;  %v1006_v54 = vmul.f32 %v961_v5, %v961_v5  ;;  %v923_v48 = vsel %vm863_vm7, 1.0, %v1456_v50  ;;  %v945_v58 = vunpack.c.h.bf16 %v1995_v8 }
 0x11c   : > { %v977_v40 = vadd.f32 %v976_v41, %v958_v33  ;;  %v1021_v43 = vadd.f32 %v1020_v37, %v1002_v36  ;;  %v963_v59 = vmul.f32 %v943_v45, %v922_v3  ;;  %v924_v55 = vsel %vm904_vm3, 1.0, %v1456_v50 }
 0x11d   : > { %v964_v15 = vmul.f32 %v944_v63, %v923_v48  ;;  %v1007_v61 = vmul.f32 %v962_v53, %v962_v53  ;;  %v965_v1 = vmul.f32 %v945_v58, %v924_v55  ;;  %vm1036_vm9 = vcmask 1040384  }
 0x11e   : > { %v978_v47 = vadd.f32 %v977_v40, %v959_v39  ;;  %v1022_v0 = vadd.f32 %v1021_v43, %v1003_v42  ;;  %v1008_v7 = vmul.f32 %v963_v59, %v963_v59  ;;  %vm1038_vm13 = vcmask 1041408  }
 0x11f   : > { %v1009_v12 = vmul.f32 %v964_v15, %v964_v15  ;;  %v1010_v16 = vmul.f32 %v965_v1, %v965_v1 }
 0x120   : > { %v979_v52 = vadd.f32 %v978_v47, %v960_v24  ;;  %v1023_v10 = vadd.f32 %v1022_v0, %v1004_v49 }
 0x122   : > { %v1024_v56 = vadd.f32 %v1023_v10, %v1005_v51  ;;  %v980_v57 = vadd.f32 %v979_v52, %v961_v5 }
 0x124   : > { %v981_v60 = vadd.f32 %v980_v57, %v962_v53  ;;  %v1025_v62 = vadd.f32 %v1024_v56, %v1006_v54 }
 0x126   : > { %v982_v2 = vadd.f32 %v981_v60, %v963_v59  ;;  %v1026_v9 = vadd.f32 %v1025_v62, %v1007_v61 }
 0x128   : > { %v983_v13 = vadd.f32 %v982_v2, %v964_v15  ;;  %v1027_v14 = vadd.f32 %v1026_v9, %v1008_v7 }
 0x12a   : > { %v984_v17 = vadd.f32 %v983_v13, %v965_v1  ;;  %v1028_v19 = vadd.f32 %v1027_v14, %v1009_v12 }
 0x12c   : > { %v985_v8 = vrot.slane %v984_v17, 4  ;;  %v1029_v20 = vadd.f32 %v1028_v19, %v1010_v16 }
 0x12e   : > { %v986_v21 = vadd.f32 %v985_v8, %v984_v17  ;;  %v1030_v38 = vrot.slane %v1029_v20, 4 }
 0x130   : > { %v987_v50 = vrot.slane %v986_v21, 2  ;;  %v1031_v44 = vadd.f32 %v1030_v38, %v1029_v20 }
 0x132   : > { %v988_v22 = vadd.f32 %v987_v50, %v986_v21  ;;  %v1032_v11 = vrot.slane %v1031_v44, 2 }
 0x134   : > { %v989_v26 = vrot.slane %v988_v22, 1  ;;  %v1033_v27 = vadd.f32 %v1032_v11, %v1031_v44 }
 0x136   : > { %v1034_v28 = vrot.slane %v1033_v27, 1  ;;  %v990_v23 = vadd.f32 %v989_v26, %v988_v22 }
 0x138   : > { %v1035_v25 = vadd.f32 %v1034_v28, %v1033_v27 }
 0x13a   : > { %v1037_v29 = vsel %vm1036_vm9, %v990_v23, %v1035_v25 }
 0x13b   : > { %v1039_v32 = vsel %vm1038_vm13, %v1037_v29, 0.0 }
 0x13c   : > { %1041 = vst [vmem:[%s274_s6] sm:$0xff] %v1039_v32 }
 0x13d PF: > { %s16_s20 = sadd.s32 1, %s1454_s20   ;;  %s2324_s18 = smov %s1450_s19 }
 0x13e   : > { %p13_p5 = scmp.ge.s32.totalorder %s16_s20, 4   ;;  %s2325_s19 = smov %s2327_s21 }
 0x140   :  { %15 = sbr.rel (!%p13_p5) target bundleno = 2 (0x2), region = 82 }

// kernel: bottleneck_stage_forward.13
= control target key start
LH: loop header
LB: loop body
LE: loop exit
PB: predicated region body
PF: predicated region fallthrough
CT: control target
= control target key end

     0   :  { %s935_s15 = smov 0   ;;  %s937_s16 = smov 0   ;;  %s1062_s0 = inlined_call_operand.vmem [shape: bf16[2,160,128], index: 0, kind: input, shape index: {}]   ;;  %s1063_s1 = inlined_call_operand.vmem [shape: bf16[2,160,128], index: 1, kind: input, shape index: {}]   ;;  %s1064_s2 = inlined_call_operand.vmem [shape: f32[1,128], index: 2, kind: input, shape index: {}]   ;;  %s1065_s3 = inlined_call_operand.vmem [shape: f32[1,128], index: 3, kind: input, shape index: {}]   ;;  %s1066_s4 = inlined_call_operand.vmem [shape: bf16[2,160,128], index: 4, kind: output, shape index: {}]  }
   0x1   :  { %s939_s17 = smov 0  }
   0x2 LB: > { %s26_s18 = sadd.s32 1, %s904_s16  ;;  %p656_p0 = scmp.ge.s32.totalorder %s908_s17, 1  ;;  %s908_s17 = sphi %s939_s17, %s14_s17   ;;  %s904_s16 = sphi %s937_s16, %s1068_s16   ;;  %s900_s15 = sphi %s935_s15, %s1067_s15  }
   0x3   : > { %p28_p1 = scmp.ge.s32.totalorder %s26_s18, 2  ;;  %p200_p2 = scmp.lt.s32.totalorder %s908_s17, 3 }
   0x5   : > { %s1070_s18 = smov (%p28_p1, %s26_s18), 0  ;;  %p201_p3 = pnand %p656_p0, %p200_p2 }
   0x6   : > { %p244_p4 = scmp.lt.s32.totalorder (!%p201_p3), %s900_s15, 1  ;;  %v970_v0 = vld [vmem:[%s1064_s2] ss:$0 sm:$0xff] (!%p201_p3) }
   0x7   : > { %204 = sbr.rel (%p201_p3) target bundleno = 59 (0x3b), region = 36  ;;  %v981_v11 = vld [vmem:[%s1065_s3] ss:$0 sm:$0xff] (!%p201_p3) }
   0xe   : > { %s1072_s15 = smov (!%p244_p4, %s900_s15), 1 }
   0xf   : > { %s953_s19 = smul.u32 80, %s1072_s15 }
  0x11   : > { %s959_s22 = scalar_lea.vmem %s1062_s0, %s953_s19  ;;  %s965_s25 = scalar_lea.vmem %s1063_s1, %s953_s19 }
  0x12   : > { %v705_v1 = vld [vmem:[%s959_s22] sm:$0xff]   ;;  %v834_v3 = vld [vmem:[%s959_s22 + $0x8] sm:$0xff]   ;;  %v835_v9 = vld [vmem:[%s959_s22 + $0x10] sm:$0xff]   ;;  %s1004_s6 = scalar_lea.vmem %s1066_s4, %s953_s19 }
  0x13   : > { %v745_v2 = vld [vmem:[%s965_s25] sm:$0xff]   ;;  %v706_v4 = vunpack.c.l.bf16 %v705_v1  ;;  %v707_v5 = vunpack.c.h.bf16 %v705_v1  ;;  %v843_v8 = vld [vmem:[%s965_s25 + $0x8] sm:$0xff]   ;;  %v844_v10 = vld [vmem:[%s965_s25 + $0x10] sm:$0xff]   ;;  %v710_v12 = vunpack.c.l.bf16 %v834_v3  ;;  %v711_v13 = vunpack.c.h.bf16 %v834_v3 }
  0x14   : > { %v746_v6 = vunpack.c.l.bf16 %v745_v2  ;;  %v747_v7 = vunpack.c.h.bf16 %v745_v2  ;;  %v750_v14 = vunpack.c.l.bf16 %v843_v8  ;;  %v751_v15 = vunpack.c.h.bf16 %v843_v8  ;;  %v836_v20 = vld [vmem:[%s959_s22 + $0x18] sm:$0xff]   ;;  %v837_v46 = vld [vmem:[%s959_s22 + $0x20] sm:$0xff]   ;;  %v838_v56 = vld [vmem:[%s959_s22 + $0x28] sm:$0xff]  }
  0x15   : > { %v320_v16 = vmul.f32 %v706_v4, %v970_v0  ;;  %v321_v17 = vmul.f32 %v707_v5, %v970_v0  ;;  %v714_v18 = vunpack.c.l.bf16 %v835_v9  ;;  %v715_v19 = vunpack.c.h.bf16 %v835_v9  ;;  %v845_v41 = vld [vmem:[%s965_s25 + $0x18] sm:$0xff]   ;;  %v846_v51 = vld [vmem:[%s965_s25 + $0x20] sm:$0xff]   ;;  %v847_v61 = vld [vmem:[%s965_s25 + $0x28] sm:$0xff]  }
  0x16   : > { %v322_v21 = vmul.f32 %v710_v12, %v970_v0  ;;  %v323_v22 = vmul.f32 %v711_v13, %v970_v0  ;;  %v754_v23 = vunpack.c.l.bf16 %v844_v10  ;;  %v755_v24 = vunpack.c.h.bf16 %v844_v10  ;;  %v848_v8 = vld [vmem:[%s965_s25 + $0x30] sm:$0xff]  }
  0x17   : > { %v347_v25 = vadd.f32 %v981_v11, %v320_v16  ;;  %v348_v26 = vadd.f32 %v981_v11, %v321_v17  ;;  %v324_v27 = vmul.f32 %v714_v18, %v970_v0  ;;  %v325_v28 = vmul.f32 %v715_v19, %v970_v0 }
  0x18   : > { %v349_v29 = vadd.f32 %v981_v11, %v322_v21  ;;  %v350_v30 = vadd.f32 %v981_v11, %v323_v22  ;;  %v718_v31 = vunpack.c.l.bf16 %v836_v20  ;;  %v719_v32 = vunpack.c.h.bf16 %v836_v20  ;;  %v840_v22 = vld [vmem:[%s959_s22 + $0x38] sm:$0xff]  }
  0x19   : > { %v407_v33 = vadd.f32 %v746_v6, %v347_v25  ;;  %v408_v34 = vadd.f32 %v747_v7, %v348_v26  ;;  %v351_v35 = vadd.f32 %v981_v11, %v324_v27  ;;  %v352_v36 = vadd.f32 %v981_v11, %v325_v28  ;;  %v839_v7 = vld [vmem:[%s959_s22 + $0x30] sm:$0xff]  }
  0x1a   : > { %v409_v37 = vadd.f32 %v750_v14, %v349_v29  ;;  %v410_v38 = vadd.f32 %v751_v15, %v350_v30  ;;  %v326_v39 = vmul.f32 %v718_v31, %v970_v0  ;;  %v327_v40 = vmul.f32 %v719_v32, %v970_v0  ;;  %v849_v31 = vld [vmem:[%s965_s25 + $0x38] sm:$0xff]  }
  0x1b   : > { %v427_v42 = vmax.f32 %v407_v33, 0.0  ;;  %v428_v43 = vmax.f32 %v408_v34, 0.0  ;;  %v411_v44 = vadd.f32 %v754_v23, %v351_v35  ;;  %v412_v45 = vadd.f32 %v755_v24, %v352_v36 }
  0x1c   : > { %v429_v47 = vmax.f32 %v409_v37, 0.0  ;;  %v430_v48 = vmax.f32 %v410_v38, 0.0  ;;  %v353_v49 = vadd.f32 %v981_v11, %v326_v39  ;;  %v354_v50 = vadd.f32 %v981_v11, %v327_v40  ;;  %v841_v40 = vld [vmem:[%s959_s22 + $0x40] sm:$0xff]  }
  0x1d   : > { %v787_v52 = vpack.c.bf16 %v428_v43, %v427_v42  ;;  %v431_v53 = vmax.f32 %v411_v44, 0.0  ;;  %v432_v54 = vmax.f32 %v412_v45, 0.0  ;;  %v758_v55 = vunpack.c.l.bf16 %v845_v41 }
  0x1e   : > { %v792_v57 = vpack.c.bf16 %v430_v48, %v429_v47  ;;  %v759_v58 = vunpack.c.h.bf16 %v845_v41  ;;  %v722_v59 = vunpack.c.l.bf16 %v837_v46  ;;  %v723_v60 = vunpack.c.h.bf16 %v837_v46 }
  0x1f   : > { %788 = vst [vmem:[%s1004_s6] sm:$0xff] %v787_v52   ;;  %v797_v62 = vpack.c.bf16 %v432_v54, %v431_v53  ;;  %v413_v63 = vadd.f32 %v758_v55, %v353_v49  ;;  %v762_v1 = vunpack.c.l.bf16 %v846_v51  ;;  %v763_v2 = vunpack.c.h.bf16 %v846_v51  ;;  %v850_v49 = vld [vmem:[%s965_s25 + $0x40] sm:$0xff]   ;;  %v842_v54 = vld [vmem:[%s959_s22 + $0x48] sm:$0xff]  }
  0x20   : > { %852 = vst [vmem:[%s1004_s6 + $0x8] sm:$0xff] %v792_v57   ;;  %v414_v3 = vadd.f32 %v759_v58, %v354_v50  ;;  %v328_v4 = vmul.f32 %v722_v59, %v970_v0  ;;  %v329_v5 = vmul.f32 %v723_v60, %v970_v0  ;;  %v726_v6 = vunpack.c.l.bf16 %v838_v56 }
  0x21   : > { %853 = vst [vmem:[%s1004_s6 + $0x10] sm:$0xff] %v797_v62   ;;  %v433_v9 = vmax.f32 %v413_v63, 0.0  ;;  %v727_v10 = vunpack.c.h.bf16 %v838_v56  ;;  %v766_v12 = vunpack.c.l.bf16 %v847_v61  ;;  %v767_v13 = vunpack.c.h.bf16 %v847_v61  ;;  %v851_v63 = vld [vmem:[%s965_s25 + $0x48] sm:$0xff]  }
  0x22   : > { %v434_v14 = vmax.f32 %v414_v3, 0.0  ;;  %v355_v15 = vadd.f32 %v981_v11, %v328_v4  ;;  %v356_v16 = vadd.f32 %v981_v11, %v329_v5  ;;  %v330_v17 = vmul.f32 %v726_v6, %v970_v0 }
  0x23   : > { %v331_v18 = vmul.f32 %v727_v10, %v970_v0  ;;  %v730_v19 = vunpack.c.l.bf16 %v839_v7  ;;  %v731_v20 = vunpack.c.h.bf16 %v839_v7  ;;  %v770_v21 = vunpack.c.l.bf16 %v848_v8 }
  0x24   : > { %v802_v23 = vpack.c.bf16 %v434_v14, %v433_v9  ;;  %v415_v24 = vadd.f32 %v762_v1, %v355_v15  ;;  %v416_v25 = vadd.f32 %v763_v2, %v356_v16  ;;  %v357_v26 = vadd.f32 %v981_v11, %v330_v17 }
  0x25   : > { %v358_v27 = vadd.f32 %v981_v11, %v331_v18  ;;  %v332_v28 = vmul.f32 %v730_v19, %v970_v0  ;;  %v333_v29 = vmul.f32 %v731_v20, %v970_v0  ;;  %v771_v30 = vunpack.c.h.bf16 %v848_v8 }
  0x26   : > { %854 = vst [vmem:[%s1004_s6 + $0x18] sm:$0xff] %v802_v23   ;;  %v435_v32 = vmax.f32 %v415_v24, 0.0  ;;  %v436_v33 = vmax.f32 %v416_v25, 0.0  ;;  %v417_v34 = vadd.f32 %v766_v12, %v357_v26  ;;  %v734_v35 = vunpack.c.l.bf16 %v840_v22 }
  0x27   : > { %v418_v36 = vadd.f32 %v767_v13, %v358_v27  ;;  %v359_v37 = vadd.f32 %v981_v11, %v332_v28  ;;  %v360_v38 = vadd.f32 %v981_v11, %v333_v29  ;;  %v735_v39 = vunpack.c.h.bf16 %v840_v22 }
  0x28   : > { %v807_v41 = vpack.c.bf16 %v436_v33, %v435_v32  ;;  %v437_v42 = vmax.f32 %v417_v34, 0.0  ;;  %v334_v43 = vmul.f32 %v734_v35, %v970_v0  ;;  %v774_v44 = vunpack.c.l.bf16 %v849_v31 }
  0x29   : > { %v438_v45 = vmax.f32 %v418_v36, 0.0  ;;  %v419_v46 = vadd.f32 %v770_v21, %v359_v37  ;;  %v420_v47 = vadd.f32 %v771_v30, %v360_v38  ;;  %v335_v48 = vmul.f32 %v735_v39, %v970_v0 }
  0x2a   : > { %855 = vst [vmem:[%s1004_s6 + $0x20] sm:$0xff] %v807_v41   ;;  %v361_v50 = vadd.f32 %v981_v11, %v334_v43  ;;  %v775_v51 = vunpack.c.h.bf16 %v849_v31  ;;  %v738_v52 = vunpack.c.l.bf16 %v841_v40  ;;  %v739_v53 = vunpack.c.h.bf16 %v841_v40 }
  0x2b   : > { %v812_v55 = vpack.c.bf16 %v438_v45, %v437_v42  ;;  %v439_v56 = vmax.f32 %v419_v46, 0.0  ;;  %v440_v57 = vmax.f32 %v420_v47, 0.0  ;;  %v362_v58 = vadd.f32 %v981_v11, %v335_v48 }
  0x2c   : > { %v421_v59 = vadd.f32 %v774_v44, %v361_v50  ;;  %v336_v60 = vmul.f32 %v738_v52, %v970_v0  ;;  %v337_v61 = vmul.f32 %v739_v53, %v970_v0  ;;  %v778_v62 = vunpack.c.l.bf16 %v850_v49 }
  0x2d   : > { %856 = vst [vmem:[%s1004_s6 + $0x28] sm:$0xff] %v812_v55   ;;  %v817_v1 = vpack.c.bf16 %v440_v57, %v439_v56  ;;  %v422_v2 = vadd.f32 %v775_v51, %v362_v58  ;;  %v779_v3 = vunpack.c.h.bf16 %v850_v49  ;;  %v742_v4 = vunpack.c.l.bf16 %v842_v54 }
  0x2e   : > { %v441_v5 = vmax.f32 %v421_v59, 0.0  ;;  %v363_v6 = vadd.f32 %v981_v11, %v336_v60  ;;  %v364_v7 = vadd.f32 %v981_v11, %v337_v61  ;;  %v743_v8 = vunpack.c.h.bf16 %v842_v54 }
  0x2f   : > { %857 = vst [vmem:[%s1004_s6 + $0x30] sm:$0xff] %v817_v1   ;;  %v442_v9 = vmax.f32 %v422_v2, 0.0  ;;  %v338_v10 = vmul.f32 %v742_v4, %v970_v0  ;;  %v782_v12 = vunpack.c.l.bf16 %v851_v63  ;;  %v783_v16 = vunpack.c.h.bf16 %v851_v63 }
  0x30   : > { %v423_v13 = vadd.f32 %v778_v62, %v363_v6  ;;  %v424_v14 = vadd.f32 %v779_v3, %v364_v7  ;;  %v339_v15 = vmul.f32 %v743_v8, %v970_v0 }
  0x31   : > { %v822_v17 = vpack.c.bf16 %v442_v9, %v441_v5  ;;  %v365_v18 = vadd.f32 %v981_v11, %v338_v10 }
  0x32   : > { %v443_v19 = vmax.f32 %v423_v13, 0.0  ;;  %v444_v20 = vmax.f32 %v424_v14, 0.0  ;;  %v366_v21 = vadd.f32 %v981_v11, %v339_v15 }
  0x33   : > { %858 = vst [vmem:[%s1004_s6 + $0x38] sm:$0xff] %v822_v17   ;;  %v425_v22 = vadd.f32 %v782_v12, %v365_v18 }
  0x34   : > { %v827_v23 = vpack.c.bf16 %v444_v20, %v443_v19  ;;  %v426_v24 = vadd.f32 %v783_v16, %v366_v21 }
  0x35   : > { %v445_v25 = vmax.f32 %v425_v22, 0.0 }
  0x36   : > { %859 = vst [vmem:[%s1004_s6 + $0x40] sm:$0xff] %v827_v23   ;;  %v446_v26 = vmax.f32 %v426_v24, 0.0 }
  0x38   : > { %v832_v27 = vpack.c.bf16 %v446_v26, %v445_v25 }
  0x3a   : > { %860 = vst [vmem:[%s1004_s6 + $0x48] sm:$0xff] %v832_v27  }
  0x3b PF: > { %s14_s17 = sadd.s32 1, %s908_s17   ;;  %s1067_s15 = smov %s904_s16 }
  0x3c   : > { %p11_p5 = scmp.ge.s32.totalorder %s14_s17, 4   ;;  %s1068_s16 = smov %s1070_s18 }
  0x3e   :  { %13 = sbr.rel (!%p11_p5) target bundleno = 2 (0x2), region = 69 }

// kernel: bottleneck_stage_forward.10
= control target key start
LH: loop header
LB: loop body
LE: loop exit
PB: predicated region body
PF: predicated region fallthrough
CT: control target
= control target key end

     0   :  { %s1978_s24 = smov 0   ;;  %s1980_s25 = smov 0   ;;  %s2701_s0 = inlined_call_operand.vmem [shape: bf16[2,160,128], index: 0, kind: input, shape index: {}]   ;;  %s2702_s1 = inlined_call_operand.vmem [shape: bf16[2,160,128], index: 1, kind: input, shape index: {}]   ;;  %s2703_s2 = inlined_call_operand.vmem [shape: f32[1,128], index: 2, kind: input, shape index: {}]   ;;  %s2704_s3 = inlined_call_operand.vmem [shape: f32[1,128], index: 3, kind: input, shape index: {}]   ;;  %s2705_s4 = inlined_call_operand.vmem [shape: bf16[128,128], index: 4, kind: input, shape index: {}]   ;;  %s2706_s5 = inlined_call_operand.vmem [shape: bf16[2,160,128], index: 5, kind: output, shape index: {0}]   ;;  %s2707_s6 = inlined_call_operand.vmem [shape: bf16[2,160,128], index: 6, kind: output, shape index: {1}]   ;;  %s2708_s7 = inlined_call_operand.vmem [shape: f32[2,8,128], index: 7, kind: output, shape index: {2}]  }
   0x1   :  { %s1982_s26 = smov 0  }
   0x2 LB: > { %s30_s27 = sadd.s32 1, %s1931_s25  ;;  %p1495_p0 = scmp.ge.s32.totalorder %s1935_s26, 1  ;;  %s1935_s26 = sphi %s1982_s26, %s18_s26   ;;  %s1931_s25 = sphi %s1980_s25, %s2852_s25   ;;  %s1927_s24 = sphi %s1978_s24, %s2851_s24  }
   0x3   : > { %p32_p1 = scmp.ge.s32.totalorder %s30_s27, 2  ;;  %p282_p2 = scmp.lt.s32.totalorder %s1935_s26, 3 }
   0x5   : > { %s2854_s27 = smov (%p32_p1, %s30_s27), 0  ;;  %p283_p3 = pnand %p1495_p0, %p282_p2 }
   0x6   : > { %v1905_v0 = vld [vmem:[%s2705_s4] sm:$0xff] (!%p283_p3)   ;;  %p345_p4 = scmp.lt.s32.totalorder (!%p283_p3), %s1927_s24, 1  ;;  %v1906_v1 = vld [vmem:[%s2705_s4 + $0x8] sm:$0xff] (!%p283_p3)   ;;  %v1907_v2 = vld [vmem:[%s2705_s4 + $0x10] sm:$0xff] (!%p283_p3)  }
   0x7   : > { %286 = sbr.rel (%p283_p3) target bundleno = 317 (0x13d), region = 40  ;;  %1827 = vmatprep.subr.bf16.mxu0 (!%p283_p3), %v1905_v0  ;;  %1863 = vmatprep.subr.bf16.mxu1 (!%p283_p3), %v1905_v0  ;;  %v1908_v3 = vld [vmem:[%s2705_s4 + $0x18] sm:$0xff] (!%p283_p3)   ;;  %v2029_v5 = vld [vmem:[%s2703_s2] ss:$0 sm:$0xff] (!%p283_p3)  ;;  %v1910_v41 = vld [vmem:[%s2705_s4 + $0x28] sm:$0xff] (!%p283_p3)  }
   0x8   : > { %1828 = vmatpush3.bf16.msra.mxu0 (!%p283_p3), %v1905_v0  ;;  %1871 = vmatpush3.bf16.msra.mxu1 (!%p283_p3), %v1905_v0  ;;  %v2037_v11 = vld [vmem:[%s2704_s3] ss:$0 sm:$0xff] (!%p283_p3)  ;;  %v1911_v61 = vld [vmem:[%s2705_s4 + $0x30] sm:$0xff] (!%p283_p3)  }
   0x9   : > { %1829 = vmatprep.subr.bf16.mxu0 (!%p283_p3), %v1906_v1  ;;  %1864 = vmatprep.subr.bf16.mxu1 (!%p283_p3), %v1906_v1  ;;  %v1909_v22 = vld [vmem:[%s2705_s4 + $0x20] sm:$0xff] (!%p283_p3)  }
   0xc   : > { %1830 = vmatpush3.bf16.msra.mxu0 (!%p283_p3), %v1906_v1  ;;  %1872 = vmatpush3.bf16.msra.mxu1 (!%p283_p3), %v1906_v1 }
   0xd   : > { %1831 = vmatprep.subr.bf16.mxu0 (!%p283_p3), %v1907_v2  ;;  %1865 = vmatprep.subr.bf16.mxu1 (!%p283_p3), %v1907_v2 }
   0xe   : > { %s2856_s24 = smov (!%p345_p4, %s1927_s24), 1 }
   0xf   : > { %s2008_s11 = smul.u32 80, %s2856_s24 }
  0x10   : > { %1832 = vmatpush3.bf16.msra.mxu0 %v1907_v2  ;;  %1873 = vmatpush3.bf16.msra.mxu1 %v1907_v2 }
  0x11   : > { %s2014_s14 = scalar_lea.vmem %s2701_s0, %s2008_s11  ;;  %s2020_s17 = scalar_lea.vmem %s2702_s1, %s2008_s11  ;;  %1833 = vmatprep.subr.bf16.mxu0 %v1908_v3  ;;  %1866 = vmatprep.subr.bf16.mxu1 %v1908_v3 }
  0x12   : > { %v1594_v4 = vld [vmem:[%s2014_s14] sm:$0xff]   ;;  %v1773_v9 = vld [vmem:[%s2014_s14 + $0x8] sm:$0xff]   ;;  %v1774_v16 = vld [vmem:[%s2014_s14 + $0x10] sm:$0xff]   ;;  %s2067_s12 = scalar_lea.vmem %s2707_s6, %s2008_s11  ;;  %s2400_s19 = scalar_lea.vmem %s2706_s5, %s2008_s11 }
  0x13   : > { %v1595_v6 = vunpack.c.l.bf16 %v1594_v4  ;;  %v1596_v7 = vunpack.c.h.bf16 %v1594_v4  ;;  %v1634_v8 = vld [vmem:[%s2020_s17] sm:$0xff]   ;;  %v1782_v10 = vld [vmem:[%s2020_s17 + $0x8] sm:$0xff]   ;;  %v1599_v14 = vunpack.c.l.bf16 %v1773_v9  ;;  %v1600_v15 = vunpack.c.h.bf16 %v1773_v9  ;;  %v1783_v17 = vld [vmem:[%s2020_s17 + $0x10] sm:$0xff]   ;;  %s1500_s11 = sshll.u32 %s2856_s24, 3 }
  0x14   : > { %v1635_v12 = vunpack.c.l.bf16 %v1634_v8  ;;  %v1636_v13 = vunpack.c.h.bf16 %v1634_v8  ;;  %v1639_v20 = vunpack.c.l.bf16 %v1782_v10  ;;  %v1640_v21 = vunpack.c.h.bf16 %v1782_v10  ;;  %v1775_v27 = vld [vmem:[%s2014_s14 + $0x18] sm:$0xff]   ;;  %1834 = vmatpush3.bf16.msra.mxu0 %v1908_v3  ;;  %1874 = vmatpush3.bf16.msra.mxu1 %v1908_v3  ;;  %v1776_v50 = vld [vmem:[%s2014_s14 + $0x20] sm:$0xff]   ;;  %v1777_v60 = vld [vmem:[%s2014_s14 + $0x28] sm:$0xff]   ;;  %s387_s22 = scalar_lea.vmem %s2708_s7, %s1500_s11 }
  0x15   : > { %v441_v18 = vmul.f32 %v1595_v6, %v2029_v5  ;;  %v442_v19 = vmul.f32 %v1596_v7, %v2029_v5  ;;  %v443_v23 = vmul.f32 %v1599_v14, %v2029_v5  ;;  %v444_v24 = vmul.f32 %v1600_v15, %v2029_v5  ;;  %v1784_v32 = vld [vmem:[%s2020_s17 + $0x18] sm:$0xff]   ;;  %1835 = vmatprep.subr.bf16.mxu0 %v1909_v22  ;;  %v1785_v55 = vld [vmem:[%s2020_s17 + $0x20] sm:$0xff]   ;;  %v1786_v7 = vld [vmem:[%s2020_s17 + $0x28] sm:$0xff]  }
  0x16   : > { %v1603_v25 = vunpack.c.l.bf16 %v1774_v16  ;;  %v1604_v26 = vunpack.c.h.bf16 %v1774_v16  ;;  %v1643_v30 = vunpack.c.l.bf16 %v1783_v17  ;;  %v1644_v31 = vunpack.c.h.bf16 %v1783_v17  ;;  %1867 = vmatprep.subr.bf16.mxu1 %v1909_v22 }
  0x17   : > { %v468_v28 = vadd.f32 %v2037_v11, %v441_v18  ;;  %v469_v29 = vadd.f32 %v2037_v11, %v442_v19  ;;  %v470_v33 = vadd.f32 %v2037_v11, %v443_v23  ;;  %v471_v34 = vadd.f32 %v2037_v11, %v444_v24  ;;  %v1912_v18 = vld [vmem:[%s2705_s4 + $0x38] sm:$0xff]   ;;  %v1787_v23 = vld [vmem:[%s2020_s17 + $0x30] sm:$0xff]  }
  0x18   : > { %v445_v35 = vmul.f32 %v1603_v25, %v2029_v5  ;;  %v446_v36 = vmul.f32 %v1604_v26, %v2029_v5  ;;  %v1607_v39 = vunpack.c.l.bf16 %v1775_v27  ;;  %v1608_v40 = vunpack.c.h.bf16 %v1775_v27  ;;  %1836 = vmatpush3.bf16.msra.mxu0 %v1909_v22  ;;  %1875 = vmatpush3.bf16.msra.mxu1 %v1909_v22 }
  0x19   : > { %v528_v37 = vadd.f32 %v1635_v12, %v468_v28  ;;  %v529_v38 = vadd.f32 %v1636_v13, %v469_v29  ;;  %v530_v42 = vadd.f32 %v1639_v20, %v470_v33  ;;  %v531_v43 = vadd.f32 %v1640_v21, %v471_v34  ;;  %1837 = vmatprep.subr.bf16.mxu0 %v1910_v41  ;;  %v1778_v13 = vld [vmem:[%s2014_s14 + $0x30] sm:$0xff]  }
  0x1a   : > { %v472_v44 = vadd.f32 %v2037_v11, %v445_v35  ;;  %v1647_v45 = vunpack.c.l.bf16 %v1784_v32  ;;  %v473_v48 = vadd.f32 %v2037_v11, %v446_v36  ;;  %v447_v49 = vmul.f32 %v1607_v39, %v2029_v5  ;;  %1868 = vmatprep.subr.bf16.mxu1 %v1910_v41 }
  0x1b   : > { %v548_v46 = vmax.f32 %v528_v37, 0.0  ;;  %v549_v47 = vmax.f32 %v529_v38, 0.0  ;;  %v550_v51 = vmax.f32 %v530_v42, 0.0  ;;  %v551_v52 = vmax.f32 %v531_v43, 0.0  ;;  %v1788_v37 = vld [vmem:[%s2020_s17 + $0x38] sm:$0xff]  }
  0x1c   : > { %v532_v53 = vadd.f32 %v1643_v30, %v472_v44  ;;  %v448_v54 = vmul.f32 %v1608_v40, %v2029_v5  ;;  %v533_v57 = vadd.f32 %v1644_v31, %v473_v48  ;;  %v474_v58 = vadd.f32 %v2037_v11, %v447_v49  ;;  %1838 = vmatpush3.bf16.msra.mxu0 %v1910_v41 }
  0x1d   : > { %v568_v56 = vpack.c.bf16 %v549_v47, %v548_v46  ;;  %v1648_v59 = vunpack.c.h.bf16 %v1784_v32  ;;  %v2076_v62 = vpack.c.bf16 %v551_v52, %v550_v51  ;;  %v1611_v1 = vunpack.c.l.bf16 %v1776_v50  ;;  %1876 = vmatpush3.bf16.msra.mxu1 %v1910_v41  ;;  %1839 = vmatprep.subr.bf16.mxu0 %v1911_v61  ;;  %v1779_v32 = vld [vmem:[%s2014_s14 + $0x38] sm:$0xff]   ;;  %v1780_v46 = vld [vmem:[%s2014_s14 + $0x40] sm:$0xff]  }
  0x1e   : > { %v552_v63 = vmax.f32 %v532_v53, 0.0  ;;  %v475_v0 = vadd.f32 %v2037_v11, %v448_v54  ;;  %v553_v2 = vmax.f32 %v533_v57, 0.0  ;;  %v534_v3 = vadd.f32 %v1647_v45, %v474_v58  ;;  %1869 = vmatprep.subr.bf16.mxu1 %v1911_v61 }
  0x1f   : > { %1677 = vst [vmem:[%s2067_s12] sm:$0xff] %v568_v56   ;;  %1843 = vmatprep.mubr.bf16.mxu0 %v568_v56  ;;  %v1612_v4 = vunpack.c.h.bf16 %v1776_v50  ;;  %v1651_v6 = vunpack.c.l.bf16 %v1785_v55  ;;  %1791 = vst [vmem:[%s2067_s12 + $0x8] sm:$0xff] %v2076_v62   ;;  %v449_v9 = vmul.f32 %v1611_v1, %v2029_v5  ;;  %v1652_v10 = vunpack.c.h.bf16 %v1785_v55  ;;  %v1789_v55 = vld [vmem:[%s2020_s17 + $0x40] sm:$0xff]  }
  0x20   : > { %v535_v8 = vadd.f32 %v1648_v59, %v475_v0  ;;  %v1615_v12 = vunpack.c.l.bf16 %v1777_v60  ;;  %v2085_v14 = vpack.c.bf16 %v553_v2, %v552_v63  ;;  %v554_v15 = vmax.f32 %v534_v3, 0.0  ;;  %1840 = vmatpush3.bf16.msra.mxu0 %v1911_v61 }
  0x21   : > { %v450_v16 = vmul.f32 %v1612_v4, %v2029_v5  ;;  %v1616_v17 = vunpack.c.h.bf16 %v1777_v60  ;;  %v476_v20 = vadd.f32 %v2037_v11, %v449_v9  ;;  %v1655_v22 = vunpack.c.l.bf16 %v1786_v7  ;;  %1877 = vmatpush3.bf16.msra.mxu1 %v1911_v61  ;;  %1841 = vmatprep.subr.bf16.mxu0 %v1912_v18  ;;  %v1781_v60 = vld [vmem:[%s2014_s14 + $0x48] sm:$0xff]  }
  0x22   : > { %v555_v19 = vmax.f32 %v535_v8, 0.0  ;;  %v451_v21 = vmul.f32 %v1615_v12, %v2029_v5  ;;  %1792 = vst [vmem:[%s2067_s12 + $0x10] sm:$0xff] %v2085_v14   ;;  %v1656_v26 = vunpack.c.h.bf16 %v1786_v7  ;;  %v1619_v27 = vunpack.c.l.bf16 %v1778_v13  ;;  %1870 = vmatprep.subr.bf16.mxu1 %v1912_v18  ;;  %v1790_v7 = vld [vmem:[%s2020_s17 + $0x48] sm:$0xff]  }
  0x23   : > { %v477_v24 = vadd.f32 %v2037_v11, %v450_v16  ;;  %v452_v25 = vmul.f32 %v1616_v17, %v2029_v5  ;;  %v536_v29 = vadd.f32 %v1651_v6, %v476_v20  ;;  %v1620_v31 = vunpack.c.h.bf16 %v1778_v13 }
  0x24   : > { %v2098_v28 = vpack.c.bf16 %v555_v19, %v554_v15  ;;  %v478_v30 = vadd.f32 %v2037_v11, %v451_v21  ;;  %v453_v35 = vmul.f32 %v1619_v27, %v2029_v5  ;;  %v1659_v36 = vunpack.c.l.bf16 %v1787_v23  ;;  %1842 = vmatpush3.bf16.msra.mxu0 %v1912_v18 }
  0x25   : > { %v537_v33 = vadd.f32 %v1652_v10, %v477_v24  ;;  %v479_v34 = vadd.f32 %v2037_v11, %v452_v25  ;;  %v556_v38 = vmax.f32 %v536_v29, 0.0  ;;  %v454_v40 = vmul.f32 %v1620_v31, %v2029_v5  ;;  %1878 = vmatpush3.bf16.msra.mxu1 %v1912_v18 }
  0x26   : > { %1793 = vst [vmem:[%s2067_s12 + $0x18] sm:$0xff] %v2098_v28   ;;  %v538_v39 = vadd.f32 %v1655_v22, %v478_v30  ;;  %v1660_v41 = vunpack.c.h.bf16 %v1787_v23  ;;  %v480_v44 = vadd.f32 %v2037_v11, %v453_v35  ;;  %v1623_v45 = vunpack.c.l.bf16 %v1779_v32 }
  0x27   : > { %v557_v42 = vmax.f32 %v537_v33, 0.0  ;;  %v539_v43 = vadd.f32 %v1656_v26, %v479_v34  ;;  %v481_v48 = vadd.f32 %v2037_v11, %v454_v40  ;;  %v1624_v49 = vunpack.c.h.bf16 %v1779_v32  ;;  %1844 = vmatmul.mubr.bf16.vlgmr.msra.gmra.mrb[0].mxu0 %v2076_v62 }
  0x28   : > { %v558_v47 = vmax.f32 %v538_v39, 0.0  ;;  %v1663_v50 = vunpack.c.l.bf16 %v1788_v37  ;;  %v540_v53 = vadd.f32 %v1659_v36, %v480_v44  ;;  %v455_v54 = vmul.f32 %v1623_v45, %v2029_v5  ;;  %1847 = vmatprep.mubr.bf16.mxu0 %v2085_v14 }
  0x29   : > { %v572_v51 = vpack.c.bf16 %v557_v42, %v556_v38  ;;  %v559_v52 = vmax.f32 %v539_v43, 0.0  ;;  %v541_v56 = vadd.f32 %v1660_v41, %v481_v48  ;;  %v456_v57 = vmul.f32 %v1624_v49, %v2029_v5 }
  0x2a   : > { %v1664_v58 = vunpack.c.h.bf16 %v1788_v37  ;;  %v1627_v59 = vunpack.c.l.bf16 %v1780_v46  ;;  %v560_v63 = vmax.f32 %v540_v53, 0.0  ;;  %v482_v0 = vadd.f32 %v2037_v11, %v455_v54 }
  0x2b   : > { %1794 = vst [vmem:[%s2067_s12 + $0x20] sm:$0xff] %v572_v51   ;;  %v573_v61 = vpack.c.bf16 %v559_v52, %v558_v47  ;;  %v1628_v1 = vunpack.c.h.bf16 %v1780_v46  ;;  %v561_v2 = vmax.f32 %v541_v56, 0.0  ;;  %v483_v3 = vadd.f32 %v2037_v11, %v456_v57 }
  0x2c   : > { %v457_v4 = vmul.f32 %v1627_v59, %v2029_v5  ;;  %v1667_v6 = vunpack.c.l.bf16 %v1789_v55  ;;  %v542_v8 = vadd.f32 %v1663_v50, %v482_v0  ;;  %v1668_v10 = vunpack.c.h.bf16 %v1789_v55 }
  0x2d   : > { %1795 = vst [vmem:[%s2067_s12 + $0x28] sm:$0xff] %v573_v61   ;;  %v458_v9 = vmul.f32 %v1628_v1, %v2029_v5  ;;  %v1631_v12 = vunpack.c.l.bf16 %v1781_v60  ;;  %v574_v13 = vpack.c.bf16 %v561_v2, %v560_v63  ;;  %v543_v15 = vadd.f32 %v1664_v58, %v483_v3 }
  0x2e   : > { %v484_v62 = vadd.f32 %v2037_v11, %v457_v4  ;;  %v1632_v16 = vunpack.c.h.bf16 %v1781_v60  ;;  %v562_v17 = vmax.f32 %v542_v8, 0.0  ;;  %v1671_v20 = vunpack.c.l.bf16 %v1790_v7 }
  0x2f   : > { %v485_v18 = vadd.f32 %v2037_v11, %v458_v9  ;;  %v459_v19 = vmul.f32 %v1631_v12, %v2029_v5  ;;  %1796 = vst [vmem:[%s2067_s12 + $0x30] sm:$0xff] %v574_v13   ;;  %1855 = vmatprep.mubr.bf16.mxu1 %v574_v13  ;;  %v563_v14 = vmax.f32 %v543_v15, 0.0  ;;  %v1672_v23 = vunpack.c.h.bf16 %v1790_v7  ;;  %1848 = vmatmul.mubr.bf16.gmra.mrb[4].mxu0 %v2098_v28 }
  0x30   : > { %v544_v21 = vadd.f32 %v1667_v6, %v484_v62  ;;  %v460_v22 = vmul.f32 %v1632_v16, %v2029_v5  ;;  %1851 = vmatprep.mubr.bf16.mxu0 %v572_v51  ;;  %v946_v36 = vlaneseq  ;;  %v2717_v51 = vmov 0 }
  0x31   : > { %v545_v24 = vadd.f32 %v1668_v10, %v485_v18  ;;  %v486_v25 = vadd.f32 %v2037_v11, %v459_v19  ;;  %v575_v26 = vpack.c.bf16 %v563_v14, %v562_v17  ;;  %v2719_v52 = vmov 0 }
  0x32   : > { %v564_v27 = vmax.f32 %v544_v21, 0.0  ;;  %v487_v29 = vadd.f32 %v2037_v11, %v460_v22  ;;  %v2135_v37 = vshrl.u32 %v946_v36, 7  ;;  %v2721_v55 = vmov 0 }
  0x33   : > { %v565_v30 = vmax.f32 %v545_v24, 0.0  ;;  %v546_v31 = vadd.f32 %v1671_v20, %v486_v25  ;;  %1797 = vst [vmem:[%s2067_s12 + $0x38] sm:$0xff] %v575_v26   ;;  %1856 = vmatmul.mubr.bf16.vlgmr.msra.gmra.mrb[0].mxu1 %v575_v26  ;;  %v2723_v56 = vmov 0  ;;  %v2735_v4 = vmov 0 }
  0x34   : > { %v547_v32 = vadd.f32 %v1672_v23, %v487_v29  ;;  %v949_v11 = vadd.s32 16, %v2135_v37  ;;  %v950_v28 = vadd.s32 24, %v2135_v37  ;;  %v948_v38 = vadd.s32 8, %v2135_v37 }
  0x35   : > { %v576_v33 = vpack.c.bf16 %v565_v30, %v564_v27  ;;  %v566_v5 = vmax.f32 %v546_v31, 0.0  ;;  %v953_v40 = vadd.s32 48, %v2135_v37  ;;  %v988_v42 = vshra.s32 %v2135_v37, 4 }
  0x36   : > { %v567_v34 = vmax.f32 %v547_v32, 0.0  ;;  %v990_v39 = vshra.s32 %v949_v11, 4  ;;  %v991_v41 = vshra.s32 %v950_v28, 4  ;;  %v954_v43 = vadd.s32 56, %v2135_v37 }
  0x37   : > { %1798 = vst [vmem:[%s2067_s12 + $0x40] sm:$0xff] %v576_v33   ;;  %1859 = vmatprep.mubr.bf16.mxu1 %v576_v33  ;;  %1852 = vmatmul.mubr.bf16.gmra.mrb[8].mxu0 %v573_v61  ;;  %v1010_v44 = vand.u32 15, %v949_v11  ;;  %v1011_v45 = vand.u32 15, %v950_v28  ;;  %v989_v46 = vshra.s32 %v948_v38, 4  ;;  %v994_v49 = vshra.s32 %v953_v40, 4 }
  0x38   : > { %v577_v35 = vpack.c.bf16 %v567_v34, %v566_v5  ;;  %vm2143_vm0 = vcmp.ge.s32.totalorder %v990_v39, 1  ;;  %vm2147_vm1 = vcmp.le.s32.totalorder %v990_v39, 8  ;;  %v951_v50 = vadd.s32 32, %v2135_v37 }
  0x39   : > { %vm2152_vm2 = vcmp.ge.s32.totalorder %v991_v41, 1  ;;  %vm2156_vm3 = vcmp.le.s32.totalorder %v991_v41, 8  ;;  %v1008_v53 = vand.u32 15, %v2135_v37  ;;  %v1009_v54 = vand.u32 15, %v948_v38 }
  0x3a   : > { %1799 = vst [vmem:[%s2067_s12 + $0x48] sm:$0xff] %v577_v35   ;;  %v2718_v51 = vsel %vm2152_vm2, 4294967295, %v2717_v51  ;;  %v2720_v52 = vsel %vm2156_vm3, 4294967295, %v2719_v52  ;;  %vm2161_vm4 = vcmp.ge.s32.totalorder %v988_v42, 1  ;;  %vm2165_vm5 = vcmp.le.s32.totalorder %v988_v42, 8 }
  0x3b   : > { %1860 = vmatmul.mubr.bf16.gmra.mrb[4].mxu1 %v577_v35  ;;  %v2722_v55 = vsel %vm2161_vm4, 4294967295, %v2721_v55  ;;  %v2724_v56 = vsel %vm2165_vm5, 4294967295, %v2723_v56  ;;  %v995_v57 = vshra.s32 %v954_v43, 4  ;;  %v952_v58 = vadd.s32 40, %v2135_v37 }
  0x3c   : > { %vm2174_vm7 = vcmp.ge.s32.totalorder %v1010_v44, 1  ;;  %vm2178_vm8 = vcmp.ge.s32.totalorder %v989_v46, 1  ;;  %vm2182_vm9 = vcmp.le.s32.totalorder %v989_v46, 8  ;;  %v1014_v63 = vand.u32 15, %v953_v40 }
  0x3d   : > { %vm2190_vm11 = vcmp.ge.s32.totalorder %v994_v49, 1  ;;  %vm2194_vm12 = vcmp.le.s32.totalorder %v994_v49, 8  ;;  %v992_v2 = vshra.s32 %v951_v50, 4  ;;  %v957_v3 = vadd.s32 80, %v2135_v37  ;;  %vm1069_vm10 = vmand %vm2178_vm8, %vm2182_vm9 }
  0x3e   : > { %vm1131_vm13 = vcmp.le.s32.totalorder %v1011_v45, 8  ;;  %vm2203_vm15 = vcmp.ge.s32.totalorder %v1008_v53, 1  ;;  %v1015_v6 = vand.u32 15, %v954_v43  ;;  %v958_v7 = vadd.s32 88, %v2135_v37  ;;  %vm1074_vm14 = vmand %vm2190_vm11, %vm2194_vm12 }
  0x3f   : > { %v2736_v4 = vsel %vm2203_vm15, 4294967295, %v2735_v4  ;;  %vm1129_vm6 = vcmp.le.s32.totalorder %v1009_v54, 8  ;;  %vm2212_vm3 = vcmp.ge.s32.totalorder %v995_v57, 1  ;;  %v2737_v8 = vmov 0  ;;  %vm2741_vm8 = vmand %vm2143_vm0, %vm2147_vm1 }
  0x40   : > { %v2738_v8 = vsel %vm2212_vm3, 4294967295, %v2737_v8  ;;  %vm2216_vm2 = vcmp.le.s32.totalorder %v995_v57, 8  ;;  %v2739_v9 = vmov 0  ;;  %v993_v10 = vshra.s32 %v952_v58, 4  ;;  %vm2231_vm9 = vmand %vm2741_vm8, %vm2174_vm7 }
  0x41   : > { %v2740_v9 = vsel %vm2216_vm2, 4294967295, %v2739_v9  ;;  %vm1094_vm5 = vcmp.ge.s32.totalorder %v1014_v63, 1  ;;  %v1012_v12 = vand.u32 15, %v951_v50  ;;  %v2742_v13 = vmov 0 }
  0x42   : > { %v2743_v13 = vsel %vm2231_vm9, 4294967295, %v2742_v13  ;;  %vm2744_vm3 = vnez %v2718_v51  ;;  %vm2745_vm2 = vnez %v2720_v52  ;;  %v2747_v15 = vmov 0 }
  0x43   : > { %vm2746_vm4 = vmand %vm2744_vm3, %vm2745_vm2  ;;  %vm2244_vm11 = vcmp.ge.s32.totalorder %v992_v2, 1  ;;  %v2749_v62 = vmov 0  ;;  %vm2248_vm12 = vcmp.le.s32.totalorder %v992_v2, 8  ;;  %v998_v17 = vshra.s32 %v957_v3, 4 }
  0x44   : > { %vm2240_vm15 = vmand %vm2746_vm4, %vm1131_vm13  ;;  %v2750_v62 = vsel %vm2244_vm11, 4294967295, %v2749_v62  ;;  %vm2753_vm0 = vnez %v2736_v4  ;;  %vm2754_vm1 = vnez %v2722_v55  ;;  %vm2755_vm7 = vnez %v2724_v56 }
  0x45   : > { %v2748_v15 = vsel %vm2240_vm15, 4294967295, %v2747_v15  ;;  %vm2756_vm2 = vmand %vm2754_vm1, %vm2755_vm7  ;;  %vm2761_vm13 = vnez %v2740_v9  ;;  %vm2762_vm8 = vnez %v2738_v8  ;;  %vm1135_vm9 = vcmp.le.s32.totalorder %v1015_v6, 8 }
  0x46   : > { %vm2259_vm3 = vmand %vm2756_vm2, %vm2753_vm0  ;;  %v999_v20 = vshra.s32 %v958_v7, 4  ;;  %v955_v14 = vadd.s32 64, %v2135_v37  ;;  %v1013_v22 = vand.u32 15, %v952_v58  ;;  %vm2276_vm0 = vcmp.ge.s32.totalorder %v993_v10, 1 }
  0x47   : > { %vm2263_vm4 = vmand %vm1069_vm10, %vm1129_vm6  ;;  %vm2280_vm6 = vcmp.le.s32.totalorder %v993_v10, 8  ;;  %v956_v25 = vadd.s32 72, %v2135_v37  ;;  %vm2769_vm10 = vnez %v2750_v62  ;;  %v1018_v26 = vand.u32 15, %v957_v3 }
  0x48   : > { %vm1075_vm15 = vmand %vm2762_vm8, %vm2761_vm13  ;;  %v2770_v27 = vmov 0  ;;  %v1019_v29 = vand.u32 15, %v958_v7  ;;  %vm2293_vm7 = vcmp.ge.s32.totalorder %v998_v17, 1  ;;  %vm2297_vm2 = vcmp.le.s32.totalorder %v998_v17, 8 }
  0x49   : > { %vm2272_vm11 = vmand %vm1074_vm14, %vm1094_vm5  ;;  %vm1092_vm5 = vcmp.ge.s32.totalorder %v1012_v12, 1  ;;  %vm2305_vm13 = vcmp.ge.s32.totalorder %v999_v20, 1  ;;  %v996_v5 = vshra.s32 %v955_v14, 4  ;;  %vm1133_vm8 = vcmp.le.s32.totalorder %v1013_v22, 8 }
  0x4a   : > { %vm1072_vm1 = vmand %vm2769_vm10, %vm2248_vm12  ;;  %v997_v35 = vshra.s32 %v956_v25, 4  ;;  %v1016_v36 = vand.u32 15, %v955_v14  ;;  %v961_v11 = vadd.s32 112, %v2135_v37  ;;  %v1017_v38 = vand.u32 15, %v956_v25 }
  0x4b   : > { %vm2289_vm14 = vmand %vm1075_vm15, %vm1135_vm9  ;;  %vm2309_vm15 = vcmp.le.s32.totalorder %v999_v20, 8  ;;  %v2788_v41 = vmov 0  ;;  %v962_v44 = vadd.s32 120, %v2135_v37  ;;  %v1937_v45 = vmov 0.0  }
  0x4c   : > { %v2771_v27 = vsel %vm2289_vm14, 4294967295, %v2770_v27  ;;  %vm1073_vm12 = vmand %vm2276_vm0, %vm2280_vm6  ;;  %vm1098_vm6 = vcmp.ge.s32.totalorder %v1018_v26, 1  ;;  %vm1139_vm14 = vcmp.le.s32.totalorder %v1019_v29, 8  ;;  %vm2342_vm10 = vcmp.ge.s32.totalorder %v997_v35, 1 }
  0x4d   : > { %vm2313_vm9 = vmand %vm1072_vm1, %vm1092_vm5  ;;  %vm2330_vm5 = vcmp.ge.s32.totalorder %v996_v5, 1  ;;  %v1168_v50 = vsel %vm2259_vm3, 1.0, %v1937_v45  ;;  %v1169_v51 = vsel %vm2263_vm4, 1.0, %v1937_v45  ;;  %v1002_v53 = vshra.s32 %v961_v11, 4 }
  0x4e   : > { %vm1078_vm0 = vmand %vm2293_vm7, %vm2297_vm2  ;;  %vm2334_vm7 = vcmp.le.s32.totalorder %v996_v5, 8  ;;  %v2383_v55 = vsel %vm2272_vm11, 1.0, %v1937_v45  ;;  %vm2389_vm4 = vcmp.le.s32.totalorder %v1017_v38, 8  ;;  %v1022_v57 = vand.u32 15, %v961_v11 }
  0x4f   : > { %vm2326_vm1 = vmand %vm1073_vm12, %vm1133_vm8  ;;  %vm2346_vm12 = vcmp.le.s32.totalorder %v997_v35, 8  ;;  %vm2794_vm8 = vnez %v2743_v13  ;;  %v2394_v58 = vadd.s32 96, %v2135_v37  ;;  %vm2803_vm11 = vnez %v2771_v27 }
  0x50   : > { %vm2338_vm2 = vmand %vm1078_vm0, %vm1098_vm6  ;;  %v1170_v46 = vsel %vm2794_vm8, 1.0, %v1937_v45  ;;  %vm2795_vm0 = vnez %v2748_v15  ;;  %v2405_v60 = vsel %vm2803_vm11, 1.0, %v1937_v45  ;;  %v2410_v61 = vsel %vm2313_vm9, 1.0, %v1937_v45 }
  0x51   : > { %v2789_v41 = vsel %vm2338_vm2, 4294967295, %v2788_v41  ;;  %v1171_v47 = vsel %vm2795_vm0, 1.0, %v1937_v45  ;;  %vm2796_vm6 = vmand %vm2305_vm13, %vm2309_vm15  ;;  %vm2376_vm0 = vcmp.ge.s32.totalorder %v1016_v36, 1  ;;  %v2415_v63 = vsel %vm2326_vm1, 1.0, %v1937_v45 }
  0x52   : > { %vm2362_vm2 = vmand %vm2796_vm6, %vm1139_vm14  ;;  %v1003_v0 = vshra.s32 %v962_v44, 4  ;;  %vm2804_vm14 = vnez %v2789_v41  ;;  %v1023_v6 = vand.u32 15, %v962_v44  ;;  %vm2441_vm9 = vcmp.ge.s32.totalorder %v1002_v53, 1 }
  0x53   : > { %vm1076_vm8 = vmand %vm2330_vm5, %vm2334_vm7  ;;  %v2420_v3 = vsel %vm2804_vm14, 1.0, %v1937_v45  ;;  %v2425_v4 = vsel %vm2362_vm2, 1.0, %v1937_v45  ;;  %vm2445_vm1 = vcmp.le.s32.totalorder %v1002_v53, 8  ;;  %v960_v10 = vadd.s32 104, %v2135_v37 }
  0x54   : > { %vm1077_vm3 = vmand %vm2342_vm10, %vm2346_vm12  ;;  %vm2451_vm5 = vcmp.ge.s32.totalorder %v1022_v57, 1  ;;  %v1000_v62 = vshra.s32 %v2394_v58, 4  ;;  %vm2460_vm10 = vcmp.ge.s32.totalorder %v1003_v0, 1  ;;  %vm2467_vm7 = vcmp.le.s32.totalorder %v1003_v0, 8 }
  0x55   : > { %vm1116_vm13 = vmand %vm1076_vm8, %vm2376_vm0  ;;  %vm2471_vm2 = vcmp.le.s32.totalorder %v1023_v6, 8  ;;  %v1001_v27 = vshra.s32 %v960_v10, 4  ;;  %v1020_v29 = vand.u32 15, %v2394_v58  ;;  %v1021_v33 = vand.u32 15, %v960_v10 }
  0x56   : > { %vm1157_vm15 = vmand %vm1077_vm3, %vm2389_vm4  ;;  %v2458_v18 = vsel %vm1116_vm13, 1.0, %v1937_v45  ;;  %vm2480_vm6 = vcmp.ge.s32.totalorder %v1000_v62, 1  ;;  %vm2484_vm8 = vcmp.le.s32.totalorder %v1000_v62, 8  ;;  %v2489_v39 = vadd.s32 144, %v2135_v37 }
  0x57   : > { %v2465_v14 = vsel %vm1157_vm15, 1.0, %v1937_v45  ;;  %vm1082_vm12 = vmand %vm2441_vm9, %vm2445_vm1  ;;  %vm2516_vm4 = vcmp.ge.s32.totalorder %v1001_v27, 1  ;;  %vm2520_vm11 = vcmp.le.s32.totalorder %v1001_v27, 8  ;;  %vm2543_vm13 = vcmp.ge.s32.totalorder %v1020_v29, 1 }
  0x58   : > { %vm1083_vm0 = vmand %vm2460_vm10, %vm2467_vm7  ;;  %vm2547_vm15 = vcmp.le.s32.totalorder %v1021_v33, 8  ;;  %v1006_v62 = vshra.s32 %v2489_v39, 4 }
  0x59   : > { %vm2507_vm3 = vmand %vm1082_vm12, %vm2451_vm5 }
  0x5a   : > { %vm2534_vm14 = vmand %vm1083_vm0, %vm2471_vm2  ;;  %v2541_v6 = vsel %vm2507_vm3, 1.0, %v1937_v45  ;;  %vm2592_vm5 = vcmp.ge.s32.totalorder %v1006_v62, 1  ;;  %vm2637_vm0 = vcmp.le.s32.totalorder %v1006_v62, 8 }
  0x5b   : > { %vm1080_vm9 = vmand %vm2480_vm6, %vm2484_vm8 }
  0x5c   : > { %vm2581_vm1 = vmand %vm1080_vm9, %vm2543_vm13 }
  0x5d   : > { %vm1081_vm10 = vmand %vm2516_vm4, %vm2520_vm11 }
  0x5e   : > { %vm1161_vm12 = vmand %vm1081_vm10, %vm2547_vm15 }
  0xfa   : > { %v1845_v49 = vpop.f32.mrb[0].mxu0 }
  0xfb   : > { %v766_v54 = vpop.f32.mrb[1].mxu0 }
  0xfc   : > { %v1846_v59 = vpop.f32.mrb[2].mxu0 }
  0xfd   : > { %v846_v1 = vpack.c.bf16 %v1846_v59, %v1845_v49  ;;  %v769_v2 = vpop.f32.mrb[3].mxu0 }
  0xfe   : > { %v845_v7 = vpack.c.bf16 %v769_v2, %v766_v54 }
  0xff   : > { %1800 = vst [vmem:[%s2400_s19 + $0x8] sm:$0xff] %v846_v1   ;;  %v1191_v12 = vunpack.c.l.bf16 %v846_v1  ;;  %v1192_v13 = vunpack.c.h.bf16 %v846_v1 }
 0x100   : > { %1727 = vst [vmem:[%s2400_s19] sm:$0xff] %v845_v7   ;;  %v1189_v16 = vunpack.c.l.bf16 %v845_v7  ;;  %v1190_v17 = vunpack.c.h.bf16 %v845_v7 }
 0x101   : > { %v1211_v20 = vmul.f32 %v1191_v12, %v1170_v46  ;;  %v1212_v30 = vmul.f32 %v1192_v13, %v1171_v47  ;;  %v2498_v46 = vadd.s32 152, %v2135_v37 }
 0x102   : > { %v1209_v23 = vmul.f32 %v1189_v16, %v1168_v50  ;;  %v1210_v24 = vmul.f32 %v1190_v17, %v1169_v51  ;;  %v1849_v25 = vpop.f32.mrb[4].mxu0 }
 0x103   : > { %v782_v31 = vpop.f32.mrb[5].mxu0  ;;  %v1256_v40 = vmul.f32 %v1211_v20, %v1211_v20  ;;  %v1257_v52 = vmul.f32 %v1212_v30, %v1212_v30 }
 0x104   : > { %v1229_v35 = vadd.f32 %v1210_v24, %v1209_v23  ;;  %v1254_v36 = vmul.f32 %v1209_v23, %v1209_v23  ;;  %v1255_v11 = vmul.f32 %v1210_v24, %v1210_v24  ;;  %v1850_v28 = vpop.f32.mrb[6].mxu0 }
 0x105   : > { %v848_v41 = vpack.c.bf16 %v1850_v28, %v1849_v25  ;;  %v785_v42 = vpop.f32.mrb[7].mxu0  ;;  %v1026_v25 = vand.u32 15, %v2489_v39 }
 0x106   : > { %v1857_v26 = vpop.f32.mrb[0].mxu1  ;;  %v1230_v47 = vadd.f32 %v1229_v35, %v1211_v20  ;;  %v1274_v48 = vadd.f32 %v1255_v11, %v1254_v36  ;;  %v847_v49 = vpack.c.bf16 %v785_v42, %v782_v31  ;;  %v1007_v20 = vshra.s32 %v2498_v46, 4 }
 0x107   : > { %v814_v32 = vpop.f32.mrb[1].mxu1  ;;  %1802 = vst [vmem:[%s2400_s19 + $0x18] sm:$0xff] %v848_v41   ;;  %v1195_v53 = vunpack.c.l.bf16 %v848_v41  ;;  %v1196_v1 = vunpack.c.h.bf16 %v848_v41  ;;  %vm1106_vm10 = vcmp.ge.s32.totalorder %v1026_v25, 1 }
 0x108   : > { %v1858_v38 = vpop.f32.mrb[2].mxu1  ;;  %v1275_v57 = vadd.f32 %v1274_v48, %v1256_v40  ;;  %1801 = vst [vmem:[%s2400_s19 + $0x10] sm:$0xff] %v847_v49   ;;  %v1193_v58 = vunpack.c.l.bf16 %v847_v49  ;;  %v1194_v59 = vunpack.c.h.bf16 %v847_v49  ;;  %v1231_v0 = vadd.f32 %v1230_v47, %v1212_v30 }
 0x109   : > { %v2491_v43 = vpack.c.bf16 %v1858_v38, %v1857_v26  ;;  %v817_v44 = vpop.f32.mrb[3].mxu1  ;;  %v1215_v16 = vmul.f32 %v1195_v53, %v2383_v55  ;;  %v2567_v55 = vsel %vm2534_vm14, 1.0, %v1937_v45  ;;  %v1216_v26 = vmul.f32 %v1196_v1, %v2405_v60 }
 0x10a   : > { %v2511_v51 = vpack.c.bf16 %v817_v44, %v814_v32  ;;  %v1213_v9 = vmul.f32 %v1193_v58, %v2410_v61  ;;  %v1214_v10 = vmul.f32 %v1194_v59, %v2415_v63  ;;  %v1276_v12 = vadd.f32 %v1275_v57, %v1257_v52  ;;  %v1853_v13 = vpop.f32.mrb[8].mxu0 }
 0x10b   : > { %1806 = vst [vmem:[%s2400_s19 + $0x38] sm:$0xff] %v2491_v43   ;;  %v798_v17 = vpop.f32.mrb[9].mxu0  ;;  %v963_v61 = vadd.s32 128, %v2135_v37  ;;  %v2562_v63 = vadd.s32 136, %v2135_v37  ;;  %v1027_v37 = vand.u32 15, %v2498_v46  ;;  %v1260_v11 = vmul.f32 %v1215_v16, %v1215_v16 }
 0x10c   : > { %1805 = vst [vmem:[%s2400_s19 + $0x30] sm:$0xff] %v2511_v51   ;;  %v1232_v21 = vadd.f32 %v1231_v0, %v1213_v9  ;;  %v1258_v22 = vmul.f32 %v1213_v9, %v1213_v9  ;;  %v1854_v23 = vpop.f32.mrb[10].mxu0  ;;  %v1259_v33 = vmul.f32 %v1214_v10, %v1214_v10  ;;  %v1261_v47 = vmul.f32 %v1216_v26, %v1216_v26 }
 0x10d   : > { %v850_v27 = vpack.c.bf16 %v1854_v23, %v1853_v13  ;;  %v801_v29 = vpop.f32.mrb[11].mxu0  ;;  %v1004_v38 = vshra.s32 %v963_v61, 4  ;;  %v1005_v40 = vshra.s32 %v2562_v63, 4  ;;  %v1180_v49 = vsel %vm2581_vm1, 1.0, %v1937_v45  ;;  %vm1086_vm1 = vmand %vm2592_vm5, %vm2637_vm0 }
 0x10e   : > { %v1861_v15 = vpop.f32.mrb[4].mxu1  ;;  %v1233_v32 = vadd.f32 %v1232_v21, %v1214_v10  ;;  %v1277_v35 = vadd.f32 %v1276_v12, %v1258_v22  ;;  %v849_v36 = vpack.c.bf16 %v801_v29, %v798_v17  ;;  %v1024_v50 = vand.u32 15, %v963_v61  ;;  %vm1126_vm5 = vmand %vm1086_vm1, %vm1106_vm10 }
 0x10f   : > { %v830_v19 = vpop.f32.mrb[5].mxu1  ;;  %1804 = vst [vmem:[%s2400_s19 + $0x28] sm:$0xff] %v850_v27   ;;  %v1199_v28 = vunpack.c.l.bf16 %v850_v27  ;;  %v1200_v48 = vunpack.c.h.bf16 %v850_v27  ;;  %v1201_v59 = vunpack.c.l.bf16 %v2511_v51  ;;  %v1025_v0 = vand.u32 15, %v2562_v63 }
 0x110   : > { %v1862_v24 = vpop.f32.mrb[6].mxu1  ;;  %v1234_v41 = vadd.f32 %v1233_v32, %v1215_v16  ;;  %v1278_v42 = vadd.f32 %v1277_v35, %v1259_v33  ;;  %1803 = vst [vmem:[%s2400_s19 + $0x20] sm:$0xff] %v849_v36   ;;  %v1197_v44 = vunpack.c.l.bf16 %v849_v36  ;;  %v1198_v5 = vunpack.c.h.bf16 %v849_v36 }
 0x111   : > { %v2571_v30 = vpack.c.bf16 %v1862_v24, %v1861_v15  ;;  %v833_v31 = vpop.f32.mrb[7].mxu1  ;;  %vm2607_vm7 = vcmp.ge.s32.totalorder %v1004_v38, 1  ;;  %vm2611_vm2 = vcmp.le.s32.totalorder %v1004_v38, 8  ;;  %v1219_v7 = vmul.f32 %v1199_v28, %v2420_v3 }
 0x112   : > { %v1279_v52 = vadd.f32 %v1278_v42, %v1260_v11  ;;  %v1217_v53 = vmul.f32 %v1197_v44, %v2458_v18  ;;  %v1218_v57 = vmul.f32 %v1198_v5, %v2465_v14  ;;  %v1235_v58 = vadd.f32 %v1234_v41, %v1216_v26  ;;  %vm1084_vm3 = vmand %vm2607_vm7, %vm2611_vm2 }
 0x113   : > { %1808 = vst [vmem:[%s2400_s19 + $0x48] sm:$0xff] %v2571_v30   ;;  %v1202_v14 = vunpack.c.h.bf16 %v2511_v51  ;;  %v853_v12 = vpack.c.bf16 %v833_v31, %v830_v19  ;;  %vm2624_vm6 = vcmp.ge.s32.totalorder %v1005_v40, 1  ;;  %vm2628_vm8 = vcmp.le.s32.totalorder %v1005_v40, 8 }
 0x114   : > { %v1236_v9 = vadd.f32 %v1235_v58, %v1217_v53  ;;  %v1262_v18 = vmul.f32 %v1217_v53, %v1217_v53  ;;  %v1280_v10 = vadd.f32 %v1279_v52, %v1261_v47  ;;  %v1220_v15 = vmul.f32 %v1200_v48, %v2425_v4  ;;  %vm1085_vm13 = vmand %vm2624_vm6, %vm2628_vm8 }
 0x115   : > { %v1263_v16 = vmul.f32 %v1218_v57, %v1218_v57  ;;  %v1203_v56 = vunpack.c.l.bf16 %v2491_v43  ;;  %v1181_v17 = vsel %vm1161_vm12, 1.0, %v1937_v45  ;;  %1807 = vst [vmem:[%s2400_s19 + $0x40] sm:$0xff] %v853_v12   ;;  %vm1104_vm4 = vcmp.ge.s32.totalorder %v1024_v50, 1 }
 0x116   : > { %v1237_v8 = vadd.f32 %v1236_v9, %v1218_v57  ;;  %v1281_v54 = vadd.f32 %v1280_v10, %v1262_v18  ;;  %v1264_v4 = vmul.f32 %v1219_v7, %v1219_v7  ;;  %v1221_v63 = vmul.f32 %v1201_v59, %v1180_v49  ;;  %vm1124_vm9 = vmand %vm1084_vm3, %vm1104_vm4 }
 0x117   : > { %v1204_v21 = vunpack.c.h.bf16 %v2491_v43  ;;  %vm2649_vm11 = vcmp.ge.s32.totalorder %v1007_v20, 1  ;;  %vm2655_vm14 = vcmp.le.s32.totalorder %v1007_v20, 8  ;;  %vm1145_vm15 = vcmp.le.s32.totalorder %v1025_v0, 8 }
 0x118   : > { %v1238_v19 = vadd.f32 %v1237_v8, %v1219_v7  ;;  %v1282_v61 = vadd.f32 %v1281_v54, %v1263_v16  ;;  %v1265_v23 = vmul.f32 %v1220_v15, %v1220_v15  ;;  %v1222_v24 = vmul.f32 %v1202_v14, %v1181_v17  ;;  %vm1165_vm12 = vmand %vm1085_vm13, %vm1145_vm15 }
 0x119   : > { %v1223_v20 = vmul.f32 %v1203_v56, %v2541_v6  ;;  %v1266_v29 = vmul.f32 %v1221_v63, %v1221_v63  ;;  %v1205_v32 = vunpack.c.l.bf16 %v853_v12  ;;  %v1224_v33 = vmul.f32 %v1204_v21, %v2567_v55  ;;  %vm1087_vm7 = vmand %vm2649_vm11, %vm2655_vm14 }
 0x11a   : > { %v1283_v43 = vadd.f32 %v1282_v61, %v1264_v4  ;;  %v1239_v26 = vadd.f32 %v1238_v19, %v1220_v15  ;;  %vm1147_vm2 = vcmp.le.s32.totalorder %v1027_v37, 8  ;;  %v1184_v6 = vsel %vm1124_vm9, 1.0, %v1937_v45 }
 0x11b   : > { %v1267_v39 = vmul.f32 %v1222_v24, %v1222_v24  ;;  %v1206_v36 = vunpack.c.h.bf16 %v853_v12  ;;  %v1268_v60 = vmul.f32 %v1223_v20, %v1223_v20  ;;  %v1185_v11 = vsel %vm1165_vm12, 1.0, %v1937_v45  ;;  %vm1167_vm6 = vmand %vm1087_vm7, %vm1147_vm2 }
 0x11c   : > { %v1240_v27 = vadd.f32 %v1239_v26, %v1221_v63  ;;  %v1284_v31 = vadd.f32 %v1283_v43, %v1265_v23  ;;  %v1207_v38 = vunpack.c.l.bf16 %v2571_v30  ;;  %v1225_v40 = vmul.f32 %v1205_v32, %v1184_v6 }
 0x11d   : > { %v1269_v41 = vmul.f32 %v1224_v33, %v1224_v33  ;;  %v1186_v46 = vsel %vm1126_vm5, 1.0, %v1937_v45  ;;  %v1208_v42 = vunpack.c.h.bf16 %v2571_v30  ;;  %v1226_v44 = vmul.f32 %v1206_v36, %v1185_v11 }
 0x11e   : > { %v1241_v35 = vadd.f32 %v1240_v27, %v1222_v24  ;;  %v1285_v25 = vadd.f32 %v1284_v31, %v1266_v29  ;;  %v1187_v34 = vsel %vm1167_vm6, 1.0, %v1937_v45  ;;  %v1227_v47 = vmul.f32 %v1207_v38, %v1186_v46 }
 0x11f   : > { %v1270_v49 = vmul.f32 %v1225_v40, %v1225_v40  ;;  %v1228_v52 = vmul.f32 %v1208_v42, %v1187_v34  ;;  %v1271_v57 = vmul.f32 %v1226_v44, %v1226_v44  ;;  %vm1299_vm8 = vcmask 1040384  }
 0x120   : > { %v1242_v28 = vadd.f32 %v1241_v35, %v1223_v20  ;;  %v1286_v55 = vadd.f32 %v1285_v25, %v1267_v39  ;;  %v1272_v59 = vmul.f32 %v1227_v47, %v1227_v47  ;;  %vm1301_vm0 = vcmask 1041408  }
 0x121   : > { %v1273_v2 = vmul.f32 %v1228_v52, %v1228_v52 }
 0x122   : > { %v1287_v37 = vadd.f32 %v1286_v55, %v1268_v60  ;;  %v1243_v5 = vadd.f32 %v1242_v28, %v1224_v33 }
 0x124   : > { %v1244_v48 = vadd.f32 %v1243_v5, %v1225_v40  ;;  %v1288_v50 = vadd.f32 %v1287_v37, %v1269_v41 }
 0x126   : > { %v1245_v53 = vadd.f32 %v1244_v48, %v1226_v44  ;;  %v1289_v58 = vadd.f32 %v1288_v50, %v1270_v49 }
 0x128   : > { %v1246_v0 = vadd.f32 %v1245_v53, %v1227_v47  ;;  %v1290_v1 = vadd.f32 %v1289_v58, %v1271_v57 }
 0x12a   : > { %v1247_v7 = vadd.f32 %v1246_v0, %v1228_v52  ;;  %v1291_v9 = vadd.f32 %v1290_v1, %v1272_v59 }
 0x12c   : > { %v1248_v30 = vrot.slane %v1247_v7, 4  ;;  %v1292_v18 = vadd.f32 %v1291_v9, %v1273_v2 }
 0x12e   : > { %v1249_v10 = vadd.f32 %v1248_v30, %v1247_v7  ;;  %v1293_v14 = vrot.slane %v1292_v18, 4 }
 0x130   : > { %v1250_v45 = vrot.slane %v1249_v10, 2  ;;  %v1294_v12 = vadd.f32 %v1293_v14, %v1292_v18 }
 0x132   : > { %v1251_v13 = vadd.f32 %v1250_v45, %v1249_v10  ;;  %v1295_v3 = vrot.slane %v1294_v12, 2 }
 0x134   : > { %v1252_v15 = vrot.slane %v1251_v13, 1  ;;  %v1296_v8 = vadd.f32 %v1295_v3, %v1294_v12 }
 0x136   : > { %v1297_v16 = vrot.slane %v1296_v8, 1  ;;  %v1253_v54 = vadd.f32 %v1252_v15, %v1251_v13 }
 0x138   : > { %v1298_v56 = vadd.f32 %v1297_v16, %v1296_v8 }
 0x13a   : > { %v1300_v17 = vsel %vm1299_vm8, %v1253_v54, %v1298_v56 }
 0x13b   : > { %v1302_v51 = vsel %vm1301_vm0, %v1300_v17, 0.0 }
 0x13c   : > { %1304 = vst [vmem:[%s387_s22] sm:$0xff] %v1302_v51 }
 0x13d PF: > { %s18_s26 = sadd.s32 1, %s1935_s26   ;;  %s2851_s24 = smov %s1931_s25 }
 0x13e   : > { %p15_p5 = scmp.ge.s32.totalorder %s18_s26, 4   ;;  %s2852_s25 = smov %s2854_s27 }
 0x140   :  { %17 = sbr.rel (!%p15_p5) target bundleno = 2 (0x2), region = 101 }

// kernel: bottleneck_stage_forward.8
= control target key start
LH: loop header
LB: loop body
LE: loop exit
PB: predicated region body
PF: predicated region fallthrough
CT: control target
= control target key end

     0   :  { %s3297_s18 = smov 0   ;;  %s4500_s0 = inlined_call_operand.vmem [shape: bf16[2,160,128], index: 0, kind: input, shape index: {}]   ;;  %s4501_s1 = inlined_call_operand.vmem [shape: f32[1,128], index: 1, kind: input, shape index: {}]   ;;  %s4502_s2 = inlined_call_operand.vmem [shape: f32[1,128], index: 2, kind: input, shape index: {}]   ;;  %s4503_s3 = inlined_call_operand.vmem [shape: bf16[3,384,128], index: 3, kind: input, shape index: {}]   ;;  %s4504_s4 = inlined_call_operand.vmem [shape: bf16[2,160,128], index: 4, kind: output, shape index: {0}]   ;;  %s4505_s5 = inlined_call_operand.vmem [shape: f32[2,8,128], index: 5, kind: output, shape index: {1}]  }
   0x1 LB: > { %s2340_s19 = sadd.s32 4294967295, %s3263_s18   ;;  %p2344_p0 = scmp.ge.s32.totalorder %s3263_s18, 1  ;;  %s3263_s18 = sphi %s3297_s18, %s16_s18  }
   0x2   : > { %p190_p1 = scmp.lt.s32.totalorder %s3263_s18, 3 }
   0x4   : > { %p191_p2 = pnand %p2344_p0, %p190_p1 }
   0x6   : > { %194 = sbr.rel (%p191_p2) target bundleno = 487 (0x1e7), region = 36 }
   0xd   : > { %v3185_v0 = vld [vmem:[%s4503_s3 + $0x100] sm:$0xff]   ;;  %v237_v1 = vlaneseq  ;;  %p222_p3 = scmp.lt.s32.totalorder %s2340_s19, 1  ;;  %v3188_v4 = vld [vmem:[%s4503_s3 + $0x108] sm:$0xff]   ;;  %v3191_v8 = vld [vmem:[%s4503_s3 + $0x110] sm:$0xff]   ;;  %v3265_v57 = vmov 0.0   ;;  %v3266_v45 = vmov 0  }
   0xe   : > { %v3186_v2 = vld [vmem:[%s4503_s3 + $0x140] sm:$0xff]   ;;  %2668 = vmatprep.subr.bf16.mxu0 %v3185_v0  ;;  %v3189_v6 = vld [vmem:[%s4503_s3 + $0x148] sm:$0xff]   ;;  %v3192_v10 = vld [vmem:[%s4503_s3 + $0x150] sm:$0xff]  }
   0xf   : > { %v3187_v3 = vld [vmem:[%s4503_s3 + $0xc0] sm:$0xff]   ;;  %2950 = vmatprep.subr.bf16.mxu1 %v3186_v2  ;;  %v3317_v5 = vshrl.u32 %v237_v1, 7  ;;  %v3190_v7 = vld [vmem:[%s4503_s3 + $0xc8] sm:$0xff]   ;;  %s4637_s19 = smov (!%p222_p3, %s2340_s19), 1  ;;  %v3193_v11 = vld [vmem:[%s4503_s3 + $0xd0] sm:$0xff]  }
  0x10   : > { %2669 = vmatpush3.bf16.msra.mxu0 %v3187_v3  ;;  %2951 = vmatpush3.bf16.msra.mxu1 %v3186_v2  ;;  %v3194_v12 = vld [vmem:[%s4503_s3 + $0x118] sm:$0xff]   ;;  %s3174_s21 = smul.u32 80, %s4637_s19  ;;  %v3197_v17 = vld [vmem:[%s4503_s3 + $0x120] sm:$0xff]   ;;  %v3200_v25 = vld [vmem:[%s4503_s3 + $0x128] sm:$0xff]  }
  0x11   : > { %2670 = vmatprep.subr.bf16.mxu0 %v3188_v4  ;;  %2952 = vmatprep.subr.bf16.mxu1 %v3189_v6  ;;  %v239_v9 = vadd.s32 8, %v3317_v5  ;;  %v258_v13 = vshra.s32 %v3317_v5, 4  ;;  %v3195_v14 = vld [vmem:[%s4503_s3 + $0x158] sm:$0xff]   ;;  %v278_v18 = vand.u32 15, %v3317_v5  ;;  %v3198_v19 = vld [vmem:[%s4503_s3 + $0x160] sm:$0xff]   ;;  %v240_v26 = vadd.s32 16, %v3317_v5 }
  0x12   : > { %v3196_v16 = vld [vmem:[%s4503_s3 + $0xd8] sm:$0xff]   ;;  %v3199_v23 = vld [vmem:[%s4503_s3 + $0xe0] sm:$0xff]   ;;  %v3201_v27 = vld [vmem:[%s4503_s3 + $0x168] sm:$0xff]   ;;  %v241_v28 = vadd.s32 24, %v3317_v5  ;;  %s3400_s15 = scalar_lea.vmem %s4500_s0, %s3174_s21  ;;  %v242_v61 = vadd.s32 32, %v3317_v5  ;;  %v243_v1 = vadd.s32 40, %v3317_v5  ;;  %s4448_s20 = scalar_lea.vmem %s4504_s4, %s3174_s21 }
  0x13   : > { %v259_v15 = vshra.s32 %v239_v9, 4  ;;  %v279_v20 = vand.u32 15, %v239_v9  ;;  %vm3355_vm0 = vcmp.ge.s32.totalorder %v258_v13, 1  ;;  %vm3366_vm2 = vcmp.le.s32.totalorder %v258_v13, 8  ;;  %v3202_v29 = vld [vmem:[%s4503_s3 + $0xe8] sm:$0xff]   ;;  %v3203_v31 = vld [vmem:[%s4503_s3 + $0x130] sm:$0xff]  }
  0x14   : > { %2671 = vmatpush3.bf16.msra.mxu0 %v3190_v7  ;;  %2953 = vmatpush3.bf16.msra.mxu1 %v3189_v6  ;;  %vm3388_vm4 = vcmp.ge.s32.totalorder %v278_v18, 1  ;;  %v260_v33 = vshra.s32 %v240_v26, 4  ;;  %v261_v34 = vshra.s32 %v241_v28, 4  ;;  %v3204_v35 = vld [vmem:[%s4503_s3 + $0x170] sm:$0xff]   ;;  %v280_v36 = vand.u32 15, %v240_v26  ;;  %v3206_v39 = vld [vmem:[%s4503_s3 + $0x138] sm:$0xff]   ;;  %vm338_vm6 = vmand %vm3355_vm0, %vm3366_vm2 }
  0x15   : > { %2672 = vmatprep.subr.bf16.mxu0 %v3191_v8  ;;  %2954 = vmatprep.subr.bf16.mxu1 %v3192_v10  ;;  %vm3359_vm1 = vcmp.ge.s32.totalorder %v259_v15, 1  ;;  %vm3381_vm3 = vcmp.le.s32.totalorder %v259_v15, 8  ;;  %v3205_v37 = vld [vmem:[%s4503_s3 + $0xf0] sm:$0xff]   ;;  %v281_v38 = vand.u32 15, %v241_v28  ;;  %vm3408_vm5 = vcmp.le.s32.totalorder %v279_v20, 8  ;;  %v2561_v41 = vld [vmem:[%s3400_s15] sm:$0xff]   ;;  %vm378_vm13 = vmand %vm338_vm6, %vm3388_vm4 }
  0x16   : > { %v3420_v42 = vld [vmem:[%s4501_s1] ss:$0 sm:$0xff]  ;;  %vm3422_vm7 = vcmp.ge.s32.totalorder %v260_v33, 1  ;;  %vm3426_vm8 = vcmp.ge.s32.totalorder %v261_v34, 1  ;;  %vm3430_vm9 = vcmp.le.s32.totalorder %v260_v33, 8  ;;  %v3207_v46 = vld [vmem:[%s4503_s3 + $0x178] sm:$0xff]   ;;  %vm339_vm10 = vmand %vm3359_vm1, %vm3381_vm3  ;;  %v2562_v47 = vunpack.c.l.bf16 %v2561_v41 }
  0x17   : > { %v2563_v48 = vunpack.c.h.bf16 %v2561_v41  ;;  %vm3441_vm11 = vcmp.le.s32.totalorder %v261_v34, 8  ;;  %vm3445_vm12 = vcmp.ge.s32.totalorder %v280_v36, 1  ;;  %v2650_v51 = vld [vmem:[%s3400_s15 + $0x8] sm:$0xff]   ;;  %v3460_v52 = vld [vmem:[%s4502_s2] ss:$0 sm:$0xff]  ;;  %vm3462_vm14 = vcmp.le.s32.totalorder %v281_v38, 8  ;;  %vm419_vm15 = vmand %vm339_vm10, %vm3408_vm5 }
  0x18   : > { %2673 = vmatpush3.bf16.msra.mxu0 %v3193_v11  ;;  %2955 = vmatpush3.bf16.msra.mxu1 %v3192_v10  ;;  %v2566_v54 = vunpack.c.l.bf16 %v2650_v51  ;;  %v2567_v55 = vunpack.c.h.bf16 %v2650_v51  ;;  %v3208_v56 = vld [vmem:[%s4503_s3 + $0xf8] sm:$0xff]   ;;  %v3472_v58 = vsel %vm378_vm13, 1.0, %v3265_v57  ;;  %v505_v59 = vmul.f32 %v2562_v47, %v3420_v42  ;;  %vm340_vm0 = vmand %vm3422_vm7, %vm3430_vm9  ;;  %v3209_v7 = vld [vmem:[%s4503_s3 + $0x1c0] sm:$0xff]   ;;  %s2347_s21 = sshll.u32 %s4637_s19, 3 }
  0x19   : > { %2674 = vmatprep.subr.bf16.mxu0 %v3194_v12  ;;  %2956 = vmatprep.subr.bf16.mxu1 %v3195_v14  ;;  %v506_v60 = vmul.f32 %v2563_v48, %v3420_v42  ;;  %v3478_v62 = vsel %vm419_vm15, 1.0, %v3265_v57  ;;  %vm341_vm1 = vmand %vm3426_vm8, %vm3441_vm11  ;;  %v262_v4 = vshra.s32 %v242_v61, 4  ;;  %v282_v6 = vand.u32 15, %v242_v61  ;;  %v2651_v12 = vld [vmem:[%s3400_s15 + $0x10] sm:$0xff]   ;;  %v2652_v21 = vld [vmem:[%s3400_s15 + $0x18] sm:$0xff]   ;;  %s235_s24 = scalar_lea.vmem %s4505_s5, %s2347_s21 }
  0x1a   : > { %v507_v63 = vmul.f32 %v2566_v54, %v3420_v42  ;;  %v508_v0 = vmul.f32 %v2567_v55, %v3420_v42  ;;  %v532_v2 = vadd.f32 %v3460_v52, %v505_v59  ;;  %vm380_vm2 = vmand %vm340_vm0, %vm3445_vm12  ;;  %v263_v10 = vshra.s32 %v243_v1, 4  ;;  %v3211_v22 = vld [vmem:[%s4503_s3 + $0x40] sm:$0xff]   ;;  %v3214_v51 = vld [vmem:[%s4503_s3 + $0x188] sm:$0xff]  }
  0x1b   : > { %v533_v3 = vadd.f32 %v3460_v52, %v506_v60  ;;  %v283_v11 = vand.u32 15, %v243_v1  ;;  %vm421_vm3 = vmand %vm341_vm1, %vm3462_vm14  ;;  %v3504_v15 = vsel %vm380_vm2, 1.0, %v3265_v57  ;;  %vm3506_vm4 = vcmp.ge.s32.totalorder %v262_v4, 1  ;;  %v3210_v33 = vld [vmem:[%s4503_s3 + $0x180] sm:$0xff]   ;;  %v2655_v59 = vld [vmem:[%s3400_s15 + $0x30] sm:$0xff]  }
  0x1c   : > { %2675 = vmatpush3.bf16.msra.mxu0 %v3196_v16  ;;  %2957 = vmatpush3.bf16.msra.mxu1 %v3195_v14  ;;  %v534_v8 = vadd.f32 %v3460_v52, %v507_v63  ;;  %v535_v9 = vadd.f32 %v3460_v52, %v508_v0  ;;  %v552_v13 = vmax.f32 %v532_v2, 0.0  ;;  %vm3513_vm5 = vcmp.ge.s32.totalorder %v263_v10, 1  ;;  %v2653_v50 = vld [vmem:[%s3400_s15 + $0x20] sm:$0xff]  }
  0x1d   : > { %2676 = vmatprep.subr.bf16.mxu0 %v3197_v17  ;;  %2958 = vmatprep.subr.bf16.mxu1 %v3198_v19  ;;  %v553_v14 = vmax.f32 %v533_v3, 0.0  ;;  %v3511_v17 = vsel %vm421_vm3, 1.0, %v3265_v57  ;;  %vm3523_vm6 = vcmp.le.s32.totalorder %v262_v4, 8  ;;  %vm3527_vm7 = vcmp.le.s32.totalorder %v263_v10, 8 }
  0x1e   : > { %v554_v18 = vmax.f32 %v534_v8, 0.0  ;;  %vm342_vm8 = vmand %vm3506_vm4, %vm3523_vm6  ;;  %vm362_vm9 = vcmp.ge.s32.totalorder %v282_v6, 1  ;;  %vm3537_vm10 = vcmp.le.s32.totalorder %v283_v11, 8  ;;  %v2571_v32 = vunpack.c.h.bf16 %v2651_v12  ;;  %v3212_v6 = vld [vmem:[%s4503_s3] sm:$0xff]   ;;  %v3215_v11 = vld [vmem:[%s4503_s3 + $0x48] sm:$0xff]  }
  0x1f   : > { %v573_v24 = vmul.f32 %v553_v14, %v3478_v62  ;;  %vm343_vm11 = vmand %vm3513_vm5, %vm3527_vm7  ;;  %v244_v34 = vadd.s32 48, %v3317_v5  ;;  %v245_v36 = vadd.s32 56, %v3317_v5  ;;  %v2575_v38 = vunpack.c.h.bf16 %v2652_v21 }
  0x20   : > { %2677 = vmatpush3.bf16.msra.mxu0 %v3199_v23  ;;  %2959 = vmatpush3.bf16.msra.mxu1 %v3198_v19  ;;  %v555_v19 = vmax.f32 %v535_v9, 0.0  ;;  %v572_v23 = vmul.f32 %v552_v13, %v3472_v58  ;;  %vm382_vm12 = vmand %vm342_vm8, %vm362_vm9  ;;  %v510_v43 = vmul.f32 %v2571_v32, %v3420_v42  ;;  %v246_v1 = vadd.s32 64, %v3317_v5 }
  0x21   : > { %2678 = vmatprep.subr.bf16.mxu0 %v3200_v25  ;;  %2960 = vmatprep.subr.bf16.mxu1 %v3201_v27  ;;  %vm423_vm13 = vmand %vm343_vm11, %vm3537_vm10  ;;  %v3561_v40 = vsel %vm382_vm12, 1.0, %v3265_v57  ;;  %v264_v44 = vshra.s32 %v244_v34, 4  ;;  %v265_v47 = vshra.s32 %v245_v36, 4  ;;  %v284_v48 = vand.u32 15, %v244_v34  ;;  %v3738_v25 = vld [vmem:[%s3400_s15 + $0x38] sm:$0xff]  }
  0x22   : > { %v575_v28 = vmul.f32 %v555_v19, %v3511_v17  ;;  %v3541_v30 = vpack.c.bf16 %v573_v24, %v572_v23  ;;  %v285_v49 = vand.u32 15, %v245_v36  ;;  %v537_v54 = vadd.f32 %v3460_v52, %v510_v43  ;;  %v3220_v23 = vld [vmem:[%s4503_s3 + $0x1d0] sm:$0xff]  }
  0x23   : > { %vm304_vm14 = vcmp.ge.s32.totalorder %v264_v44, 1  ;;  %vm324_vm15 = vcmp.le.s32.totalorder %v264_v44, 8  ;;  %vm3577_vm0 = vcmp.ge.s32.totalorder %v265_v47, 1  ;;  %vm3581_vm1 = vcmp.le.s32.totalorder %v265_v47, 8 }
  0x24   : > { %2679 = vmatpush3.bf16.msra.mxu0 %v3202_v29  ;;  %2961 = vmatpush3.bf16.msra.mxu1 %v3201_v27  ;;  %v574_v27 = vmul.f32 %v554_v18, %v3504_v15  ;;  %vm344_vm2 = vmand %vm304_vm14, %vm324_vm15  ;;  %vm364_vm3 = vcmp.ge.s32.totalorder %v284_v48, 1  ;;  %vm3585_vm4 = vcmp.le.s32.totalorder %v285_v49, 8  ;;  %v557_v61 = vmax.f32 %v537_v54, 0.0  ;;  %v3616_v18 = vld [vmem:[%s3400_s15 + $0x28] sm:$0xff]  }
  0x25   : > { %2680 = vmatprep.subr.bf16.mxu0 %v3203_v31  ;;  %2962 = vmatprep.subr.bf16.mxu1 %v3204_v35  ;;  %v2570_v31 = vunpack.c.l.bf16 %v2651_v12  ;;  %vm345_vm5 = vmand %vm3577_vm0, %vm3581_vm1  ;;  %v512_v0 = vmul.f32 %v2575_v38, %v3420_v42  ;;  %v247_v2 = vadd.s32 72, %v3317_v5  ;;  %v2578_v3 = vunpack.c.l.bf16 %v2653_v50 }
  0x26   : > { %1036 = vmatprep.mubr.bf16.mxu0 %v3541_v30  ;;  %vm384_vm6 = vmand %vm344_vm2, %vm364_vm3  ;;  %v2579_v4 = vunpack.c.h.bf16 %v2653_v50  ;;  %v266_v14 = vshra.s32 %v246_v1, 4  ;;  %v248_v38 = vadd.s32 80, %v3317_v5  ;;  %v2583_v43 = vunpack.c.h.bf16 %v3616_v18 }
  0x27   : > { %v509_v41 = vmul.f32 %v2570_v31, %v3420_v42  ;;  %vm425_vm7 = vmand %vm345_vm5, %vm3585_vm4  ;;  %v3605_v9 = vsel %vm384_vm6, 1.0, %v3265_v57  ;;  %v539_v13 = vadd.f32 %v3460_v52, %v512_v0  ;;  %v267_v16 = vshra.s32 %v247_v2, 4  ;;  %v3223_v31 = vld [vmem:[%s4503_s3 + $0x60] sm:$0xff]  }
  0x28   : > { %2681 = vmatpush3.bf16.msra.mxu0 %v3205_v37  ;;  %2963 = vmatpush3.bf16.msra.mxu1 %v3204_v35  ;;  %v3551_v35 = vpack.c.bf16 %v575_v28, %v574_v27  ;;  %v2574_v37 = vunpack.c.l.bf16 %v2652_v21  ;;  %v3612_v12 = vsel %vm425_vm7, 1.0, %v3265_v57  ;;  %v286_v21 = vand.u32 15, %v246_v1  ;;  %v3216_v28 = vld [vmem:[%s4503_s3 + $0x8] sm:$0xff]  }
  0x29   : > { %2682 = vmatprep.subr.bf16.mxu0 %v3206_v39  ;;  %2964 = vmatprep.subr.bf16.mxu1 %v3207_v46  ;;  %v3213_v39 = vld [vmem:[%s4503_s3 + $0x1c8] sm:$0xff]   ;;  %v536_v53 = vadd.f32 %v3460_v52, %v509_v41  ;;  %v559_v24 = vmax.f32 %v539_v13, 0.0  ;;  %vm3624_vm8 = vcmp.ge.s32.totalorder %v266_v14, 1  ;;  %vm3628_vm9 = vcmp.ge.s32.totalorder %v267_v16, 1  ;;  %v3221_v13 = vld [vmem:[%s4503_s3 + $0x18] sm:$0xff]  }
  0x2a   : > { %2966 = vmatprep.mubr.bf16.mxu1 %v3551_v35  ;;  %v511_v63 = vmul.f32 %v2574_v37, %v3420_v42  ;;  %vm3632_vm10 = vcmp.le.s32.totalorder %v266_v14, 8  ;;  %vm3641_vm11 = vcmp.le.s32.totalorder %v267_v16, 8  ;;  %v513_v36 = vmul.f32 %v2578_v3, %v3420_v42 }
  0x2b   : > { %v556_v60 = vmax.f32 %v536_v53, 0.0  ;;  %vm346_vm12 = vmand %vm3624_vm8, %vm3632_vm10  ;;  %v579_v34 = vmul.f32 %v559_v24, %v3612_v12  ;;  %v514_v37 = vmul.f32 %v2579_v4, %v3420_v42  ;;  %v2582_v41 = vunpack.c.l.bf16 %v3616_v18 }
  0x2c   : > { %2683 = vmatpush3.bf16.msra.mxu0 %v3208_v56  ;;  %2965 = vmatpush3.bf16.msra.mxu1 %v3207_v46  ;;  %v3568_v46 = vsel %vm423_vm13, 1.0, %v3265_v57  ;;  %v538_v10 = vadd.f32 %v3460_v52, %v511_v63  ;;  %vm366_vm13 = vcmp.ge.s32.totalorder %v286_v21, 1  ;;  %vm347_vm15 = vmand %vm3628_vm9, %vm3641_vm11  ;;  %v3669_v44 = vadd.s32 96, %v3317_v5 }
  0x2d   : > { %2856 = vmatprep.subr.bf16.mxu0 %v3209_v7  ;;  %2762 = vmatprep.subr.bf16.mxu1 %v3211_v22  ;;  %v576_v7 = vmul.f32 %v556_v60, %v3561_v40  ;;  %v577_v8 = vmul.f32 %v557_v61, %v3568_v46  ;;  %v287_v22 = vand.u32 15, %v247_v2  ;;  %vm386_vm0 = vmand %vm346_vm12, %vm366_vm13  ;;  %v540_v49 = vadd.f32 %v3460_v52, %v513_v36  ;;  %v3218_v60 = vld [vmem:[%s4503_s3 + $0x10] sm:$0xff]   ;;  %v3219_v2 = vld [vmem:[%s4503_s3 + $0x58] sm:$0xff]  }
  0x2e   : > { %v558_v20 = vmax.f32 %v538_v10, 0.0  ;;  %v3676_v48 = vsel %vm386_vm0, 1.0, %v3265_v57  ;;  %v541_v50 = vadd.f32 %v3460_v52, %v514_v37  ;;  %v268_v54 = vshra.s32 %v248_v38, 4  ;;  %v3224_v37 = vld [vmem:[%s4503_s3 + $0x20] sm:$0xff]  }
  0x2f   : > { %1037 = vmatmul.mubr.bf16.vlgmr.msra.gmra.mrb[0].mxu0 %v3266_v45  ;;  %v3618_v19 = vpack.c.bf16 %v577_v8, %v576_v7  ;;  %vm3649_vm14 = vcmp.le.s32.totalorder %v287_v22, 8  ;;  %v288_v56 = vand.u32 15, %v248_v38  ;;  %v560_v61 = vmax.f32 %v540_v49, 0.0  ;;  %v3226_v7 = vld [vmem:[%s4503_s3 + $0x28] sm:$0xff]  }
  0x30   : > { %2857 = vmatpush3.bf16.msra.mxu0 %v3210_v33  ;;  %1044 = vmatprep.mubr.bf16.mxu0 %v3551_v35  ;;  %v578_v29 = vmul.f32 %v558_v20, %v3605_v9  ;;  %v3217_v33 = vld [vmem:[%s4503_s3 + $0x50] sm:$0xff]   ;;  %vm427_vm1 = vmand %vm347_vm15, %vm3649_vm14  ;;  %v561_v63 = vmax.f32 %v541_v50, 0.0  ;;  %v515_v1 = vmul.f32 %v2582_v41, %v3420_v42  ;;  %vm3695_vm2 = vcmp.ge.s32.totalorder %v268_v54, 1 }
  0x31   : > { %2858 = vmatprep.subr.bf16.mxu0 %v3213_v39  ;;  %2967 = vmatmul.mubr.bf16.vlgmr.msra.gmra.mrb[0].mxu1 %v3618_v19  ;;  %v249_v39 = vadd.s32 88, %v3317_v5  ;;  %v3684_v53 = vsel %vm427_vm1, 1.0, %v3265_v57  ;;  %vm3703_vm4 = vcmp.le.s32.totalorder %v268_v54, 8  ;;  %v580_v8 = vmul.f32 %v560_v61, %v3676_v48 }
  0x32   : > { %2763 = vmatpush3.bf16.msra.mxu1 %v3212_v6  ;;  %v3671_v47 = vpack.c.bf16 %v579_v34, %v578_v29  ;;  %v581_v10 = vmul.f32 %v561_v63, %v3684_v53  ;;  %vm348_vm6 = vmand %vm3695_vm2, %vm3703_vm4  ;;  %vm368_vm7 = vcmp.ge.s32.totalorder %v288_v56, 1  ;;  %v516_v14 = vmul.f32 %v2583_v43, %v3420_v42 }
  0x33   : > { %2764 = vmatprep.subr.bf16.mxu1 %v3215_v11  ;;  %v269_v55 = vshra.s32 %v249_v39, 4  ;;  %v289_v0 = vand.u32 15, %v249_v39  ;;  %v542_v16 = vadd.f32 %v3460_v52, %v515_v1  ;;  %v251_v18 = vadd.s32 104, %v3317_v5  ;;  %vm388_vm10 = vmand %vm348_vm6, %vm368_vm7 }
  0x34   : > { %2859 = vmatpush3.bf16.msra.mxu0 %v3214_v51  ;;  %v3222_v51 = vld [vmem:[%s4503_s3 + $0x190] sm:$0xff]   ;;  %2970 = vmatprep.mubr.bf16.mxu1 %v3671_v47  ;;  %v270_v20 = vshra.s32 %v3669_v44, 4  ;;  %v3734_v21 = vpack.c.bf16 %v581_v10, %v580_v8  ;;  %v290_v22 = vand.u32 15, %v3669_v44  ;;  %v2587_v24 = vunpack.c.h.bf16 %v2655_v59  ;;  %v3227_v44 = vld [vmem:[%s4503_s3 + $0x1d8] sm:$0xff]  }
  0x35   : > { %2860 = vmatprep.subr.bf16.mxu0 %v3220_v23  ;;  %vm3699_vm3 = vcmp.ge.s32.totalorder %v269_v55, 1  ;;  %vm3707_vm5 = vcmp.le.s32.totalorder %v269_v55, 8  ;;  %vm3717_vm8 = vcmp.le.s32.totalorder %v289_v0, 8  ;;  %v2586_v23 = vunpack.c.l.bf16 %v2655_v59 }
  0x36   : > { %2765 = vmatpush3.bf16.msra.mxu1 %v3216_v28  ;;  %vm349_vm9 = vmand %vm3699_vm3, %vm3707_vm5  ;;  %v3743_v26 = vsel %vm388_vm10, 1.0, %v3265_v57  ;;  %v543_v27 = vadd.f32 %v3460_v52, %v516_v14  ;;  %v562_v28 = vmax.f32 %v542_v16, 0.0  ;;  %v271_v29 = vshra.s32 %v251_v18, 4 }
  0x37   : > { %1045 = vmatmul.mubr.bf16.gmra.mrb[4].mxu0 %v3541_v30  ;;  %2766 = vmatprep.subr.bf16.mxu1 %v3217_v33  ;;  %vm429_vm11 = vmand %vm349_vm9, %vm3717_vm8  ;;  %v291_v33 = vand.u32 15, %v251_v18  ;;  %vm3753_vm12 = vcmp.ge.s32.totalorder %v270_v20, 1  ;;  %vm3757_vm13 = vcmp.le.s32.totalorder %v270_v20, 8  ;;  %vm370_vm2 = vcmp.ge.s32.totalorder %v290_v22, 1  ;;  %v2657_v22 = vld [vmem:[%s3400_s15 + $0x40] sm:$0xff]  }
  0x38   : > { %1052 = vmatprep.mubr.bf16.mxu0 %v3618_v19  ;;  %2861 = vmatpush3.bf16.msra.mxu0 %v3222_v51  ;;  %v3751_v32 = vsel %vm429_vm11, 1.0, %v3265_v57  ;;  %v563_v38 = vmax.f32 %v543_v27, 0.0  ;;  %v582_v39 = vmul.f32 %v562_v28, %v3743_v26  ;;  %vm3765_vm14 = vcmp.ge.s32.totalorder %v271_v29, 1  ;;  %vm350_vm0 = vmand %vm3753_vm12, %vm3757_vm13  ;;  %v3225_v51 = vld [vmem:[%s4503_s3 + $0x68] sm:$0xff]   ;;  %v3230_v27 = vld [vmem:[%s4503_s3 + $0x30] sm:$0xff]  }
  0x39   : > { %2971 = vmatmul.mubr.bf16.gmra.mrb[4].mxu1 %v3734_v21  ;;  %vm3769_vm15 = vcmp.le.s32.totalorder %v271_v29, 8  ;;  %vm411_vm3 = vcmp.le.s32.totalorder %v291_v33, 8  ;;  %v517_v49 = vmul.f32 %v2586_v23, %v3420_v42  ;;  %v518_v50 = vmul.f32 %v2587_v24, %v3420_v42  ;;  %vm390_vm4 = vmand %vm350_vm0, %vm370_vm2  ;;  %2862 = vmatprep.subr.bf16.mxu0 %v3227_v44  ;;  %v3229_v23 = vld [vmem:[%s4503_s3 + $0x70] sm:$0xff]  }
  0x3a   : > { %2767 = vmatpush3.bf16.msra.mxu1 %v3218_v60  ;;  %vm351_vm1 = vmand %vm3765_vm14, %vm3769_vm15  ;;  %v583_v54 = vmul.f32 %v563_v38, %v3751_v32  ;;  %v252_v55 = vadd.s32 112, %v3317_v5  ;;  %v253_v56 = vadd.s32 120, %v3317_v5  ;;  %v2590_v59 = vunpack.c.l.bf16 %v3738_v25  ;;  %v3228_v60 = vld [vmem:[%s4503_s3 + $0x198] sm:$0xff]  }
  0x3b   : > { %2768 = vmatprep.subr.bf16.mxu1 %v3219_v2  ;;  %vm431_vm5 = vmand %vm351_vm1, %vm411_vm3  ;;  %v3802_v61 = vsel %vm390_vm4, 1.0, %v3265_v57  ;;  %v544_v63 = vadd.f32 %v3460_v52, %v517_v49  ;;  %v545_v0 = vadd.f32 %v3460_v52, %v518_v50  ;;  %v2591_v1 = vunpack.c.h.bf16 %v3738_v25  ;;  %v3867_v50 = vld [vmem:[%s3400_s15 + $0x48] sm:$0xff]  }
  0x3c   : > { %v3808_v2 = vpack.c.bf16 %v583_v54, %v582_v39  ;;  %v3811_v3 = vsel %vm431_vm5, 1.0, %v3265_v57  ;;  %v272_v4 = vshra.s32 %v252_v55, 4  ;;  %v273_v6 = vshra.s32 %v253_v56, 4  ;;  %2863 = vmatpush3.bf16.msra.mxu0 %v3228_v60  ;;  %v3231_v39 = vld [vmem:[%s4503_s3 + $0x78] sm:$0xff]  }
  0x3d   : > { %v564_v8 = vmax.f32 %v544_v63, 0.0  ;;  %v565_v10 = vmax.f32 %v545_v0, 0.0  ;;  %v292_v11 = vand.u32 15, %v252_v55  ;;  %v519_v28 = vmul.f32 %v2590_v59, %v3420_v42  ;;  %v3232_v60 = vld [vmem:[%s4503_s3 + $0x38] sm:$0xff]  }
  0x3e   : > { %2769 = vmatpush3.bf16.msra.mxu1 %v3221_v13  ;;  %v293_v13 = vand.u32 15, %v253_v56  ;;  %2974 = vmatprep.mubr.bf16.mxu1 %v3808_v2  ;;  %vm3818_vm6 = vcmp.ge.s32.totalorder %v272_v4, 1  ;;  %vm3822_vm7 = vcmp.ge.s32.totalorder %v273_v6, 1  ;;  %vm3826_vm8 = vcmp.le.s32.totalorder %v272_v4, 8 }
  0x3f   : > { %1053 = vmatmul.mubr.bf16.gmra.mrb[8].mxu0 %v3551_v35  ;;  %2770 = vmatprep.subr.bf16.mxu1 %v3223_v31  ;;  %vm3830_vm9 = vcmp.le.s32.totalorder %v273_v6, 8  ;;  %v584_v24 = vmul.f32 %v564_v8, %v3802_v61  ;;  %v585_v25 = vmul.f32 %v565_v10, %v3811_v3  ;;  %vm352_vm10 = vmand %vm3818_vm6, %vm3826_vm8  ;;  %vm372_vm11 = vcmp.ge.s32.totalorder %v292_v11, 1  ;;  %v3234_v10 = vld [vmem:[%s4503_s3 + $0x1a0] sm:$0xff]   ;;  %v3235_v11 = vld [vmem:[%s4503_s3 + $0x1e8] sm:$0xff]  }
  0x40   : > { %1060 = vmatprep.mubr.bf16.mxu0 %v3671_v47  ;;  %vm413_vm12 = vcmp.le.s32.totalorder %v293_v13, 8  ;;  %vm353_vm13 = vmand %vm3822_vm7, %vm3830_vm9  ;;  %v520_v29 = vmul.f32 %v2591_v1, %v3420_v42  ;;  %v254_v31 = vadd.s32 128, %v3317_v5  ;;  %v255_v33 = vadd.s32 136, %v3317_v5 }
  0x41   : > { %v3855_v34 = vpack.c.bf16 %v585_v25, %v584_v24  ;;  %vm392_vm14 = vmand %vm352_vm10, %vm372_vm11  ;;  %v2594_v36 = vunpack.c.l.bf16 %v2657_v22  ;;  %v256_v38 = vadd.s32 144, %v3317_v5  ;;  %v546_v43 = vadd.f32 %v3460_v52, %v519_v28  ;;  %v3236_v25 = vld [vmem:[%s4503_s3 + $0x1a8] sm:$0xff]  }
  0x42   : > { %2771 = vmatpush3.bf16.msra.mxu1 %v3224_v37  ;;  %v2595_v37 = vunpack.c.h.bf16 %v2657_v22  ;;  %vm433_vm15 = vmand %vm353_vm13, %vm413_vm12  ;;  %v3862_v41 = vsel %vm392_vm14, 1.0, %v3265_v57  ;;  %v547_v44 = vadd.f32 %v3460_v52, %v520_v29  ;;  %v274_v49 = vshra.s32 %v254_v31, 4 }
  0x43   : > { %2772 = vmatprep.subr.bf16.mxu1 %v3225_v51  ;;  %v3233_v51 = vld [vmem:[%s4503_s3 + $0x1e0] sm:$0xff]   ;;  %2975 = vmatmul.mubr.bf16.gmra.mrb[8].mxu1 %v3855_v34  ;;  %v3874_v54 = vsel %vm433_vm15, 1.0, %v3265_v57  ;;  %v275_v55 = vshra.s32 %v255_v33, 4  ;;  %v294_v56 = vand.u32 15, %v254_v31  ;;  %v295_v59 = vand.u32 15, %v255_v33 }
  0x44   : > { %v566_v63 = vmax.f32 %v546_v43, 0.0  ;;  %v567_v0 = vmax.f32 %v547_v44, 0.0  ;;  %vm3880_vm0 = vcmp.ge.s32.totalorder %v274_v49, 1  ;;  %vm3884_vm1 = vcmp.le.s32.totalorder %v274_v49, 8  ;;  %2864 = vmatprep.subr.bf16.mxu0 %v3233_v51  ;;  %v3952_v49 = vld [vmem:[%s4503_s3 + $0x80] sm:$0xff]   ;;  %v3238_v51 = vld [vmem:[%s4503_s3 + $0x1f0] sm:$0xff]  }
  0x45   : > { %vm3889_vm2 = vcmp.ge.s32.totalorder %v275_v55, 1  ;;  %vm3893_vm3 = vcmp.le.s32.totalorder %v275_v55, 8  ;;  %vm354_vm4 = vmand %vm3880_vm0, %vm3884_vm1  ;;  %vm374_vm5 = vcmp.ge.s32.totalorder %v294_v56, 1  ;;  %vm3901_vm6 = vcmp.le.s32.totalorder %v295_v59, 8  ;;  %2865 = vmatpush3.bf16.msra.mxu0 %v3234_v10 }
  0x46   : > { %2773 = vmatpush3.bf16.msra.mxu1 %v3226_v7  ;;  %v586_v13 = vmul.f32 %v566_v63, %v3862_v41  ;;  %v587_v14 = vmul.f32 %v567_v0, %v3874_v54  ;;  %vm355_vm7 = vmand %vm3889_vm2, %vm3893_vm3  ;;  %v521_v16 = vmul.f32 %v2594_v36, %v3420_v42  ;;  %v522_v18 = vmul.f32 %v2595_v37, %v3420_v42  ;;  %v3239_v63 = vld [vmem:[%s4503_s3 + $0x1b0] sm:$0xff]  }
  0x47   : > { %1061 = vmatmul.mubr.bf16.gmra.mrb[12].mxu0 %v3618_v19  ;;  %2774 = vmatprep.subr.bf16.mxu1 %v3229_v23  ;;  %vm394_vm8 = vmand %vm354_vm4, %vm374_vm5  ;;  %v257_v20 = vadd.s32 152, %v3317_v5  ;;  %v276_v22 = vshra.s32 %v256_v38, 4  ;;  %v296_v23 = vand.u32 15, %v256_v38  ;;  %v2598_v24 = vunpack.c.l.bf16 %v3867_v50 }
  0x48   : > { %1068 = vmatprep.mubr.bf16.mxu0 %v3734_v21  ;;  %vm435_vm9 = vmand %vm355_vm7, %vm3901_vm6  ;;  %v3929_v28 = vsel %vm394_vm8, 1.0, %v3265_v57  ;;  %v548_v29 = vadd.f32 %v3460_v52, %v521_v16  ;;  %v549_v5 = vadd.f32 %v3460_v52, %v522_v18  ;;  %2866 = vmatprep.subr.bf16.mxu0 %v3235_v11  ;;  %vm602_vm3 = vsmask.f32 256 }
  0x49   : > { %4603 = vst [vmem:[#allocation2_spill] sm:$0xff] %v3929_v28  ;;  %v3934_v31 = vsel %vm435_vm9, 1.0, %v3265_v57  ;;  %v277_v33 = vshra.s32 %v257_v20, 4  ;;  %v297_v36 = vand.u32 15, %v257_v20  ;;  %vm3936_vm10 = vcmp.ge.s32.totalorder %v276_v22, 1  ;;  %2867 = vmatpush3.bf16.msra.mxu0 %v3236_v25 }
  0x4a   : > { %2775 = vmatpush3.bf16.msra.mxu1 %v3230_v27  ;;  %v3924_v27 = vpack.c.bf16 %v587_v14, %v586_v13  ;;  %4604 = vst [vmem:[#allocation3_spill] sm:$0xff] %v3934_v31  ;;  %v568_v38 = vmax.f32 %v548_v29, 0.0  ;;  %vm3941_vm11 = vcmp.le.s32.totalorder %v276_v22, 8  ;;  %vm3945_vm12 = vcmp.ge.s32.totalorder %v296_v23, 1  ;;  %2868 = vmatprep.subr.bf16.mxu0 %v3238_v51  ;;  %v3241_v14 = vld [vmem:[%s4503_s3 + $0x1f8] sm:$0xff]   ;;  %v4026_v29 = vld [vmem:[%s4503_s3 + $0x200] sm:$0xff]  }
  0x4b   : > { %2776 = vmatprep.subr.bf16.mxu1 %v3231_v39  ;;  %v569_v39 = vmax.f32 %v549_v5, 0.0  ;;  %vm3957_vm13 = vcmp.ge.s32.totalorder %v277_v33, 1  ;;  %vm3961_vm14 = vcmp.le.s32.totalorder %v277_v33, 8  ;;  %vm356_vm15 = vmand %vm3936_vm10, %vm3941_vm11  ;;  %vm3969_vm0 = vcmp.le.s32.totalorder %v297_v36, 8 }
  0x4c   : > { %2978 = vmatprep.mubr.bf16.mxu1 %v3924_v27  ;;  %v588_v0 = vmul.f32 %v568_v38, %v3929_v28  ;;  %vm357_vm1 = vmand %vm3957_vm13, %vm3961_vm14  ;;  %v523_v4 = vmul.f32 %v2598_v24, %v3420_v42  ;;  %v4509_v6 = vshrl.u32 %v3541_v30, 16  ;;  %v614_v10 = vshll.u32 %v3541_v30, 16 }
  0x4d   : > { %v589_v1 = vmul.f32 %v569_v39, %v3934_v31  ;;  %vm396_vm2 = vmand %vm356_vm15, %vm3945_vm12  ;;  %vm705_vm5 = vcmask 1040384   ;;  %2869 = vmatpush3.bf16.msra.mxu0 %v3239_v63  ;;  %v4507_v22 = vshrl.u32 %v3551_v35, 16  ;;  %v4029_v5 = vrot.slane %v3266_v45, 7 }
  0x4e   : > { %2777 = vmatpush3.bf16.msra.mxu1 %v3232_v60  ;;  %v2599_v60 = vunpack.c.h.bf16 %v3867_v50  ;;  %vm437_vm4 = vmand %vm357_vm1, %vm3969_vm0  ;;  %v550_v8 = vadd.f32 %v3460_v52, %v523_v4  ;;  %v3998_v11 = vsel %vm396_vm2, 1.0, %v3265_v57  ;;  %v613_v13 = vrot.slane %v4509_v6, 7  ;;  %2870 = vmatprep.subr.bf16.mxu0 %v3241_v14  ;;  %v3240_v14 = vld [vmem:[%s4503_s3 + $0x88] sm:$0xff]  }
  0x4f   : > { %1069 = vmatmul.mubr.bf16.gmra.mrb[16].mxu0 %v3671_v47  ;;  %2986 = vmatprep.subr.bf16.mxu1 %v3952_v49  ;;  %v3991_v7 = vpack.c.bf16 %v589_v1, %v588_v0  ;;  %4617 = vst [vmem:[#allocation4_spill] sm:$0xff] %v3998_v11  ;;  %v4008_v16 = vsel %vm437_vm4, 1.0, %v3265_v57  ;;  %vm4018_vm6 = vmand %vm705_vm5, %vm602_vm3  ;;  %v4034_v36 = vrot.slane %v4507_v22, 7  ;;  %v4508_v37 = vshll.u32 %v3551_v35, 16 }
  0x50   : > { %1076 = vmatprep.mubr.bf16.mxu0 %v3808_v2  ;;  %v524_v50 = vmul.f32 %v2599_v60, %v3420_v42  ;;  %4618 = vst [vmem:[#allocation5_spill] sm:$0xff] %v4008_v16  ;;  %v570_v18 = vmax.f32 %v550_v8, 0.0  ;;  %v616_v24 = vor.u32 %v614_v10, %v613_v13  ;;  %v4041_v39 = vrot.slane %v3266_v45, 1 }
  0x51   : > { %2979 = vmatmul.mubr.bf16.gmra.mrb[12].mxu1 %v3991_v7  ;;  %v4044_v43 = vrot.slane %v614_v10, 1  ;;  %v4506_v44 = vshrl.u32 %v3618_v19, 16  ;;  %v707_v51 = vsel %vm4018_vm6, 0, %v4029_v5  ;;  %v4053_v55 = vor.u32 %v4508_v37, %v4034_v36 }
  0x52   : > { %v551_v42 = vadd.f32 %v3460_v52, %v524_v50  ;;  %v3242_v52 = vld [vmem:[%s4503_s3 + $0x1b8] sm:$0xff]   ;;  %v590_v23 = vmul.f32 %v570_v18, %v3998_v11  ;;  %v708_v38 = vsel %vm4018_vm6, 0, %v616_v24  ;;  %v4514_v56 = vshll.u32 %v3618_v19, 16 }
  0x53   : > { %2871 = vmatpush3.bf16.msra.mxu0 %v3242_v52  ;;  %v4516_v59 = vshrl.u32 %v3671_v47, 16  ;;  %v667_v60 = vshrl.u32 %v3924_v27, 16  ;;  %v670_v63 = vshll.u32 %v3924_v27, 16  ;;  %vm710_vm7 = vsmask.f32 7424 }
  0x54   : > { %v571_v20 = vmax.f32 %v551_v42, 0.0  ;;  %3022 = vmatprep.subr.bf16.mxu0 %v4026_v29  ;;  %v4063_v0 = vrot.slane %v4506_v44, 7  ;;  %v675_v4 = vshrl.u32 %v3991_v7, 16  ;;  %v678_v50 = vshll.u32 %v3991_v7, 16 }
  0x55   : > { %v669_v1 = vrot.slane %v667_v60, 7  ;;  %v4070_v8 = vsel %vm602_vm3, %v613_v13, %v4053_v55  ;;  %v4511_v10 = vshll.u32 %v3855_v34, 16  ;;  %v3243_v13 = vld [vmem:[%s4503_s3 + $0x90] sm:$0xff]   ;;  %vm758_vm8 = vcmask 1047552  }
  0x56   : > { %v591_v25 = vmul.f32 %v571_v20, %v4008_v16  ;;  %v677_v52 = vrot.slane %v675_v4, 7  ;;  %v734_v16 = vrot.slane %v670_v63, 1  ;;  %v737_v11 = vrot.slane %v678_v50, 1  ;;  %vm4123_vm9 = vmand %vm758_vm8, %vm710_vm7 }
  0x57   : > { %1077 = vmatmul.mubr.bf16.gmra.mrb[20].mxu0 %v3734_v21  ;;  %v672_v20 = vor.u32 %v670_v63, %v669_v1  ;;  %vm2251_vm10 = vcmask 1041408  }
  0x58   : > { %1084 = vmatprep.mubr.bf16.mxu0 %v3855_v34  ;;  %v601_v33 = vpack.c.bf16 %v591_v25, %v590_v23  ;;  %v624_v25 = vsel %vm602_vm3, %v4029_v5, %v616_v24  ;;  %v680_v37 = vor.u32 %v678_v50, %v677_v52  ;;  %v4093_v24 = vrot.slane %v4511_v10, 1 }
  0x5a   : > { %2982 = vmatprep.mubr.bf16.mxu1 %v601_v33  ;;  %v683_v42 = vshrl.u32 %v601_v33, 16  ;;  %v686_v23 = vshll.u32 %v601_v33, 16  ;;  %v4105_v6 = vsel %vm602_vm3, %v669_v1, %v680_v37  ;;  %v4118_v37 = vor.u32 %v737_v11, %v675_v4 }
  0x5b   : > { %2983 = vmatmul.mubr.bf16.gmra.mrb[16].mxu1 %v3266_v45  ;;  %v659_v45 = vshrl.u32 %v3855_v34, 16  ;;  %v762_v1 = vsel %vm4123_vm9, %v4041_v39, 0  ;;  %v4625_v4 = vshll.u32 %v3671_v47, 16 }
  0x5c   : > { %1406 = vmatprep.mubr.bf16.mxu1 %v708_v38  ;;  %v685_v44 = vrot.slane %v683_v42, 7  ;;  %v740_v31 = vrot.slane %v686_v23, 1 }
  0x5d   : > { %v4076_v18 = vrot.slane %v659_v45, 7  ;;  %v733_v10 = vor.u32 %v4093_v24, %v659_v45 }
  0x5e   : > { %v688_v38 = vor.u32 %v686_v23, %v685_v44  ;;  %v4120_v45 = vor.u32 %v740_v31, %v683_v42  ;;  %v3247_v42 = vld [vmem:[%s4503_s3 + $0xa0] sm:$0xff]   ;;  %v4627_v23 = vshll.u32 %v3618_v19, 16 }
  0x5f   : > { %1085 = vmatmul.mubr.bf16.gmra.mrb[24].mxu0 %v3808_v2  ;;  %v4086_v22 = vsel %vm602_vm3, %v4076_v18, %v672_v20  ;;  %v4102_v20 = vrot.slane %v4516_v59, 7  ;;  %v736_v59 = vor.u32 %v734_v16, %v667_v60  ;;  %v4116_v63 = vsel %vm710_vm7, %v733_v10, %v734_v16 }
  0x60   : > { %1092 = vmatprep.mubr.bf16.mxu0 %v3924_v27  ;;  %v4113_v28 = vsel %vm602_vm3, %v677_v52, %v688_v38  ;;  %v4624_v16 = vshll.u32 %v3551_v35, 16  ;;  %v643_v10 = vshrl.u32 %v3734_v21, 16 }
  0x61   : > { %v4138_v60 = vsel %vm710_vm7, %v736_v59, %v737_v11  ;;  %v760_v11 = vsel %vm4123_vm9, %v4118_v37, 0  ;;  %v4159_v59 = vsel %vm710_vm7, %v4120_v45, %v4041_v39  ;;  %v640_v50 = vor.u32 %v4625_v4, %v4102_v20 }
  0x63   : > { %1407 = vmatmul.mubr.bf16.vlgmr.msra.gmra.mrb[20].mxu1 %v707_v51  ;;  %v632_v51 = vor.u32 %v4514_v56, %v4063_v0  ;;  %v4621_v56 = vshrl.u32 %v3541_v30, 16  ;;  %v4129_v30 = vsel %vm602_vm3, %v685_v44, %v4029_v5  ;;  %v3245_v5 = vld [vmem:[%s4503_s3 + $0x98] sm:$0xff]   ;;  %v761_v44 = vsel %vm4123_vm9, %v4120_v45, 0 }
  0x64   : > { %1414 = vmatprep.mubr.bf16.mxu1 %v4070_v8  ;;  %2987 = vmatpush3.bf16.msra.mxu1 %v3952_v49  ;;  %v4177_v38 = vsel %vm602_vm3, %v4063_v0, %v640_v50  ;;  %v722_v50 = vrot.slane %v4625_v4, 1 }
  0x65   : > { %2988 = vmatprep.subr.bf16.mxu1 %v3240_v14  ;;  %v715_v49 = vor.u32 %v4044_v43, %v4621_v56  ;;  %v4133_v56 = vsel %vm602_vm3, %v4034_v36, %v632_v51  ;;  %v4148_v36 = vsel %vm710_vm7, %v4118_v37, %v740_v31  ;;  %v646_v51 = vshll.u32 %v3734_v21, 16  ;;  %v3256_v21 = vld [vmem:[%s4503_s3 + $0x238] sm:$0xff]  }
  0x67   : > { %1093 = vmatmul.mubr.bf16.gmra.mrb[28].mxu0 %v3855_v34 }
  0x68   : > { %1100 = vmatprep.mubr.bf16.mxu0 %v3991_v7  ;;  %2989 = vmatpush3.bf16.msra.mxu1 %v3240_v14  ;;  %v4626_v14 = vshrl.u32 %v3551_v35, 16  ;;  %v714_v35 = vsel %vm710_vm7, %v4041_v39, %v4044_v43  ;;  %v4628_v43 = vshrl.u32 %v3618_v19, 16  ;;  %v3252_v19 = vld [vmem:[%s4503_s3 + $0xb8] sm:$0xff]  }
  0x69   : > { %2990 = vmatprep.subr.bf16.mxu1 %v3243_v13 }
  0x6b   : > { %1415 = vmatmul.mubr.bf16.gmra.mrb[24].mxu1 %v624_v25  ;;  %v719_v25 = vrot.slane %v4627_v23, 1  ;;  %v654_v23 = vshll.u32 %v3808_v2, 16 }
  0x6c   : > { %1422 = vmatprep.mubr.bf16.mxu1 %v4133_v56  ;;  %2991 = vmatpush3.bf16.msra.mxu1 %v3243_v13  ;;  %v645_v13 = vrot.slane %v643_v10, 7 }
  0x6d   : > { %2992 = vmatprep.subr.bf16.mxu1 %v3245_v5  ;;  %v728_v4 = vrot.slane %v654_v23, 1 }
  0x6f   : > { %1101 = vmatmul.mubr.bf16.gmra.mrb[32].mxu0 %v3924_v27 }
  0x70   : > { %1108 = vmatprep.mubr.bf16.mxu0 %v601_v33  ;;  %v716_v33 = vrot.slane %v4624_v16, 1  ;;  %2993 = vmatpush3.bf16.msra.mxu1 %v3245_v5  ;;  %v648_v16 = vor.u32 %v646_v51, %v645_v13  ;;  %v721_v5 = vor.u32 %v719_v25, %v4628_v43  ;;  %v4242_v43 = vld [vmem:[%s4503_s3 + $0x220] sm:$0xff]  }
  0x71   : > { %2994 = vmatprep.subr.bf16.mxu1 %v3247_v42 }
  0x72   : > { %v717_v31 = vsel %vm710_vm7, %v715_v49, %v716_v33  ;;  %v718_v52 = vor.u32 %v716_v33, %v4626_v14  ;;  %v4196_v49 = vld [vmem:[%s4503_s3 + $0x208] sm:$0xff]   ;;  %v651_v33 = vshrl.u32 %v3808_v2, 16  ;;  %v4216_v14 = vsel %vm602_vm3, %v4102_v20, %v648_v16  ;;  %v4232_v2 = vld [vmem:[%s4503_s3 + $0x218] sm:$0xff]  }
  0x73   : > { %1423 = vmatmul.mubr.bf16.gmra.mrb[28].mxu1 %v4070_v8  ;;  %v3251_v8 = vld [vmem:[%s4503_s3 + $0xb0] sm:$0xff]   ;;  %v725_v16 = vrot.slane %v646_v51, 1  ;;  %v4630_v51 = vshll.u32 %v3855_v34, 16 }
  0x74   : > { %1430 = vmatprep.mubr.bf16.mxu1 %v4177_v38  ;;  %v4191_v0 = vsel %vm710_vm7, %v718_v52, %v719_v25  ;;  %2995 = vmatpush3.bf16.msra.mxu1 %v3247_v42  ;;  %v4212_v42 = vld [vmem:[%s4503_s3 + $0x210] sm:$0xff]   ;;  %v653_v52 = vrot.slane %v651_v33, 7  ;;  %v4226_v25 = vsel %vm710_vm7, %v721_v5, %v722_v50 }
  0x76   : > { %v656_v20 = vor.u32 %v654_v23, %v653_v52 }
  0x77   : > { %1109 = vmatmul.mubr.bf16.gmra.mrb[36].mxu0 %v3991_v7  ;;  %v3249_v7 = vld [vmem:[%s4503_s3 + $0xa8] sm:$0xff]  }
  0x78   : > { %1825 = vmatprep.mubr.bf16.mxu0 %v717_v31  ;;  %2996 = vmatprep.subr.bf16.mxu1 %v3249_v7  ;;  %v657_v5 = vsel %vm602_vm3, %v645_v13, %v656_v20  ;;  %v664_v13 = vor.u32 %v4630_v51, %v4076_v18  ;;  %v730_v18 = vor.u32 %v728_v4, %v651_v33 }
  0x79   : > { %2997 = vmatpush3.bf16.msra.mxu1 %v3249_v7  ;;  %v4629_v7 = vshrl.u32 %v3671_v47, 16 }
  0x7a   : > { %2998 = vmatprep.subr.bf16.mxu1 %v3251_v8 }
  0x7b   : > { %1431 = vmatmul.mubr.bf16.gmra.mrb[32].mxu1 %v4133_v56 }
  0x7c   : > { %1438 = vmatprep.mubr.bf16.mxu1 %v4216_v14 }
  0x7d   : > { %2999 = vmatpush3.bf16.msra.mxu1 %v3251_v8  ;;  %v727_v8 = vor.u32 %v725_v16, %v643_v10  ;;  %v732_v10 = vsel %vm710_vm7, %v730_v18, %v4093_v24  ;;  %v4631_v24 = vsel %vm4018_vm6, 0, %v4053_v55 }
  0x7e   : > { %3000 = vmatprep.subr.bf16.mxu1 %v3252_v19 }
  0x7f   : > { %1826 = vmatmul.mubr.bf16.vlgmr.msra.gmra.mrb[40].mxu0 %v714_v35  ;;  %v724_v35 = vor.u32 %v722_v50, %v4629_v7  ;;  %v3255_v50 = vld [vmem:[%s4503_s3 + $0x230] sm:$0xff]   ;;  %v729_v34 = vsel %vm710_vm7, %v727_v8, %v728_v4 }
  0x80   : > { %3023 = vmatpush3.bf16.msra.mxu0 %v4026_v29  ;;  %1833 = vmatprep.mubr.bf16.mxu0 %v4191_v0 }
  0x81   : > { %3024 = vmatprep.subr.bf16.mxu0 %v4196_v49  ;;  %3001 = vmatpush3.bf16.msra.mxu1 %v3252_v19  ;;  %v726_v47 = vsel %vm710_vm7, %v724_v35, %v725_v16  ;;  %v665_v19 = vsel %vm602_vm3, %v653_v52, %v664_v13 }
  0x82   : > { %3058 = vmatprep.subr.bf16.mxu1 %v4026_v29 }
  0x83   : > { %1439 = vmatmul.mubr.bf16.gmra.mrb[36].mxu1 %v4177_v38 }
  0x84   : > { %3025 = vmatpush3.bf16.msra.mxu0 %v4196_v49  ;;  %1446 = vmatprep.mubr.bf16.mxu1 %v657_v5 }
  0x85   : > { %3026 = vmatprep.subr.bf16.mxu0 %v4212_v42 }
  0x87   : > { %1834 = vmatmul.mubr.bf16.gmra.mrb[44].mxu0 %v717_v31  ;;  %v3254_v31 = vld [vmem:[%s4503_s3 + $0x228] sm:$0xff]  }
  0x88   : > { %1841 = vmatprep.mubr.bf16.mxu0 %v4226_v25  ;;  %3027 = vmatpush3.bf16.msra.mxu0 %v4212_v42 }
  0x89   : > { %3028 = vmatprep.subr.bf16.mxu0 %v4232_v2 }
  0x8b   : > { %1447 = vmatmul.mubr.bf16.gmra.mrb[40].mxu1 %v4216_v14 }
  0x8c   : > { %3029 = vmatpush3.bf16.msra.mxu0 %v4232_v2  ;;  %1454 = vmatprep.mubr.bf16.mxu1 %v665_v19 }
  0x8d   : > { %3030 = vmatprep.subr.bf16.mxu0 %v4242_v43 }
  0x8f   : > { %1842 = vmatmul.mubr.bf16.gmra.mrb[48].mxu0 %v4191_v0 }
  0x90   : > { %1849 = vmatprep.mubr.bf16.mxu0 %v726_v47  ;;  %3031 = vmatpush3.bf16.msra.mxu0 %v4242_v43 }
  0x91   : > { %3032 = vmatprep.subr.bf16.mxu0 %v3254_v31 }
  0x93   : > { %1455 = vmatmul.mubr.bf16.gmra.mrb[44].mxu1 %v657_v5 }
  0x94   : > { %3033 = vmatpush3.bf16.msra.mxu0 %v3254_v31  ;;  %1462 = vmatprep.mubr.bf16.mxu1 %v4086_v22 }
  0x95   : > { %3034 = vmatprep.subr.bf16.mxu0 %v3255_v50 }
  0x97   : > { %1850 = vmatmul.mubr.bf16.gmra.mrb[52].mxu0 %v4226_v25 }
  0x98   : > { %1857 = vmatprep.mubr.bf16.mxu0 %v729_v34  ;;  %3035 = vmatpush3.bf16.msra.mxu0 %v3255_v50 }
  0x99   : > { %3036 = vmatprep.subr.bf16.mxu0 %v3256_v21 }
  0x9b   : > { %1463 = vmatmul.mubr.bf16.gmra.mrb[48].mxu1 %v665_v19 }
  0x9c   : > { %3037 = vmatpush3.bf16.msra.mxu0 %v3256_v21  ;;  %1470 = vmatprep.mubr.bf16.mxu1 %v4105_v6 }
  0x9f   : > { %1858 = vmatmul.mubr.bf16.gmra.mrb[56].mxu0 %v726_v47 }
  0xa0   : > { %1865 = vmatprep.mubr.bf16.mxu0 %v732_v10 }
  0xa3   : > { %1471 = vmatmul.mubr.bf16.gmra.mrb[52].mxu1 %v4086_v22 }
  0xa4   : > { %1478 = vmatprep.mubr.bf16.mxu1 %v4113_v28 }
  0xa7   : > { %1866 = vmatmul.mubr.bf16.gmra.mrb[60].mxu0 %v729_v34 }
  0xa8   : > { %1873 = vmatprep.mubr.bf16.mxu0 %v4116_v63 }
  0xab   : > { %1479 = vmatmul.mubr.bf16.gmra.mrb[56].mxu1 %v4105_v6 }
  0xac   : > { %3002 = vmatprep.mubr.bf16.mxu1 %v4631_v24 }
  0xaf   : > { %1874 = vmatmul.mubr.bf16.gmra.mrb[64].mxu0 %v732_v10 }
  0xb0   : > { %1881 = vmatprep.mubr.bf16.mxu0 %v4138_v60 }
  0xb3   : > { %3003 = vmatmul.mubr.bf16.vlgmr.msra.gmra.mrb[0].mxu1 %v4133_v56 }
  0xb4   : > { %3006 = vmatprep.mubr.bf16.mxu1 %v4177_v38  ;;  %3066 = vmatpush3.bf16.msra.mxu1 %v4026_v29 }
  0xb5   : > { %3059 = vmatprep.subr.bf16.mxu1 %v4196_v49 }
  0xb7   : > { %1882 = vmatmul.mubr.bf16.gmra.mrb[68].mxu0 %v4116_v63 }
  0xb8   : > { %1889 = vmatprep.mubr.bf16.mxu0 %v4148_v36  ;;  %3067 = vmatpush3.bf16.msra.mxu1 %v4196_v49 }
  0xb9   : > { %3060 = vmatprep.subr.bf16.mxu1 %v4212_v42 }
  0xbb   : > { %3007 = vmatmul.mubr.bf16.gmra.mrb[4].mxu1 %v4216_v14 }
  0xbc   : > { %3010 = vmatprep.mubr.bf16.mxu1 %v657_v5  ;;  %3068 = vmatpush3.bf16.msra.mxu1 %v4212_v42 }
  0xbd   : > { %3061 = vmatprep.subr.bf16.mxu1 %v4232_v2 }
  0xbf   : > { %1890 = vmatmul.mubr.bf16.gmra.mrb[72].mxu0 %v4138_v60 }
  0xc0   : > { %1897 = vmatprep.mubr.bf16.mxu0 %v761_v44  ;;  %3069 = vmatpush3.bf16.msra.mxu1 %v4232_v2 }
  0xc1   : > { %3062 = vmatprep.subr.bf16.mxu1 %v4242_v43 }
  0xc3   : > { %3011 = vmatmul.mubr.bf16.gmra.mrb[8].mxu1 %v665_v19 }
  0xc4   : > { %3014 = vmatprep.mubr.bf16.mxu1 %v4086_v22  ;;  %3070 = vmatpush3.bf16.msra.mxu1 %v4242_v43 }
  0xc5   : > { %3063 = vmatprep.subr.bf16.mxu1 %v3254_v31 }
  0xc7   : > { %1898 = vmatmul.mubr.bf16.gmra.mrb[76].mxu0 %v760_v11 }
  0xc8   : > { %3038 = vmatprep.mubr.bf16.mxu0 %v4191_v0  ;;  %3071 = vmatpush3.bf16.msra.mxu1 %v3254_v31 }
  0xc9   : > { %3064 = vmatprep.subr.bf16.mxu1 %v3255_v50 }
  0xcb   : > { %3015 = vmatmul.mubr.bf16.gmra.mrb[12].mxu1 %v4105_v6 }
  0xcc   : > { %3018 = vmatprep.mubr.bf16.mxu1 %v4113_v28  ;;  %3072 = vmatpush3.bf16.msra.mxu1 %v3255_v50 }
  0xcd   : > { %3065 = vmatprep.subr.bf16.mxu1 %v3256_v21 }
  0xcf   : > { %3039 = vmatmul.mubr.bf16.vlgmr.msra.gmra.mrb[80].mxu0 %v4226_v25 }
  0xd0   : > { %3042 = vmatprep.mubr.bf16.mxu0 %v726_v47  ;;  %3073 = vmatpush3.bf16.msra.mxu1 %v3256_v21 }
  0xd3   : > { %3019 = vmatmul.mubr.bf16.gmra.mrb[16].mxu1 %v4129_v30 }
  0xd4   : > { %3046 = vmatprep.mubr.bf16.mxu1 %v732_v10 }
  0xd7   : > { %3043 = vmatmul.mubr.bf16.gmra.mrb[84].mxu0 %v729_v34 }
  0xdb   : > { %3047 = vmatmul.mubr.bf16.vlgmr.msra.gmra.mrb[8].mxu1 %v4116_v63 }
  0xdc   : > { %3050 = vmatprep.mubr.bf16.mxu1 %v4138_v60 }
  0xe3   : > { %3051 = vmatmul.mubr.bf16.gmra.mrb[12].mxu1 %v4148_v36 }
  0xe4   : > { %3054 = vmatprep.mubr.bf16.mxu1 %v4159_v59 }
  0xeb   : > { %3055 = vmatmul.mubr.bf16.gmra.mrb[16].mxu1 %v762_v1 }
 0x102   : > { %v2684_v28 = vpop.f32.mrb[0].mxu0 }
 0x103   : > { %v2685_v6 = vpop.f32.mrb[1].mxu0 }
 0x104   : > { %v2686_v22 = vadd.f32 %v2685_v6, %v2684_v28  ;;  %v2687_v57 = vpop.f32.mrb[2].mxu0 }
 0x105   : > { %v2688_v29 = vpop.f32.mrb[3].mxu0 }
 0x106   : > { %v2689_v55 = vadd.f32 %v2688_v29, %v2687_v57 }
 0x10a   : > { %v2690_v37 = vpop.f32.mrb[4].mxu0 }
 0x10b   : > { %v2691_v45 = vpop.f32.mrb[5].mxu0 }
 0x10c   : > { %v2692_v63 = vadd.f32 %v2691_v45, %v2690_v37  ;;  %v2693_v30 = vpop.f32.mrb[6].mxu0 }
 0x10d   : > { %v2694_v56 = vpop.f32.mrb[7].mxu0 }
 0x10e   : > { %v4320_v60 = vadd.f32 %v2694_v56, %v2693_v30 }
 0x112   : > { %v2696_v36 = vpop.f32.mrb[8].mxu0 }
 0x113   : > { %v2697_v44 = vpop.f32.mrb[9].mxu0 }
 0x114   : > { %v4322_v11 = vadd.f32 %v2697_v44, %v2696_v36  ;;  %v2699_v27 = vpop.f32.mrb[10].mxu0 }
 0x115   : > { %v2700_v39 = vpop.f32.mrb[11].mxu0 }
 0x116   : > { %v4324_v1 = vadd.f32 %v2700_v39, %v2699_v27 }
 0x11a   : > { %v2702_v59 = vpop.f32.mrb[12].mxu0 }
 0x11b   : > { %v2703_v38 = vpop.f32.mrb[13].mxu0 }
 0x11c   : > { %v4326_v0 = vadd.f32 %v2703_v38, %v2702_v59  ;;  %v2705_v49 = vpop.f32.mrb[14].mxu0 }
 0x11d   : > { %v2706_v33 = vpop.f32.mrb[15].mxu0 }
 0x11e   : > { %v4328_v42 = vadd.f32 %v2706_v33, %v2705_v49 }
 0x122   : > { %v2708_v14 = vpop.f32.mrb[16].mxu0 }
 0x123   : > { %v2709_v52 = vpop.f32.mrb[17].mxu0 }
 0x124   : > { %v4330_v23 = vadd.f32 %v2709_v52, %v2708_v14  ;;  %v2711_v25 = vpop.f32.mrb[18].mxu0 }
 0x125   : > { %v2712_v2 = vpop.f32.mrb[19].mxu0 }
 0x126   : > { %v4332_v20 = vadd.f32 %v2712_v2, %v2711_v25 }
 0x12a   : > { %v2714_v7 = vpop.f32.mrb[20].mxu0 }
 0x12b   : > { %v2715_v35 = vpop.f32.mrb[21].mxu0 }
 0x12c   : > { %v4334_v16 = vadd.f32 %v2715_v35, %v2714_v7  ;;  %v2717_v43 = vpop.f32.mrb[22].mxu0 }
 0x12d   : > { %v2718_v5 = vpop.f32.mrb[23].mxu0 }
 0x12e   : > { %v4336_v47 = vadd.f32 %v2718_v5, %v2717_v43 }
 0x132   : > { %v2720_v31 = vpop.f32.mrb[24].mxu0 }
 0x133   : > { %v2721_v51 = vpop.f32.mrb[25].mxu0 }
 0x134   : > { %v4338_v13 = vadd.f32 %v2721_v51, %v2720_v31  ;;  %v2723_v8 = vpop.f32.mrb[26].mxu0 }
 0x135   : > { %v2724_v4 = vpop.f32.mrb[27].mxu0 }
 0x136   : > { %v4340_v50 = vadd.f32 %v2724_v4, %v2723_v8  ;;  %v2778_v28 = vpop.f32.mrb[20].mxu1 }
 0x137   : > { %v2779_v6 = vpop.f32.mrb[21].mxu1 }
 0x138   : > { %v2780_v57 = vadd.f32 %v2779_v6, %v2778_v28  ;;  %v2781_v29 = vpop.f32.mrb[22].mxu1 }
 0x139   : > { %v2782_v37 = vpop.f32.mrb[23].mxu1 }
 0x13a   : > { %v2726_v19 = vpop.f32.mrb[28].mxu0  ;;  %v2783_v30 = vadd.f32 %v2782_v37, %v2781_v29  ;;  %v4346_v36 = vadd.f32 %v2780_v57, %v2686_v22 }
 0x13b   : > { %v2727_v34 = vpop.f32.mrb[29].mxu0 }
 0x13c   : > { %v4342_v21 = vadd.f32 %v2727_v34, %v2726_v19  ;;  %v2729_v18 = vpop.f32.mrb[30].mxu0  ;;  %v4350_v59 = vadd.f32 %v2783_v30, %v2689_v55 }
 0x13d   : > { %v2730_v10 = vpop.f32.mrb[31].mxu0 }
 0x13e   : > { %v4344_v24 = vadd.f32 %v2730_v10, %v2729_v18  ;;  %v2784_v49 = vpop.f32.mrb[24].mxu1 }
 0x13f   : > { %v2785_v33 = vpop.f32.mrb[25].mxu1 }
 0x140   : > { %v2786_v14 = vadd.f32 %v2785_v33, %v2784_v49  ;;  %v2787_v52 = vpop.f32.mrb[26].mxu1 }
 0x141   : > { %v2788_v25 = vpop.f32.mrb[27].mxu1 }
 0x142   : > { %v2732_v45 = vpop.f32.mrb[32].mxu0  ;;  %v2789_v7 = vadd.f32 %v2788_v25, %v2787_v52  ;;  %v4354_v43 = vadd.f32 %v2786_v14, %v2692_v63 }
 0x143   : > { %v2733_v56 = vpop.f32.mrb[33].mxu0 }
 0x144   : > { %v4348_v44 = vadd.f32 %v2733_v56, %v2732_v45  ;;  %v2735_v27 = vpop.f32.mrb[34].mxu0  ;;  %v4359_v51 = vadd.f32 %v2789_v7, %v4320_v60 }
 0x145   : > { %v2736_v39 = vpop.f32.mrb[35].mxu0 }
 0x146   : > { %v4352_v38 = vadd.f32 %v2736_v39, %v2735_v27  ;;  %v2790_v8 = vpop.f32.mrb[28].mxu1 }
 0x147   : > { %v2791_v4 = vpop.f32.mrb[29].mxu1 }
 0x148   : > { %v2792_v19 = vadd.f32 %v2791_v4, %v2790_v8  ;;  %v2793_v34 = vpop.f32.mrb[30].mxu1 }
 0x149   : > { %v2794_v18 = vpop.f32.mrb[31].mxu1 }
 0x14a   : > { %v2738_v2 = vpop.f32.mrb[36].mxu0  ;;  %v2795_v28 = vadd.f32 %v2794_v18, %v2793_v34  ;;  %v4364_v63 = vadd.f32 %v2792_v19, %v4322_v11 }
 0x14b   : > { %v2739_v35 = vpop.f32.mrb[37].mxu0 }
 0x14c   : > { %v4356_v22 = vadd.f32 %v2739_v35, %v2738_v2  ;;  %v2741_v5 = vpop.f32.mrb[38].mxu0  ;;  %v4369_v60 = vadd.f32 %v2795_v28, %v4324_v1 }
 0x14d   : > { %v2742_v31 = vpop.f32.mrb[39].mxu0 }
 0x14e   : > { %v4361_v55 = vadd.f32 %v2742_v31, %v2741_v5  ;;  %v2796_v30 = vpop.f32.mrb[32].mxu1 }
 0x14f   : > { %v2797_v56 = vpop.f32.mrb[33].mxu1 }
 0x150   : > { %v2798_v27 = vadd.f32 %v2797_v56, %v2796_v30  ;;  %v2799_v39 = vpop.f32.mrb[34].mxu1 }
 0x151   : > { %v2800_v49 = vpop.f32.mrb[35].mxu1 }
 0x152   : > { %v2872_v10 = vpop.f32.mrb[40].mxu0  ;;  %v2801_v14 = vadd.f32 %v2800_v49, %v2799_v39  ;;  %v4374_v11 = vadd.f32 %v2798_v27, %v4326_v0 }
 0x153   : > { %v2873_v6 = vpop.f32.mrb[41].mxu0 }
 0x154   : > { %v4366_v57 = vadd.f32 %v2873_v6, %v2872_v10  ;;  %v2875_v29 = vpop.f32.mrb[42].mxu0  ;;  %v4379_v1 = vadd.f32 %v2801_v14, %v4328_v42 }
 0x155   : > { %v2876_v37 = vpop.f32.mrb[43].mxu0 }
 0x156   : > { %v4371_v45 = vadd.f32 %v2876_v37, %v2875_v29  ;;  %v2802_v5 = vpop.f32.mrb[36].mxu1 }
 0x157   : > { %v2803_v31 = vpop.f32.mrb[37].mxu1 }
 0x158   : > { %v2804_v8 = vadd.f32 %v2803_v31, %v2802_v5  ;;  %v2805_v4 = vpop.f32.mrb[38].mxu1 }
 0x159   : > { %v2806_v19 = vpop.f32.mrb[39].mxu1 }
 0x15a   : > { %v2878_v33 = vpop.f32.mrb[44].mxu0  ;;  %v3109_v18 = vadd.f32 %v2804_v8, %v4330_v23  ;;  %v2807_v10 = vadd.f32 %v2806_v19, %v2805_v4 }
 0x15b   : > { %v2879_v52 = vpop.f32.mrb[45].mxu0 }
 0x15c   : > { %v4376_v25 = vadd.f32 %v2879_v52, %v2878_v33  ;;  %v2881_v2 = vpop.f32.mrb[46].mxu0  ;;  %v3115_v29 = vadd.f32 %v2807_v10, %v4332_v20 }
 0x15d   : > { %v2882_v7 = vpop.f32.mrb[47].mxu0 }
 0x15e   : > { %v4381_v35 = vadd.f32 %v2882_v7, %v2881_v2  ;;  %v2808_v30 = vpop.f32.mrb[40].mxu1 }
 0x15f   : > { %v2809_v56 = vpop.f32.mrb[41].mxu1 }
 0x160   : > { %v2810_v27 = vadd.f32 %v2809_v56, %v2808_v30  ;;  %v2811_v39 = vpop.f32.mrb[42].mxu1 }
 0x161   : > { %v2812_v49 = vpop.f32.mrb[43].mxu1 }
 0x162   : > { %v2884_v34 = vpop.f32.mrb[48].mxu0  ;;  %v3106_v14 = vadd.f32 %v2810_v27, %v4334_v16  ;;  %v2813_v52 = vadd.f32 %v2812_v49, %v2811_v39 }
 0x163   : > { %v2885_v0 = vpop.f32.mrb[49].mxu0 }
 0x164   : > { %v4384_v28 = vadd.f32 %v2885_v0, %v2884_v34  ;;  %v2887_v6 = vpop.f32.mrb[50].mxu0  ;;  %v3112_v5 = vadd.f32 %v2813_v52, %v4336_v47 }
 0x165   : > { %v2888_v37 = vpop.f32.mrb[51].mxu0 }
 0x166   : > { %v4387_v42 = vadd.f32 %v2888_v37, %v2887_v6  ;;  %v2814_v8 = vpop.f32.mrb[44].mxu1 }
 0x167   : > { %v2815_v4 = vpop.f32.mrb[45].mxu1 }
 0x168   : > { %v2816_v19 = vadd.f32 %v2815_v4, %v2814_v8  ;;  %v2817_v34 = vpop.f32.mrb[46].mxu1 }
 0x169   : > { %v2818_v10 = vpop.f32.mrb[47].mxu1 }
 0x16a   : > { %v2890_v33 = vpop.f32.mrb[52].mxu0  ;;  %v3121_v6 = vadd.f32 %v2816_v19, %v4338_v13  ;;  %v2819_v37 = vadd.f32 %v2818_v10, %v2817_v34 }
 0x16b   : > { %v2891_v23 = vpop.f32.mrb[53].mxu0 }
 0x16c   : > { %v4390_v2 = vadd.f32 %v2891_v23, %v2890_v33  ;;  %v2893_v7 = vpop.f32.mrb[54].mxu0  ;;  %v3127_v27 = vadd.f32 %v2819_v37, %v4340_v50 }
 0x16d   : > { %v2894_v31 = vpop.f32.mrb[55].mxu0 }
 0x16e   : > { %v4393_v20 = vadd.f32 %v2894_v31, %v2893_v7  ;;  %v2820_v33 = vpop.f32.mrb[48].mxu1 }
 0x16f   : > { %v2821_v52 = vpop.f32.mrb[49].mxu1 }
 0x170   : > { %v2822_v7 = vadd.f32 %v2821_v52, %v2820_v33  ;;  %v2823_v31 = vpop.f32.mrb[50].mxu1 }
 0x171   : > { %v2824_v8 = vpop.f32.mrb[51].mxu1 }
 0x172   : > { %v2896_v0 = vpop.f32.mrb[56].mxu0  ;;  %v3118_v13 = vadd.f32 %v2822_v7, %v4342_v21  ;;  %v2825_v19 = vadd.f32 %v2824_v8, %v2823_v31 }
 0x173   : > { %v2897_v16 = vpop.f32.mrb[57].mxu0 }
 0x174   : > { %v2898_v30 = vadd.f32 %v2897_v16, %v2896_v0  ;;  %v2899_v56 = vpop.f32.mrb[58].mxu0  ;;  %v3124_v50 = vadd.f32 %v2825_v19, %v4344_v24 }
 0x175   : > { %v2900_v39 = vpop.f32.mrb[59].mxu0 }
 0x176   : > { %v2901_v49 = vadd.f32 %v2900_v39, %v2899_v56  ;;  %v4397_v47 = vadd.f32 %v3109_v18, %v2898_v30  ;;  %v2826_v30 = vpop.f32.mrb[52].mxu1 }
 0x177   : > { %v2827_v56 = vpop.f32.mrb[53].mxu1 }
 0x178   : > { %v4399_v23 = vadd.f32 %v3115_v29, %v2901_v49  ;;  %v2828_v39 = vadd.f32 %v2827_v56, %v2826_v30  ;;  %v2829_v49 = vpop.f32.mrb[54].mxu1 }
 0x179   : > { %v2830_v33 = vpop.f32.mrb[55].mxu1 }
 0x17a   : > { %v2902_v4 = vpop.f32.mrb[60].mxu0  ;;  %v3133_v21 = vadd.f32 %v2828_v39, %v4348_v44  ;;  %v2831_v7 = vadd.f32 %v2830_v33, %v2829_v49 }
 0x17b   : > { %v2903_v34 = vpop.f32.mrb[61].mxu0 }
 0x17c   : > { %v2904_v10 = vadd.f32 %v2903_v34, %v2902_v4  ;;  %v2905_v0 = vpop.f32.mrb[62].mxu0  ;;  %v3139_v24 = vadd.f32 %v2831_v7, %v4352_v38 }
 0x17d   : > { %v2906_v37 = vpop.f32.mrb[63].mxu0 }
 0x17e   : > { %v2907_v16 = vadd.f32 %v2906_v37, %v2905_v0  ;;  %v4403_v18 = vadd.f32 %v3106_v14, %v2904_v10  ;;  %v2832_v10 = vpop.f32.mrb[56].mxu1 }
 0x17f   : > { %v2833_v0 = vpop.f32.mrb[57].mxu1 }
 0x180   : > { %v4405_v29 = vadd.f32 %v3112_v5, %v2907_v16  ;;  %v2834_v37 = vadd.f32 %v2833_v0, %v2832_v10  ;;  %v2835_v16 = vpop.f32.mrb[58].mxu1 }
 0x181   : > { %v2836_v30 = vpop.f32.mrb[59].mxu1 }
 0x182   : > { %v2908_v52 = vpop.f32.mrb[64].mxu0  ;;  %v3130_v44 = vadd.f32 %v2834_v37, %v4356_v22  ;;  %v2837_v39 = vadd.f32 %v2836_v30, %v2835_v16 }
 0x183   : > { %v2909_v31 = vpop.f32.mrb[65].mxu0 }
 0x184   : > { %v2910_v8 = vadd.f32 %v2909_v31, %v2908_v52  ;;  %v2911_v4 = vpop.f32.mrb[66].mxu0  ;;  %v3136_v38 = vadd.f32 %v2837_v39, %v4361_v55 }
 0x185   : > { %v2912_v19 = vpop.f32.mrb[67].mxu0 }
 0x186   : > { %v2913_v34 = vadd.f32 %v2912_v19, %v2911_v4  ;;  %v4409_v14 = vadd.f32 %v3121_v6, %v2910_v8  ;;  %v3004_v8 = vpop.f32.mrb[0].mxu1 }
 0x187   : > { %v1521_v4 = vpop.f32.mrb[1].mxu1 }
 0x188   : > { %v4411_v5 = vadd.f32 %v3127_v27, %v2913_v34  ;;  %v3075_v27 = vadd.f32 %v4354_v43, %v3004_v8  ;;  %v3079_v34 = vadd.f32 %v4346_v36, %v1521_v4  ;;  %v3005_v10 = vpop.f32.mrb[2].mxu1 }
 0x189   : > { %v3083_v22 = vadd.f32 %v4359_v51, %v3005_v10  ;;  %v1524_v0 = vpop.f32.mrb[3].mxu1 }
 0x18a   : > { %v2914_v56 = vpop.f32.mrb[68].mxu0  ;;  %v3076_v16 = vadd.f32 %v3075_v27, %v4376_v25  ;;  %v3087_v55 = vadd.f32 %v4350_v59, %v1524_v0 }
 0x18b   : > { %v2915_v49 = vpop.f32.mrb[69].mxu0  ;;  %v3084_v43 = vadd.f32 %v3083_v22, %v4381_v35 }
 0x18c   : > { %v2916_v33 = vadd.f32 %v2915_v49, %v2914_v56  ;;  %v2917_v52 = vpop.f32.mrb[70].mxu0  ;;  %v3088_v49 = vadd.f32 %v3087_v55, %v4371_v45 }
 0x18d   : > { %v2918_v7 = vpop.f32.mrb[71].mxu0 }
 0x18e   : > { %v2919_v31 = vadd.f32 %v2918_v7, %v2917_v52  ;;  %v4415_v6 = vadd.f32 %v3118_v13, %v2916_v33  ;;  %v3080_v13 = vadd.f32 %v3079_v34, %v4366_v57  ;;  %v3008_v51 = vpop.f32.mrb[4].mxu1 }
 0x18f   : > { %v3091_v52 = vadd.f32 %v4374_v11, %v3008_v51  ;;  %v1537_v7 = vpop.f32.mrb[5].mxu1 }
 0x190   : > { %v4418_v19 = vadd.f32 %v3124_v50, %v2919_v31  ;;  %v3095_v59 = vadd.f32 %v4364_v63, %v1537_v7  ;;  %v3009_v31 = vpop.f32.mrb[6].mxu1 }
 0x191   : > { %v3099_v57 = vadd.f32 %v4379_v1, %v3009_v31  ;;  %v1540_v8 = vpop.f32.mrb[7].mxu1  ;;  %v3092_v35 = vadd.f32 %v3091_v52, %v4390_v2 }
 0x192   : > { %v2920_v37 = vpop.f32.mrb[72].mxu0  ;;  %v3103_v45 = vadd.f32 %v4369_v60, %v1540_v8 }
 0x193   : > { %v2921_v30 = vpop.f32.mrb[73].mxu0 }
 0x194   : > { %v2922_v56 = vadd.f32 %v2921_v30, %v2920_v37  ;;  %v2923_v39 = vpop.f32.mrb[74].mxu0  ;;  %v3104_v63 = vadd.f32 %v3103_v45, %v4387_v42 }
 0x195   : > { %v2924_v50 = vpop.f32.mrb[75].mxu0 }
 0x196   : > { %v2925_v36 = vadd.f32 %v2924_v50, %v2923_v39  ;;  %v4427_v33 = vadd.f32 %v3133_v21, %v2922_v56  ;;  %v3096_v21 = vadd.f32 %v3095_v59, %v4384_v28 }
 0x198   : > { %v4430_v25 = vadd.f32 %v3139_v24, %v2925_v36  ;;  %v3100_v24 = vadd.f32 %v3099_v57, %v4393_v20 }
 0x19a   : > { %v2926_v27 = vpop.f32.mrb[76].mxu0 }
 0x19b   : > { %v2927_v4 = vpop.f32.mrb[77].mxu0 }
 0x19c   : > { %v2928_v34 = vadd.f32 %v2927_v4, %v2926_v27  ;;  %v2929_v11 = vpop.f32.mrb[78].mxu0 }
 0x19d   : > { %v2930_v10 = vpop.f32.mrb[79].mxu0 }
 0x19e   : > { %v2931_v22 = vadd.f32 %v2930_v10, %v2929_v11  ;;  %v4439_v0 = vadd.f32 %v3130_v44, %v2928_v34 }
 0x1a0   : > { %v4441_v1 = vadd.f32 %v3136_v38, %v2931_v22 }
 0x1a2   : > { %v3040_v37 = vpop.f32.mrb[80].mxu0 }
 0x1a3   : > { %v3077_v2 = vadd.f32 %v3076_v16, %v3040_v37  ;;  %v1940_v55 = vpop.f32.mrb[81].mxu0 }
 0x1a4   : > { %v3081_v60 = vadd.f32 %v3080_v13, %v1940_v55  ;;  %v3041_v30 = vpop.f32.mrb[82].mxu0 }
 0x1a5   : > { %v3085_v56 = vadd.f32 %v3084_v43, %v3041_v30  ;;  %v1943_v28 = vpop.f32.mrb[83].mxu0 }
 0x1a6   : > { %v3089_v42 = vadd.f32 %v3088_v49, %v1943_v28 }
 0x1a7   : > { %v2040_v20 = vpack.c.bf16 %v3085_v56, %v3077_v2 }
 0x1a8   : > { %v2039_v44 = vpack.c.bf16 %v3089_v42, %v3081_v60 }
 0x1a9   : > { %2659 = vst [vmem:[%s4448_s20 + $0x8] sm:$0xff] %v2040_v20   ;;  %v2141_v38 = vunpack.c.l.bf16 %v2040_v20  ;;  %v2142_v39 = vunpack.c.h.bf16 %v2040_v20 }
 0x1aa   : > { %2604 = vst [vmem:[%s4448_s20] sm:$0xff] %v2039_v44   ;;  %v2139_v16 = vunpack.c.l.bf16 %v2039_v44  ;;  %v2140_v13 = vunpack.c.h.bf16 %v2039_v44  ;;  %v3044_v50 = vpop.f32.mrb[84].mxu0 }
 0x1ab   : > { %v3093_v43 = vadd.f32 %v3092_v35, %v3044_v50  ;;  %v1956_v36 = vpop.f32.mrb[85].mxu0  ;;  %v2161_v51 = vmul.f32 %v2141_v38, %v3504_v15  ;;  %v2162_v31 = vmul.f32 %v2142_v39, %v3511_v17 }
 0x1ac   : > { %v2159_v52 = vmul.f32 %v2139_v16, %v3472_v58  ;;  %v2160_v7 = vmul.f32 %v2140_v13, %v3478_v62  ;;  %v3097_v59 = vadd.f32 %v3096_v21, %v1956_v36  ;;  %v3045_v49 = vpop.f32.mrb[86].mxu0 }
 0x1ad   : > { %v3101_v57 = vadd.f32 %v3100_v24, %v3045_v49  ;;  %v1959_v8 = vpop.f32.mrb[87].mxu0  ;;  %v2206_v11 = vmul.f32 %v2161_v51, %v2161_v51  ;;  %v2207_v58 = vmul.f32 %v2162_v31, %v2162_v31 }
 0x1ae   : > { %v2179_v27 = vadd.f32 %v2160_v7, %v2159_v52  ;;  %v2204_v45 = vmul.f32 %v2159_v52, %v2159_v52  ;;  %v2205_v4 = vmul.f32 %v2160_v7, %v2160_v7  ;;  %v3105_v34 = vadd.f32 %v3104_v63, %v1959_v8  ;;  %v3048_v42 = vpop.f32.mrb[8].mxu1 }
 0x1af   : > { %v2042_v35 = vpack.c.bf16 %v3101_v57, %v3093_v43  ;;  %v3108_v44 = vadd.f32 %v4403_v18, %v3048_v42  ;;  %v1972_v38 = vpop.f32.mrb[9].mxu1 }
 0x1b0   : > { %v2180_v10 = vadd.f32 %v2179_v27, %v2161_v51  ;;  %v2224_v15 = vadd.f32 %v2205_v4, %v2204_v45  ;;  %v2041_v22 = vpack.c.bf16 %v3105_v34, %v3097_v59  ;;  %v3111_v50 = vadd.f32 %v4397_v47, %v1972_v38 }
 0x1b1   : > { %2661 = vst [vmem:[%s4448_s20 + $0x18] sm:$0xff] %v2042_v35   ;;  %v2145_v62 = vunpack.c.l.bf16 %v2042_v35  ;;  %v2146_v55 = vunpack.c.h.bf16 %v2042_v35 }
 0x1b2   : > { %v2225_v37 = vadd.f32 %v2224_v15, %v2206_v11  ;;  %2660 = vst [vmem:[%s4448_s20 + $0x10] sm:$0xff] %v2041_v22   ;;  %v2143_v21 = vunpack.c.l.bf16 %v2041_v22  ;;  %v2144_v2 = vunpack.c.h.bf16 %v2041_v22  ;;  %v2181_v17 = vadd.f32 %v2180_v10, %v2162_v31 }
 0x1b3   : > { %v2165_v63 = vmul.f32 %v2145_v62, %v3605_v9  ;;  %v2166_v20 = vmul.f32 %v2146_v55, %v3612_v12 }
 0x1b4   : > { %v2163_v24 = vmul.f32 %v2143_v21, %v3561_v40  ;;  %v2164_v60 = vmul.f32 %v2144_v2, %v3568_v46  ;;  %v2226_v30 = vadd.f32 %v2225_v37, %v2207_v58  ;;  %v3049_v40 = vpop.f32.mrb[10].mxu1 }
 0x1b5   : > { %v3114_v46 = vadd.f32 %v4405_v29, %v3049_v40  ;;  %v1975_v43 = vpop.f32.mrb[11].mxu1  ;;  %v2210_v9 = vmul.f32 %v2165_v63, %v2165_v63  ;;  %v2211_v7 = vmul.f32 %v2166_v20, %v2166_v20 }
 0x1b6   : > { %v2182_v56 = vadd.f32 %v2181_v17, %v2163_v24  ;;  %v2208_v28 = vmul.f32 %v2163_v24, %v2163_v24  ;;  %v2209_v16 = vmul.f32 %v2164_v60, %v2164_v60  ;;  %v3117_v52 = vadd.f32 %v4399_v23, %v1975_v43  ;;  %v3052_v27 = vpop.f32.mrb[12].mxu1 }
 0x1b7   : > { %v2044_v12 = vpack.c.bf16 %v3114_v46, %v3108_v44  ;;  %v3120_v29 = vadd.f32 %v4415_v6, %v3052_v27  ;;  %v1988_v4 = vpop.f32.mrb[13].mxu1 }
 0x1b8   : > { %v2183_v39 = vadd.f32 %v2182_v56, %v2164_v60  ;;  %v2227_v13 = vadd.f32 %v2226_v30, %v2208_v28  ;;  %v2043_v49 = vpack.c.bf16 %v3117_v52, %v3111_v50  ;;  %v3123_v35 = vadd.f32 %v4409_v14, %v1988_v4  ;;  %v3053_v11 = vpop.f32.mrb[14].mxu1 }
 0x1b9   : > { %2663 = vst [vmem:[%s4448_s20 + $0x28] sm:$0xff] %v2044_v12   ;;  %v2149_v31 = vunpack.c.l.bf16 %v2044_v12  ;;  %v2150_v45 = vunpack.c.h.bf16 %v2044_v12  ;;  %v3126_v15 = vadd.f32 %v4418_v19, %v3053_v11  ;;  %v1991_v22 = vpop.f32.mrb[15].mxu1 }
 0x1ba   : > { %v2184_v36 = vadd.f32 %v2183_v39, %v2165_v63  ;;  %v2228_v51 = vadd.f32 %v2227_v13, %v2209_v16  ;;  %2662 = vst [vmem:[%s4448_s20 + $0x20] sm:$0xff] %v2043_v49   ;;  %v2147_v47 = vunpack.c.l.bf16 %v2043_v49  ;;  %v2148_v8 = vunpack.c.h.bf16 %v2043_v49 }
 0x1bb   : > { %v2169_v10 = vmul.f32 %v2149_v31, %v3743_v26  ;;  %v3129_v37 = vadd.f32 %v4411_v5, %v1991_v22  ;;  %v2170_v6 = vmul.f32 %v2150_v45, %v3751_v32  ;;  %v2046_v21 = vpack.c.bf16 %v3126_v15, %v3120_v29  ;;  %v4634_v45 = vld [vmem:[#allocation4_spill] sm:$0xff] }
 0x1bc   : > { %v2185_v18 = vadd.f32 %v2184_v36, %v2166_v20  ;;  %v2229_v59 = vadd.f32 %v2228_v51, %v2210_v9  ;;  %v2167_v34 = vmul.f32 %v2147_v47, %v3676_v48  ;;  %v2168_v23 = vmul.f32 %v2148_v8, %v3684_v53  ;;  %v4632_v47 = vld [vmem:[#allocation2_spill] sm:$0xff]  ;;  %v4633_v8 = vld [vmem:[#allocation3_spill] sm:$0xff] }
 0x1bd   : > { %v2045_v53 = vpack.c.bf16 %v3129_v37, %v3123_v35  ;;  %v2214_v55 = vmul.f32 %v2169_v10, %v2169_v10  ;;  %2665 = vst [vmem:[%s4448_s20 + $0x38] sm:$0xff] %v2046_v21   ;;  %v2153_v14 = vunpack.c.l.bf16 %v2046_v21  ;;  %v2215_v63 = vmul.f32 %v2170_v6, %v2170_v6 }
 0x1be   : > { %v2230_v57 = vadd.f32 %v2229_v59, %v2211_v7  ;;  %v2212_v58 = vmul.f32 %v2167_v34, %v2167_v34  ;;  %v2186_v62 = vadd.f32 %v2185_v18, %v2167_v34  ;;  %v2213_v48 = vmul.f32 %v2168_v23, %v2168_v23  ;;  %v3056_v30 = vpop.f32.mrb[16].mxu1 }
 0x1bf   : > { %2664 = vst [vmem:[%s4448_s20 + $0x30] sm:$0xff] %v2045_v53   ;;  %v2151_v24 = vunpack.c.l.bf16 %v2045_v53  ;;  %v2152_v26 = vunpack.c.h.bf16 %v2045_v53  ;;  %v2154_v56 = vunpack.c.h.bf16 %v2046_v21  ;;  %v3132_v5 = vadd.f32 %v4439_v0, %v3056_v30  ;;  %v2004_v28 = vpop.f32.mrb[17].mxu1 }
 0x1c0   : > { %v2231_v2 = vadd.f32 %v2230_v57, %v2212_v58  ;;  %v2187_v17 = vadd.f32 %v2186_v62, %v2168_v23  ;;  %v3057_v38 = vpop.f32.mrb[18].mxu1  ;;  %v3135_v39 = vadd.f32 %v4427_v33, %v2004_v28  ;;  %v2173_v50 = vmul.f32 %v2153_v14, %v3862_v41  ;;  %v4635_v23 = vld [vmem:[#allocation5_spill] sm:$0xff] }
 0x1c1   : > { %v2171_v32 = vmul.f32 %v2151_v24, %v3802_v61  ;;  %v2172_v42 = vmul.f32 %v2152_v26, %v3811_v3  ;;  %v3138_v16 = vadd.f32 %v4441_v1, %v3057_v38  ;;  %v2007_v13 = vpop.f32.mrb[19].mxu1  ;;  %v2174_v3 = vmul.f32 %v2154_v56, %v3874_v54 }
 0x1c2   : > { %v2188_v60 = vadd.f32 %v2187_v17, %v2169_v10  ;;  %v2232_v19 = vadd.f32 %v2231_v2, %v2213_v48  ;;  %v3141_v61 = vadd.f32 %v4430_v25, %v2007_v13  ;;  %v2218_v33 = vmul.f32 %v2173_v50, %v2173_v50 }
 0x1c3   : > { %v2216_v46 = vmul.f32 %v2171_v32, %v2171_v32  ;;  %v2048_v43 = vpack.c.bf16 %v3138_v16, %v3132_v5  ;;  %v2217_v36 = vmul.f32 %v2172_v42, %v2172_v42  ;;  %v2219_v59 = vmul.f32 %v2174_v3, %v2174_v3 }
 0x1c4   : > { %v2189_v20 = vadd.f32 %v2188_v60, %v2170_v6  ;;  %v2233_v44 = vadd.f32 %v2232_v19, %v2214_v55  ;;  %v2047_v52 = vpack.c.bf16 %v3141_v61, %v3135_v39 }
 0x1c5   : > { %2667 = vst [vmem:[%s4448_s20 + $0x48] sm:$0xff] %v2048_v43   ;;  %v2157_v7 = vunpack.c.l.bf16 %v2048_v43  ;;  %v2158_v57 = vunpack.c.h.bf16 %v2048_v43 }
 0x1c6   : > { %v2190_v40 = vadd.f32 %v2189_v20, %v2171_v32  ;;  %v2234_v0 = vadd.f32 %v2233_v44, %v2215_v63  ;;  %2666 = vst [vmem:[%s4448_s20 + $0x40] sm:$0xff] %v2047_v52   ;;  %v2155_v41 = vunpack.c.l.bf16 %v2047_v52  ;;  %v2156_v18 = vunpack.c.h.bf16 %v2047_v52 }
 0x1c7   : > { %v2177_v29 = vmul.f32 %v2157_v7, %v4634_v45  ;;  %v2178_v35 = vmul.f32 %v2158_v57, %v4635_v23 }
 0x1c8   : > { %v2191_v9 = vadd.f32 %v2190_v40, %v2172_v42  ;;  %v2235_v51 = vadd.f32 %v2234_v0, %v2216_v46  ;;  %v2175_v25 = vmul.f32 %v2155_v41, %v4632_v47  ;;  %v2176_v54 = vmul.f32 %v2156_v18, %v4633_v8 }
 0x1c9   : > { %v2222_v22 = vmul.f32 %v2177_v29, %v2177_v29  ;;  %v2223_v37 = vmul.f32 %v2178_v35, %v2178_v35 }
 0x1ca   : > { %v2192_v12 = vadd.f32 %v2191_v9, %v2173_v50  ;;  %v2236_v1 = vadd.f32 %v2235_v51, %v2217_v36  ;;  %v2220_v34 = vmul.f32 %v2175_v25, %v2175_v25  ;;  %v2221_v10 = vmul.f32 %v2176_v54, %v2176_v54 }
 0x1cc   : > { %v2237_v49 = vadd.f32 %v2236_v1, %v2218_v33  ;;  %v2193_v31 = vadd.f32 %v2192_v12, %v2174_v3 }
 0x1ce   : > { %v2238_v27 = vadd.f32 %v2237_v49, %v2219_v59  ;;  %v2194_v4 = vadd.f32 %v2193_v31, %v2175_v25 }
 0x1d0   : > { %v2195_v11 = vadd.f32 %v2194_v4, %v2176_v54  ;;  %v2239_v15 = vadd.f32 %v2238_v27, %v2220_v34 }
 0x1d2   : > { %v2196_v58 = vadd.f32 %v2195_v11, %v2177_v29  ;;  %v2240_v62 = vadd.f32 %v2239_v15, %v2221_v10 }
 0x1d4   : > { %v2197_v6 = vadd.f32 %v2196_v58, %v2178_v35  ;;  %v2241_v21 = vadd.f32 %v2240_v62, %v2222_v22 }
 0x1d6   : > { %v2198_v48 = vrot.slane %v2197_v6, 4  ;;  %v2242_v2 = vadd.f32 %v2241_v21, %v2223_v37 }
 0x1d8   : > { %v2199_v53 = vadd.f32 %v2198_v48, %v2197_v6  ;;  %v2243_v17 = vrot.slane %v2242_v2, 4 }
 0x1da   : > { %v2200_v55 = vrot.slane %v2199_v53, 2  ;;  %v2244_v14 = vadd.f32 %v2243_v17, %v2242_v2 }
 0x1dc   : > { %v2201_v24 = vadd.f32 %v2200_v55, %v2199_v53  ;;  %v2245_v26 = vrot.slane %v2244_v14, 2 }
 0x1de   : > { %v2202_v60 = vrot.slane %v2201_v24, 1  ;;  %v2246_v19 = vadd.f32 %v2245_v26, %v2244_v14 }
 0x1e0   : > { %v2247_v30 = vrot.slane %v2246_v19, 1  ;;  %v2203_v63 = vadd.f32 %v2202_v60, %v2201_v24 }
 0x1e2   : > { %v2248_v56 = vadd.f32 %v2247_v30, %v2246_v19 }
 0x1e4   : > { %v2250_v5 = vsel %vm705_vm5, %v2203_v63, %v2248_v56 }
 0x1e5   : > { %v2252_v28 = vsel %vm2251_vm10, %v2250_v5, 0.0 }
 0x1e6   : > { %2253 = vst [vmem:[%s235_s24] sm:$0xff] %v2252_v28 }
 0x1e7 PF: > { %s16_s18 = sadd.s32 1, %s3263_s18  }
 0x1e8   : > { %p13_p4 = scmp.ge.s32.totalorder %s16_s18, 4  }
 0x1ea   :  { %15 = sbr.rel (!%p13_p4) target bundleno = 1 (0x1), region = 80 }

</bundles_post_ra>
